<compile_context>
chip_gen: v7x
topology: tpu7x:2x2x1
jax: 0.10.0
libtpu: 0.0.40
codegen_flags: <defaults>
</compile_context>

<pallas_src>
import functools

import jax
import jax.numpy as jnp
from jax.experimental import pallas as pl
from jax.experimental.pallas import tpu as pltpu


# -----------------------------------------------------------------------------
# Fused Pallas kernel: [Conv3x3 -> ReLU -> Conv1x1 -> per-head post] x 4 heads
# -----------------------------------------------------------------------------
def _make_fused_kernel(embed_dim):
    # Fused output channel layout (static):
    #   [0 : embed_dim)                 embed      (L2-normalized)
    #   [embed_dim : embed_dim+4)       quaternion (L2-normalized)
    #   [embed_dim+4 : embed_dim+7)     translation (raw)
    #   [embed_dim+7]                   confidence (sigmoid)
    #   [embed_dim+8 : embed_dim+12)    bbox       (raw)
    #   [embed_dim+12 : out_pad)        zero lane padding (sliced away in glue)
    EMBED_END = embed_dim
    QUAT_END = embed_dim + 4
    CONF_IDX = embed_dim + 7
    embed_lane_aligned = (embed_dim % 128 == 0)

    def kernel(x_ref, w1_ref, b1_ref, w2_ref, b2_ref, o_ref):
        x = x_ref[...]                                              # (tile_n, K_pad) bf16
        # Conv3x3 (as matmul) + bias + ReLU, f32 accumulation on the MXU.
        h = jnp.dot(x, w1_ref[...], preferred_element_type=jnp.float32)
        h = jnp.maximum(h + b1_ref[...], 0.0)                       # (tile_n, 384) f32
        # Conv1x1 (block-diagonal fused weights) + bias.
        y = jnp.dot(h.astype(jnp.bfloat16), w2_ref[...],
                    preferred_element_type=jnp.float32) + b2_ref[...]

        # ---- epilogue (trimmed): one iota, one y*y, narrow EUP work --------
        idx = jax.lax.broadcasted_iota(jnp.int32, y.shape, 1)
        quat_mask = (idx >= EMBED_END) & (idx < QUAT_END)
        conf_mask = idx == CONF_IDX

        y2 = y * y
        if embed_lane_aligned:
            # embed occupies lanes [0, embed_dim): aligned slice, no mask.
            e_sq = jnp.sum(y2[:, :EMBED_END], axis=-1, keepdims=True)
        else:
            e_sq = jnp.sum(jnp.where(idx < EMBED_END, y2, 0.0),
                           axis=-1, keepdims=True)
        q_sq = jnp.sum(jnp.where(quat_mask, y2, 0.0), axis=-1, keepdims=True)

        # F.normalize semantics: x / max(||x||_2, 1e-12).  Exact divide on a
        # (tile_n, 1) column is nearly free and avoids approx-recip error.
        inv_e = 1.0 / jnp.maximum(jnp.sqrt(e_sq), 1e-12)
        inv_q = 1.0 / jnp.maximum(jnp.sqrt(q_sq), 1e-12)

        # Sigmoid only on the single confidence column (not all 256 lanes).
        conf_col = jnp.sum(jnp.where(conf_mask, y, 0.0), axis=-1, keepdims=True)
        sig_col = jax.nn.sigmoid(conf_col)

        scale = jnp.where(idx < EMBED_END, inv_e,
                          jnp.where(quat_mask, inv_q, 1.0))
        y = y * scale
        y = jnp.where(conf_mask, sig_col, y)

        o_ref[...] = y                                              # lane-dense store

    return kernel


def fused_heads(x_patch, params, embed_dim, tile_n, single_buffer_weights=True):
    """x_patch: (N, K_pad) bf16 im2col rows.  Returns (N, out_pad) float32."""
    N, Kdim = x_patch.shape
    w1, b1, w2, b2 = params["w1"], params["b1"], params["w2"], params["b2"]
    hid = w1.shape[1]
    out_pad = w2.shape[1]
    assert N % tile_n == 0

    # Constant-index weight/bias operands: single-buffer them (fetched once;
    # default double-buffering would waste their full VMEM footprint again).
    const_kw = dict(pipeline_mode=pl.Buffered(1)) if single_buffer_weights else {}

    # VMEM footprint: x (bf16, double-buffered), out (f32, double-buffered),
    # weights/biases, plus f32 h / y temps.  2x headroom, clamped to
    # [32 MiB default, 64 MiB v7x per-TC physical].
    wbuf = 1 if single_buffer_weights else 2
    footprint = (2 * tile_n * Kdim * 2                      # x double-buffer
                 + 2 * tile_n * out_pad * 4                 # out double-buffer
                 + wbuf * (Kdim * hid * 2 + hid * out_pad * 2
                           + (hid + out_pad) * 4)           # weights + biases
                 + tile_n * (hid + out_pad) * 4)            # h / y temps
    vmem_limit = int(min(max(2 * footprint, 32 * 2 ** 20), 64 * 2 ** 20))

    kernel = _make_fused_kernel(embed_dim)
    return pl.pallas_call(
        kernel,
        out_shape=jax.ShapeDtypeStruct((N, out_pad), jnp.float32),
        grid_spec=pltpu.PrefetchScalarGridSpec(
            num_scalar_prefetch=0,
            grid=(N // tile_n,),
            in_specs=[
                pl.BlockSpec((tile_n, Kdim), lambda i: (i, 0)),          # activations
                pl.BlockSpec((Kdim, hid), lambda i: (0, 0), **const_kw),  # fused W1
                pl.BlockSpec((1, hid), lambda i: (0, 0), **const_kw),     # fused b1
                pl.BlockSpec((hid, out_pad), lambda i: (0, 0), **const_kw),  # W2 blkdiag
                pl.BlockSpec((1, out_pad), lambda i: (0, 0), **const_kw),    # fused b2
            ],
            out_specs=pl.BlockSpec((tile_n, out_pad), lambda i: (i, 0)),
        ),
        compiler_params=pltpu.CompilerParams(
            dimension_semantics=("parallel",),
            vmem_limit_bytes=vmem_limit,
        ),
    )(x_patch, w1, b1, w2, b2)


# -----------------------------------------------------------------------------
# Glue: im2col, fused parameter packing, quaternion math, full forward
# -----------------------------------------------------------------------------
def im2col_3x3(x):
    """x: (B, C, H, W) -> (B*H*W, C*9) with col order (c, kh, kw); zero pad=1."""
    # TODO(synk): replace with an in-kernel halo-tiled 3x3 conv for production
    # feature-map sizes (cuts activation HBM reads up to ~9x, v5e especially).
    B, C, H, W = x.shape
    xp = jnp.pad(x, ((0, 0), (0, 0), (1, 1), (1, 1)))
    patches = []
    for kh in range(3):
        for kw in range(3):
            patches.append(xp[:, :, kh:kh + H, kw:kw + W])          # (B, C, H, W)
    p = jnp.stack(patches, axis=2)                                  # (B, C, 9, H, W)
    p = p.transpose(0, 3, 4, 1, 2)                                  # (B, H, W, C, 9)
    return p.reshape(B * H * W, C * 9)


def _init_conv(key, cin, cout, ksize):
    """Mimic nn.Conv2d default init (uniform +-1/sqrt(fan_in)), deterministic."""
    fan_in = cin * ksize * ksize
    bound = 1.0 / (fan_in ** 0.5)
    kw, kb = jax.random.split(key)
    w = jax.random.uniform(kw, (cout, cin, ksize, ksize), jnp.float32, -bound, bound)
    b = jax.random.uniform(kb, (cout,), jnp.float32, -bound, bound)
    return w, b


def init_params(key, feature_dim, embed_dim=128):
    """Build per-head Conv2d params (torch-style init) and pack them fused.

    W1 rows (contraction dim K = feature_dim*9) are zero-padded to a multiple
    of 128 so the MXU K-dimension and the activation DMA are lane-dense.
    """
    heads = (("embed", 128, embed_dim), ("pose", 128, 7),
             ("conf", 64, 1), ("bbox", 64, 4))
    K = feature_dim * 9
    K_pad = ((K + 127) // 128) * 128                                # lane-dense K
    hid_total = sum(h for _, h, _ in heads)                         # 384
    out_total = sum(o for _, _, o in heads)                         # embed_dim + 12
    out_pad = ((out_total + 127) // 128) * 128                      # lane-dense width

    ks = jax.random.split(key, 2 * len(heads))
    w1_cat = jnp.zeros((K_pad, hid_total), jnp.float32)
    b1_cat = jnp.zeros((hid_total,), jnp.float32)
    w2_blk = jnp.zeros((hid_total, out_pad), jnp.float32)
    b2_cat = jnp.zeros((out_pad,), jnp.float32)

    h_off = o_off = 0
    for i, (_, hidden, out_ch) in enumerate(heads):
        w1, b1 = _init_conv(ks[2 * i], feature_dim, hidden, 3)
        w2, b2 = _init_conv(ks[2 * i + 1], hidden, out_ch, 1)
        w1_cat = w1_cat.at[:K, h_off:h_off + hidden].set(w1.reshape(hidden, K).T)
        b1_cat = b1_cat.at[h_off:h_off + hidden].set(b1)
        w2_blk = w2_blk.at[h_off:h_off + hidden, o_off:o_off + out_ch].set(
            w2.reshape(out_ch, hidden).T)
        b2_cat = b2_cat.at[o_off:o_off + out_ch].set(b2)
        h_off += hidden
        o_off += out_ch

    return {
        "w1": w1_cat.astype(jnp.bfloat16),
        "b1": b1_cat.reshape(1, hid_total),
        "w2": w2_blk.astype(jnp.bfloat16),
        "b2": b2_cat.reshape(1, out_pad),
    }


def quaternion_to_matrix(q):
    """q: (B, 4) real-first (w, x, y, z) -> (B, 3, 3). (pytorch3d convention)"""
    r, i, j, k = q[:, 0], q[:, 1], q[:, 2], q[:, 3]
    two_s = 2.0 / jnp.sum(q * q, axis=-1)
    o = jnp.stack(
        [
            1 - two_s * (j * j + k * k), two_s * (i * j - k * r), two_s * (i * k + j * r),
            two_s * (i * j + k * r), 1 - two_s * (i * i + k * k), two_s * (j * k - i * r),
            two_s * (i * k - j * r), two_s * (j * k + i * r), 1 - two_s * (i * i + j * j),
        ],
        axis=-1,
    )
    return o.reshape(-1, 3, 3)


def _pick_tile(n, k_dim, hid, out_pad):
    """Largest pow2 row tile dividing n that fits VMEM (sized against v7x's
    64 MiB per-TC budget), preferring >= 4 grid steps so each of the two v7x
    TensorCores gets >= 2 pipelined steps.  Never returns a tile < 128."""
    budget = 48 * 2 ** 20                                           # headroom < 64 MiB
    weight_bytes = k_dim * hid * 2 + hid * out_pad * 2 + (hid + out_pad) * 4
    per_row = 2 * k_dim * 2 + 2 * out_pad * 4 + (hid + out_pad) * 4
    cap = max(128, (budget - weight_bytes) // per_row)
    candidates = [t for t in (2048, 1024, 512, 256, 128) if t <= cap]
    if not candidates:
        candidates = [128]
    for min_steps in (4, 2, 1):
        for t in candidates:
            if n % t == 0 and n // t >= min_steps:
                return t
    return None


def cosypose_detection_head(feat_map, params, K=None, extrinsics=None,
                            embed_dim=128, single_buffer_weights=True):
    """feat_map: (B, C, H, W) float32.  Returns the same 7-tuple as the module."""
    B, C, H, W = feat_map.shape
    k_pad = params["w1"].shape[0]
    hid = params["w1"].shape[1]
    out_pad = params["w2"].shape[1]

    x_patch = im2col_3x3(feat_map).astype(jnp.bfloat16)             # (N, C*9)
    if x_patch.shape[1] < k_pad:                                    # lane-pad K
        x_patch = jnp.pad(x_patch, ((0, 0), (0, k_pad - x_patch.shape[1])))
    N = x_patch.shape[0]

    tile_n = _pick_tile(N, k_pad, hid, out_pad)
    if tile_n is None:
        # Ragged N: pad rows up to a multiple of 512 and use one deep tile
        # rather than many shallow grid steps (per-step overhead ~0.35 us).
        tile_n = 512
        n_pad = ((N + tile_n - 1) // tile_n) * tile_n
        x_patch = jnp.pad(x_patch, ((0, n_pad - N), (0, 0)))

    y = fused_heads(x_patch, params, embed_dim, tile_n,
                    single_buffer_weights=single_buffer_weights)
    y = y[:N].reshape(B, H, W, out_pad)                             # NHWC view

    # Slice per-head channel groups BEFORE the NCHW transpose so the padded
    # lanes (out_pad - (embed_dim+12) channels) are never transposed/written.
    def nchw(lo, hi):
        return y[..., lo:hi].transpose(0, 3, 1, 2)

    embed = nchw(0, embed_dim)
    quat = nchw(embed_dim, embed_dim + 4)
    trans = nchw(embed_dim + 4, embed_dim + 7)
    confidence = nchw(embed_dim + 7, embed_dim + 8)
    bbox = nchw(embed_dim + 8, embed_dim + 12)

    # Extrinsics post-processing (tiny per-batch 3x3 math; plain JAX glue).
    # Center values are gathered straight from the NHWC slab (no dependence
    # on the transposed tensors).
    R_w2c = extrinsics["R_w2c"]                                     # (B, 3, 3)
    t_w2c = extrinsics["t_w2c"]                                     # (B, 3)
    ch, cw = H // 2, W // 2
    q_center = y[:, ch, cw, embed_dim:embed_dim + 4]                # (B, 4), normalized
    t_center = y[:, ch, cw, embed_dim + 4:embed_dim + 7]            # (B, 3)
    R_cam = quaternion_to_matrix(q_center)                          # (B, 3, 3)
    global_R = jnp.einsum("bji,bjk->bik", R_w2c, R_cam)             # R_w2c^T @ R_cam
    global_trans = jnp.einsum("bji,bj->bi", R_w2c, t_center - t_w2c)

    return quat, trans, embed, confidence, bbox, global_R, global_trans


# -----------------------------------------------------------------------------
# Main
# -----------------------------------------------------------------------------
if __name__ == "__main__":
    key = jax.random.PRNGKey(0)
    k_feat, k_param, k_q, k_t, k_K = jax.random.split(key, 5)

    B, C, H, W = 2, 4, 16, 16
    embed_dim = 128

    feat_map = jax.random.normal(k_feat, (B, C, H, W), jnp.float32)
    params = init_params(k_param, feature_dim=C, embed_dim=embed_dim)

    # Proper rotation matrices for extrinsics (via random unit quaternions).
    q_ext = jax.random.normal(k_q, (B, 4), jnp.float32)
    q_ext = q_ext / jnp.linalg.norm(q_ext, axis=-1, keepdims=True)
    extrinsics = {
        "R_w2c": quaternion_to_matrix(q_ext),
        "t_w2c": jax.random.normal(k_t, (B, 3), jnp.float32),
    }
    K = jax.random.normal(k_K, (B, 3, 3), jnp.float32)  # unused, matches signature

    def run(single_buffer):
        fwd = jax.jit(functools.partial(cosypose_detection_head,
                                        embed_dim=embed_dim,
                                        single_buffer_weights=single_buffer))
        return jax.block_until_ready(fwd(feat_map, params, K=K,
                                         extrinsics=extrinsics))

    try:
        outs = run(True)
    except Exception:
        # Fallback for JAX versions that reject single-buffered constant
        # operand specs (pl.Buffered(1)): use default double-buffering.
        outs = run(False)

    quat, trans, embed, confidence, bbox, global_R, global_trans = outs
    assert quat.shape == (B, 4, H, W)
    assert trans.shape == (B, 3, H, W)
    assert embed.shape == (B, embed_dim, H, W)
    assert confidence.shape == (B, 1, H, W)
    assert bbox.shape == (B, 4, H, W)
    assert global_R.shape == (B, 3, 3)
    assert global_trans.shape == (B, 3)

    print("KERNEL_OK")
</pallas_src>

<mosaic_0001>
module attributes {stable_mosaic.version = 11 : i64} {
  func.func @kernel(%arg0: i32, %arg1: memref<128x128xbf16, #tpu.memory_space<vmem>>, %arg2: memref<128x384xbf16, #tpu.memory_space<vmem>>, %arg3: memref<1x384xf32, #tpu.memory_space<vmem>>, %arg4: memref<384x256xbf16, #tpu.memory_space<vmem>>, %arg5: memref<1x256xf32, #tpu.memory_space<vmem>>, %arg6: memref<128x256xf32, #tpu.memory_space<vmem>>) attributes {dimension_semantics = [#tpu.dimension_semantics<parallel>], iteration_bounds = array<i64: 4>, scalar_prefetch = 0 : i64, scratch_operands = 0 : i64, tpu.core_type = #tpu.core_type<tc>, window_params = [{transform_indices = @transform_0, window_bounds = array<i64: 128, 128>}, {pipeline_mode = #tpu.pipeline_mode<synchronous>, transform_indices = @transform_1, window_bounds = array<i64: 128, 384>}, {pipeline_mode = #tpu.pipeline_mode<synchronous>, transform_indices = @transform_2, window_bounds = array<i64: 1, 384>}, {pipeline_mode = #tpu.pipeline_mode<synchronous>, transform_indices = @transform_3, window_bounds = array<i64: 384, 256>}, {pipeline_mode = #tpu.pipeline_mode<synchronous>, transform_indices = @transform_4, window_bounds = array<i64: 1, 256>}, {transform_indices = @transform_5, window_bounds = array<i64: 128, 256>}]} {
    %c0 = arith.constant 0 : index
    %c0_0 = arith.constant 0 : index
    %0 = vector.load %arg1[%c0, %c0_0] : memref<128x128xbf16, #tpu.memory_space<vmem>>, vector<128x128xbf16>
    %c0_1 = arith.constant 0 : index
    %c0_2 = arith.constant 0 : index
    %1 = vector.load %arg2[%c0_1, %c0_2] : memref<128x384xbf16, #tpu.memory_space<vmem>>, vector<128x384xbf16>
    %cst = arith.constant dense<0.000000e+00> : vector<128x384xf32>
    %2 = tpu.matmul %0, %1, %cst {dimension_numbers = #tpu.dot_dimension_numbers<[1], [0], [0], [1], [0, 0, 1, 1], [], []>} : vector<128x128xbf16>, vector<128x384xbf16>, vector<128x384xf32> -> vector<128x384xf32>
    %c0_3 = arith.constant 0 : index
    %c0_4 = arith.constant 0 : index
    %3 = vector.load %arg3[%c0_3, %c0_4] : memref<1x384xf32, #tpu.memory_space<vmem>>, vector<1x384xf32>
    %4 = vector.broadcast %3 : vector<1x384xf32> to vector<128x384xf32>
    %5 = arith.addf %2, %4 : vector<128x384xf32>
    %cst_5 = arith.constant 0.000000e+00 : f32
    %6 = vector.broadcast %cst_5 : f32 to vector<128x384xf32>
    %7 = arith.maximumf %5, %6 : vector<128x384xf32>
    %8 = arith.truncf %7 : vector<128x384xf32> to vector<128x384xbf16>
    %c0_6 = arith.constant 0 : index
    %c0_7 = arith.constant 0 : index
    %9 = vector.load %arg4[%c0_6, %c0_7] : memref<384x256xbf16, #tpu.memory_space<vmem>>, vector<384x256xbf16>
    %cst_8 = arith.constant dense<0.000000e+00> : vector<128x256xf32>
    %10 = tpu.matmul %8, %9, %cst_8 {dimension_numbers = #tpu.dot_dimension_numbers<[1], [0], [0], [1], [0, 0, 1, 1], [], []>} : vector<128x384xbf16>, vector<384x256xbf16>, vector<128x256xf32> -> vector<128x256xf32>
    %c0_9 = arith.constant 0 : index
    %c0_10 = arith.constant 0 : index
    %11 = vector.load %arg5[%c0_9, %c0_10] : memref<1x256xf32, #tpu.memory_space<vmem>>, vector<1x256xf32>
    %12 = vector.broadcast %11 : vector<1x256xf32> to vector<128x256xf32>
    %13 = arith.addf %10, %12 : vector<128x256xf32>
    %14 = tpu.iota {dimensions = array<i32: 1>} : vector<128x256xi32>
    %c128_i32 = arith.constant 128 : i32
    %15 = vector.broadcast %c128_i32 : i32 to vector<128x256xi32>
    %16 = arith.cmpi sge, %14, %15 : vector<128x256xi32>
    %c132_i32 = arith.constant 132 : i32
    %17 = vector.broadcast %c132_i32 : i32 to vector<128x256xi32>
    %18 = arith.cmpi slt, %14, %17 : vector<128x256xi32>
    %19 = arith.andi %16, %18 : vector<128x256xi1>
    %c135_i32 = arith.constant 135 : i32
    %20 = vector.broadcast %c135_i32 : i32 to vector<128x256xi32>
    %21 = arith.cmpi eq, %14, %20 : vector<128x256xi32>
    %22 = arith.mulf %13, %13 : vector<128x256xf32>
    %23 = vector.extract_strided_slice %22 {offsets = [0, 0], sizes = [128, 128], strides = [1, 1]} : vector<128x256xf32> to vector<128x128xf32>
    %cst_11 = arith.constant dense<0.000000e+00> : vector<128xf32>
    %24 = vector.multi_reduction <add>, %23, %cst_11 [1] : vector<128x128xf32> to vector<128xf32>
    %25 = vector.shape_cast %24 : vector<128xf32> to vector<128x1xf32>
    %cst_12 = arith.constant 0.000000e+00 : f32
    %26 = vector.broadcast %cst_12 : f32 to vector<128x256xf32>
    %27 = arith.select %19, %22, %26 : vector<128x256xi1>, vector<128x256xf32>
    %cst_13 = arith.constant dense<0.000000e+00> : vector<128xf32>
    %28 = vector.multi_reduction <add>, %27, %cst_13 [1] : vector<128x256xf32> to vector<128xf32>
    %29 = vector.shape_cast %28 : vector<128xf32> to vector<128x1xf32>
    %30 = math.sqrt %25 : vector<128x1xf32>
    %cst_14 = arith.constant 9.99999996E-13 : f32
    %31 = vector.broadcast %cst_14 : f32 to vector<128x1xf32>
    %32 = arith.maximumf %30, %31 : vector<128x1xf32>
    %cst_15 = arith.constant 1.000000e+00 : f32
    %33 = vector.broadcast %cst_15 : f32 to vector<128x1xf32>
    %34 = arith.divf %33, %32 : vector<128x1xf32>
    %35 = math.sqrt %29 : vector<128x1xf32>
    %cst_16 = arith.constant 9.99999996E-13 : f32
    %36 = vector.broadcast %cst_16 : f32 to vector<128x1xf32>
    %37 = arith.maximumf %35, %36 : vector<128x1xf32>
    %cst_17 = arith.constant 1.000000e+00 : f32
    %38 = vector.broadcast %cst_17 : f32 to vector<128x1xf32>
    %39 = arith.divf %38, %37 : vector<128x1xf32>
    %cst_18 = arith.constant 0.000000e+00 : f32
    %40 = vector.broadcast %cst_18 : f32 to vector<128x256xf32>
    %41 = arith.select %21, %13, %40 : vector<128x256xi1>, vector<128x256xf32>
    %cst_19 = arith.constant dense<0.000000e+00> : vector<128xf32>
    %42 = vector.multi_reduction <add>, %41, %cst_19 [1] : vector<128x256xf32> to vector<128xf32>
    %43 = vector.shape_cast %42 : vector<128xf32> to vector<128x1xf32>
    %44 = arith.negf %43 : vector<128x1xf32>
    %45 = math.exp %44 : vector<128x1xf32>
    %cst_20 = arith.constant 1.000000e+00 : f32
    %46 = vector.broadcast %cst_20 : f32 to vector<128x1xf32>
    %47 = arith.addf %46, %45 : vector<128x1xf32>
    %48 = arith.divf %46, %47 : vector<128x1xf32>
    %c128_i32_21 = arith.constant 128 : i32
    %49 = vector.broadcast %c128_i32_21 : i32 to vector<128x256xi32>
    %50 = arith.cmpi slt, %14, %49 : vector<128x256xi32>
    %cst_22 = arith.constant 1.000000e+00 : f32
    %51 = vector.shape_cast %39 : vector<128x1xf32> to vector<128x1xf32>
    %52 = vector.broadcast %51 : vector<128x1xf32> to vector<128x256xf32>
    %53 = vector.broadcast %cst_22 : f32 to vector<128x256xf32>
    %54 = arith.select %19, %52, %53 : vector<128x256xi1>, vector<128x256xf32>
    %55 = vector.shape_cast %34 : vector<128x1xf32> to vector<128x1xf32>
    %56 = vector.broadcast %55 : vector<128x1xf32> to vector<128x256xf32>
    %57 = arith.select %50, %56, %54 : vector<128x256xi1>, vector<128x256xf32>
    %58 = arith.mulf %13, %57 : vector<128x256xf32>
    %59 = vector.shape_cast %48 : vector<128x1xf32> to vector<128x1xf32>
    %60 = vector.broadcast %59 : vector<128x1xf32> to vector<128x256xf32>
    %61 = arith.select %21, %60, %58 : vector<128x256xi1>, vector<128x256xf32>
    %c0_23 = arith.constant 0 : index
    %c0_24 = arith.constant 0 : index
    %62 = vector.load %arg6[%c0_23, %c0_24] : memref<128x256xf32, #tpu.memory_space<vmem>>, vector<128x256xf32>
    tpu.vector_store %arg6[%c0_23, %c0_24], %61 {strides = array<i32>} : memref<128x256xf32, #tpu.memory_space<vmem>>, vector<128x256xf32>,
    return
  }
  func.func @transform_0(%arg0: i32) -> (i32, i32) {
    %c0_i32 = arith.constant 0 : i32
    %c0_i32_0 = arith.constant 0 : i32
    return %arg0, %c0_i32 : i32, i32
  }
  func.func @transform_1(%arg0: i32) -> (i32, i32) {
    %c0_i32 = arith.constant 0 : i32
    %c0_i32_0 = arith.constant 0 : i32
    %c0_i32_1 = arith.constant 0 : i32
    return %c0_i32, %c0_i32_0 : i32, i32
  }
  func.func @transform_2(%arg0: i32) -> (i32, i32) {
    %c0_i32 = arith.constant 0 : i32
    %c0_i32_0 = arith.constant 0 : i32
    %c0_i32_1 = arith.constant 0 : i32
    return %c0_i32, %c0_i32_0 : i32, i32
  }
  func.func @transform_3(%arg0: i32) -> (i32, i32) {
    %c0_i32 = arith.constant 0 : i32
    %c0_i32_0 = arith.constant 0 : i32
    %c0_i32_1 = arith.constant 0 : i32
    return %c0_i32, %c0_i32_0 : i32, i32
  }
  func.func @transform_4(%arg0: i32) -> (i32, i32) {
    %c0_i32 = arith.constant 0 : i32
    %c0_i32_0 = arith.constant 0 : i32
    %c0_i32_1 = arith.constant 0 : i32
    return %c0_i32, %c0_i32_0 : i32, i32
  }
  func.func @transform_5(%arg0: i32) -> (i32, i32) {
    %c0_i32 = arith.constant 0 : i32
    %c0_i32_0 = arith.constant 0 : i32
    return %arg0, %c0_i32 : i32, i32
  }
}

module attributes {stable_mosaic.version = 11 : i64} {
  func.func @kernel(%arg0: i32, %arg1: memref<128x128xbf16, #tpu.memory_space<vmem>>, %arg2: memref<128x384xbf16, #tpu.memory_space<vmem>>, %arg3: memref<1x384xf32, #tpu.memory_space<vmem>>, %arg4: memref<384x256xbf16, #tpu.memory_space<vmem>>, %arg5: memref<1x256xf32, #tpu.memory_space<vmem>>, %arg6: memref<128x256xf32, #tpu.memory_space<vmem>>) attributes {dimension_semantics = [#tpu.dimension_semantics<parallel>], iteration_bounds = array<i64: 4>, scalar_prefetch = 0 : i64, scratch_operands = 0 : i64, tpu.core_type = #tpu.core_type<tc>, window_params = [{transform_indices = @transform_0, window_bounds = array<i64: 128, 128>}, {pipeline_mode = #tpu.pipeline_mode<synchronous>, transform_indices = @transform_1, window_bounds = array<i64: 128, 384>}, {pipeline_mode = #tpu.pipeline_mode<synchronous>, transform_indices = @transform_2, window_bounds = array<i64: 1, 384>}, {pipeline_mode = #tpu.pipeline_mode<synchronous>, transform_indices = @transform_3, window_bounds = array<i64: 384, 256>}, {pipeline_mode = #tpu.pipeline_mode<synchronous>, transform_indices = @transform_4, window_bounds = array<i64: 1, 256>}, {transform_indices = @transform_5, window_bounds = array<i64: 128, 256>}]} {
    %c0 = arith.constant 0 : index
    %c0_0 = arith.constant 0 : index
    %0 = vector.load %arg1[%c0, %c0_0] : memref<128x128xbf16, #tpu.memory_space<vmem>>, vector<128x128xbf16>
    %c0_1 = arith.constant 0 : index
    %c0_2 = arith.constant 0 : index
    %1 = vector.load %arg2[%c0_1, %c0_2] : memref<128x384xbf16, #tpu.memory_space<vmem>>, vector<128x384xbf16>
    %cst = arith.constant dense<0.000000e+00> : vector<128x384xf32>
    %2 = tpu.matmul %0, %1, %cst {dimension_numbers = #tpu.dot_dimension_numbers<[1], [0], [0], [1], [0, 0, 1, 1], [], []>} : vector<128x128xbf16>, vector<128x384xbf16>, vector<128x384xf32> -> vector<128x384xf32>
    %c0_3 = arith.constant 0 : index
    %c0_4 = arith.constant 0 : index
    %3 = vector.load %arg3[%c0_3, %c0_4] : memref<1x384xf32, #tpu.memory_space<vmem>>, vector<1x384xf32>
    %4 = vector.broadcast %3 : vector<1x384xf32> to vector<128x384xf32>
    %5 = arith.addf %2, %4 : vector<128x384xf32>
    %cst_5 = arith.constant 0.000000e+00 : f32
    %6 = vector.broadcast %cst_5 : f32 to vector<128x384xf32>
    %7 = arith.maximumf %5, %6 : vector<128x384xf32>
    %8 = arith.truncf %7 : vector<128x384xf32> to vector<128x384xbf16>
    %c0_6 = arith.constant 0 : index
    %c0_7 = arith.constant 0 : index
    %9 = vector.load %arg4[%c0_6, %c0_7] : memref<384x256xbf16, #tpu.memory_space<vmem>>, vector<384x256xbf16>
    %cst_8 = arith.constant dense<0.000000e+00> : vector<128x256xf32>
    %10 = tpu.matmul %8, %9, %cst_8 {dimension_numbers = #tpu.dot_dimension_numbers<[1], [0], [0], [1], [0, 0, 1, 1], [], []>} : vector<128x384xbf16>, vector<384x256xbf16>, vector<128x256xf32> -> vector<128x256xf32>
    %c0_9 = arith.constant 0 : index
    %c0_10 = arith.constant 0 : index
    %11 = vector.load %arg5[%c0_9, %c0_10] : memref<1x256xf32, #tpu.memory_space<vmem>>, vector<1x256xf32>
    %12 = vector.broadcast %11 : vector<1x256xf32> to vector<128x256xf32>
    %13 = arith.addf %10, %12 : vector<128x256xf32>
    %14 = tpu.iota {dimensions = array<i32: 1>} : vector<128x256xi32>
    %c128_i32 = arith.constant 128 : i32
    %15 = vector.broadcast %c128_i32 : i32 to vector<128x256xi32>
    %16 = arith.cmpi sge, %14, %15 : vector<128x256xi32>
    %c132_i32 = arith.constant 132 : i32
    %17 = vector.broadcast %c132_i32 : i32 to vector<128x256xi32>
    %18 = arith.cmpi slt, %14, %17 : vector<128x256xi32>
    %19 = arith.andi %16, %18 : vector<128x256xi1>
    %c135_i32 = arith.constant 135 : i32
    %20 = vector.broadcast %c135_i32 : i32 to vector<128x256xi32>
    %21 = arith.cmpi eq, %14, %20 : vector<128x256xi32>
    %22 = arith.mulf %13, %13 : vector<128x256xf32>
    %23 = vector.extract_strided_slice %22 {offsets = [0, 0], sizes = [128, 128], strides = [1, 1]} : vector<128x256xf32> to vector<128x128xf32>
    %cst_11 = arith.constant dense<0.000000e+00> : vector<128xf32>
    %24 = vector.multi_reduction <add>, %23, %cst_11 [1] : vector<128x128xf32> to vector<128xf32>
    %25 = vector.shape_cast %24 : vector<128xf32> to vector<128x1xf32>
    %cst_12 = arith.constant 0.000000e+00 : f32
    %26 = vector.broadcast %cst_12 : f32 to vector<128x256xf32>
    %27 = arith.select %19, %22, %26 : vector<128x256xi1>, vector<128x256xf32>
    %cst_13 = arith.constant dense<0.000000e+00> : vector<128xf32>
    %28 = vector.multi_reduction <add>, %27, %cst_13 [1] : vector<128x256xf32> to vector<128xf32>
    %29 = vector.shape_cast %28 : vector<128xf32> to vector<128x1xf32>
    %30 = math.sqrt %25 : vector<128x1xf32>
    %cst_14 = arith.constant 9.99999996E-13 : f32
    %31 = vector.broadcast %cst_14 : f32 to vector<128x1xf32>
    %32 = arith.maximumf %30, %31 : vector<128x1xf32>
    %cst_15 = arith.constant 1.000000e+00 : f32
    %33 = vector.broadcast %cst_15 : f32 to vector<128x1xf32>
    %34 = arith.divf %33, %32 : vector<128x1xf32>
    %35 = math.sqrt %29 : vector<128x1xf32>
    %cst_16 = arith.constant 9.99999996E-13 : f32
    %36 = vector.broadcast %cst_16 : f32 to vector<128x1xf32>
    %37 = arith.maximumf %35, %36 : vector<128x1xf32>
    %cst_17 = arith.constant 1.000000e+00 : f32
    %38 = vector.broadcast %cst_17 : f32 to vector<128x1xf32>
    %39 = arith.divf %38, %37 : vector<128x1xf32>
    %cst_18 = arith.constant 0.000000e+00 : f32
    %40 = vector.broadcast %cst_18 : f32 to vector<128x256xf32>
    %41 = arith.select %21, %13, %40 : vector<128x256xi1>, vector<128x256xf32>
    %cst_19 = arith.constant dense<0.000000e+00> : vector<128xf32>
    %42 = vector.multi_reduction <add>, %41, %cst_19 [1] : vector<128x256xf32> to vector<128xf32>
    %43 = vector.shape_cast %42 : vector<128xf32> to vector<128x1xf32>
    %44 = arith.negf %43 : vector<128x1xf32>
    %45 = math.exp %44 : vector<128x1xf32>
    %cst_20 = arith.constant 1.000000e+00 : f32
    %46 = vector.broadcast %cst_20 : f32 to vector<128x1xf32>
    %47 = arith.addf %46, %45 : vector<128x1xf32>
    %48 = arith.divf %46, %47 : vector<128x1xf32>
    %c128_i32_21 = arith.constant 128 : i32
    %49 = vector.broadcast %c128_i32_21 : i32 to vector<128x256xi32>
    %50 = arith.cmpi slt, %14, %49 : vector<128x256xi32>
    %cst_22 = arith.constant 1.000000e+00 : f32
    %51 = vector.shape_cast %39 : vector<128x1xf32> to vector<128x1xf32>
    %52 = vector.broadcast %51 : vector<128x1xf32> to vector<128x256xf32>
    %53 = vector.broadcast %cst_22 : f32 to vector<128x256xf32>
    %54 = arith.select %19, %52, %53 : vector<128x256xi1>, vector<128x256xf32>
    %55 = vector.shape_cast %34 : vector<128x1xf32> to vector<128x1xf32>
    %56 = vector.broadcast %55 : vector<128x1xf32> to vector<128x256xf32>
    %57 = arith.select %50, %56, %54 : vector<128x256xi1>, vector<128x256xf32>
    %58 = arith.mulf %13, %57 : vector<128x256xf32>
    %59 = vector.shape_cast %48 : vector<128x1xf32> to vector<128x1xf32>
    %60 = vector.broadcast %59 : vector<128x1xf32> to vector<128x256xf32>
    %61 = arith.select %21, %60, %58 : vector<128x256xi1>, vector<128x256xf32>
    %c0_23 = arith.constant 0 : index
    %c0_24 = arith.constant 0 : index
    %62 = vector.load %arg6[%c0_23, %c0_24] : memref<128x256xf32, #tpu.memory_space<vmem>>, vector<128x256xf32>
    tpu.vector_store %arg6[%c0_23, %c0_24], %61 {strides = array<i32>} : memref<128x256xf32, #tpu.memory_space<vmem>>, vector<128x256xf32>,
    return
  }
  func.func @transform_0(%arg0: i32) -> (i32, i32) {
    %c0_i32 = arith.constant 0 : i32
    %c0_i32_0 = arith.constant 0 : i32
    return %arg0, %c0_i32 : i32, i32
  }
  func.func @transform_1(%arg0: i32) -> (i32, i32) {
    %c0_i32 = arith.constant 0 : i32
    %c0_i32_0 = arith.constant 0 : i32
    %c0_i32_1 = arith.constant 0 : i32
    return %c0_i32, %c0_i32_0 : i32, i32
  }
  func.func @transform_2(%arg0: i32) -> (i32, i32) {
    %c0_i32 = arith.constant 0 : i32
    %c0_i32_0 = arith.constant 0 : i32
    %c0_i32_1 = arith.constant 0 : i32
    return %c0_i32, %c0_i32_0 : i32, i32
  }
  func.func @transform_3(%arg0: i32) -> (i32, i32) {
    %c0_i32 = arith.constant 0 : i32
    %c0_i32_0 = arith.constant 0 : i32
    %c0_i32_1 = arith.constant 0 : i32
    return %c0_i32, %c0_i32_0 : i32, i32
  }
  func.func @transform_4(%arg0: i32) -> (i32, i32) {
    %c0_i32 = arith.constant 0 : i32
    %c0_i32_0 = arith.constant 0 : i32
    %c0_i32_1 = arith.constant 0 : i32
    return %c0_i32, %c0_i32_0 : i32, i32
  }
  func.func @transform_5(%arg0: i32) -> (i32, i32) {
    %c0_i32 = arith.constant 0 : i32
    %c0_i32_0 = arith.constant 0 : i32
    return %arg0, %c0_i32 : i32, i32
  }
}

</mosaic_0001>

<bundles_post_ra>
// kernel: cosypose_detection_head.1
= control target key start
LH: loop header
LB: loop body
LE: loop exit
PB: predicated region body
PF: predicated region fallthrough
CT: control target
= control target key end

     0   :  { %s2724_s18 = smov 0   ;;  %s3794_s0 = inlined_call_operand.vmem [shape: bf16[512,128], index: 0, kind: input, shape index: {}]   ;;  %s3795_s1 = inlined_call_operand.vmem [shape: bf16[128,384], index: 1, kind: input, shape index: {}]   ;;  %s3796_s2 = inlined_call_operand.vmem [shape: f32[1,384], index: 2, kind: input, shape index: {}]   ;;  %s3797_s3 = inlined_call_operand.vmem [shape: bf16[384,256], index: 3, kind: input, shape index: {}]   ;;  %s3798_s4 = inlined_call_operand.vmem [shape: f32[1,256], index: 4, kind: input, shape index: {}]   ;;  %s3799_s5 = inlined_call_operand.vmem [shape: f32[512,256], index: 5, kind: output, shape index: {}]  }
   0x1 LB: > { %s2151_s19 = sadd.s32 4294967295, %s2691_s18   ;;  %p2155_p0 = scmp.ge.s32.totalorder %s2691_s18, 1  ;;  %s2691_s18 = sphi %s2724_s18, %s15_s18  }
   0x2   : > { %p188_p1 = scmp.lt.s32.totalorder %s2691_s18, 5 }
   0x4   : > { %p189_p2 = pnand %p2155_p0, %p188_p1 }
   0x5   : > { %v2381_v0 = vld [vmem:[%s3795_s1 + $0x4] ss:$12 sps:$4 sm:$0xff] (!%p189_p2)   ;;  %s2156_s22 = sshll.u32 (!%p189_p2), %s2151_s19, 4  ;;  %v2383_v1 = vld [vmem:[%s3795_s1 + $0x8] ss:$12 sps:$4 sm:$0xff] (!%p189_p2)   ;;  %v2693_v2 = vmov (!%p189_p2), 0  }
   0x6   : > { %192 = sbr.rel (%p189_p2) target bundleno = 754 (0x2f2), region = 40  ;;  %504 = vmatprep.mubr.bf16.mxu0 (!%p189_p2), %v2693_v2  ;;  %472 = vmatprep.subr.bf16.mxu0 (!%p189_p2), %v2381_v0  ;;  %v2384_v3 = vld [vmem:[%s3795_s1] ss:$12 sps:$4 sm:$0xff] (!%p189_p2)   ;;  %p218_p3 = scmp.lt.s32.totalorder (!%p189_p2), %s2156_s22, 63  ;;  %v2385_v4 = vld [vmem:[%s3795_s1 + $0x1c] ss:$12 sps:$4 sm:$0xff] (!%p189_p2)  }
   0x7   : > { %2276 = vmatprep.subr.bf16.mxu1 (!%p189_p2), %v2383_v1  ;;  %473 = vmatpush1.bf16.msra.mxu0 (!%p189_p2), %v2384_v3  ;;  %v2387_v5 = vld [vmem:[%s3795_s1 + $0x20] ss:$12 sps:$4 sm:$0xff] (!%p189_p2)   ;;  %v2388_v6 = vld [vmem:[%s3795_s1 + $0x18] ss:$12 sps:$4 sm:$0xff] (!%p189_p2)   ;;  %v2392_v9 = vld [vmem:[%s3795_s1 + $0x30] ss:$12 sps:$4 sm:$0xff] (!%p189_p2)  }
   0x8   : > { %2277 = vmatpush3.bf16.msra.mxu1 (!%p189_p2), %v2383_v1  ;;  %474 = vmatprep.subr.bf16.mxu0 (!%p189_p2), %v2385_v4  ;;  %v2389_v7 = vld [vmem:[%s3795_s1 + $0x34] ss:$12 sps:$4 sm:$0xff] (!%p189_p2)   ;;  %v2391_v8 = vld [vmem:[%s3795_s1 + $0x38] ss:$12 sps:$4 sm:$0xff] (!%p189_p2)   ;;  %v2395_v11 = vld [vmem:[%s3795_s1 + $0x50] ss:$12 sps:$4 sm:$0xff] (!%p189_p2)  }
   0x9   : > { %2278 = vmatprep.subr.bf16.mxu1 (!%p189_p2), %v2387_v5  ;;  %v2393_v10 = vld [vmem:[%s3795_s1 + $0x4c] ss:$12 sps:$4 sm:$0xff] (!%p189_p2)   ;;  %v2396_v12 = vld [vmem:[%s3795_s1 + $0x48] ss:$12 sps:$4 sm:$0xff] (!%p189_p2)   ;;  %v2397_v13 = vld [vmem:[%s3795_s1 + $0x64] ss:$12 sps:$4 sm:$0xff] (!%p189_p2)  }
   0xa   : > { %v2399_v14 = vld [vmem:[%s3795_s1 + $0x68] ss:$12 sps:$4 sm:$0xff] (!%p189_p2)   ;;  %v2400_v15 = vld [vmem:[%s3795_s1 + $0x60] ss:$12 sps:$4 sm:$0xff] (!%p189_p2)   ;;  %v2404_v18 = vld [vmem:[%s3795_s1 + $0x78] ss:$12 sps:$4 sm:$0xff] (!%p189_p2)  }
   0xb   : > { %475 = vmatpush1.bf16.msra.mxu0 (!%p189_p2), %v2388_v6  ;;  %v2401_v16 = vld [vmem:[%s3795_s1 + $0x7c] ss:$12 sps:$4 sm:$0xff] (!%p189_p2)   ;;  %v2403_v17 = vld [vmem:[%s3795_s1 + $0x80] ss:$12 sps:$4 sm:$0xff] (!%p189_p2)   ;;  %v2407_v21 = vld [vmem:[%s3795_s1 + $0x98] ss:$12 sps:$4 sm:$0xff] (!%p189_p2)  }
   0xc   : > { %2279 = vmatpush3.bf16.msra.mxu1 (!%p189_p2), %v2387_v5  ;;  %476 = vmatprep.subr.bf16.mxu0 (!%p189_p2), %v2389_v7  ;;  %v2405_v20 = vld [vmem:[%s3795_s1 + $0x94] ss:$12 sps:$4 sm:$0xff] (!%p189_p2)   ;;  %v2408_v22 = vld [vmem:[%s3795_s1 + $0x90] ss:$12 sps:$4 sm:$0xff] (!%p189_p2)   ;;  %v2409_v23 = vld [vmem:[%s3795_s1 + $0xac] ss:$12 sps:$4 sm:$0xff] (!%p189_p2)  }
   0xd   : > { %s3801_s22 = smov (!%p218_p3, %s2156_s22), 63  ;;  %2280 = vmatprep.subr.bf16.mxu1 %v2391_v8  ;;  %v2411_v24 = vld [vmem:[%s3795_s1 + $0xb0] ss:$12 sps:$4 sm:$0xff]   ;;  %v2412_v25 = vld [vmem:[%s3795_s1 + $0xa8] ss:$12 sps:$4 sm:$0xff]  }
   0xe   : > { %s2157_s21 = sshll.u32 %s3801_s22, 2  ;;  %v2423_v26 = vld [vmem:[%s3797_s3 + $0x4] ss:$8 sps:$4 sm:$0xff]   ;;  %v2421_v30 = vld [vmem:[%s3797_s3] ss:$8 sps:$4 sm:$0xff]   ;;  %s2259_s13 = sshll.u32 %s3801_s22, 4 }
   0xf   : > { %477 = vmatpush1.bf16.msra.mxu0 %v2392_v9  ;;  %s2787_s8 = scalar_lea.vmem %s3794_s0, %s2157_s21  ;;  %v2426_v27 = vld [vmem:[%s3797_s3 + $0x104] ss:$8 sps:$4 sm:$0xff]   ;;  %v2424_v31 = vld [vmem:[%s3797_s3 + $0x100] ss:$8 sps:$4 sm:$0xff]   ;;  %v2429_v32 = vld [vmem:[%s3797_s3 + $0x14] ss:$8 sps:$4 sm:$0xff]  }
  0x10   : > { %2281 = vmatpush3.bf16.msra.mxu1 %v2391_v8  ;;  %478 = vmatprep.subr.bf16.mxu0 %v2393_v10  ;;  %v2413_v19 = vld [vmem:[%s2787_s8] sm:$0xff]   ;;  %v2414_v28 = vld [vmem:[%s2787_s8 + $0x8] sm:$0xff]   ;;  %v2415_v29 = vld [vmem:[%s2787_s8 + $0x10] sm:$0xff]  }
  0x11   : > { %2282 = vmatprep.subr.bf16.mxu1 %v2395_v11  ;;  %2292 = vmatprep.mubr.bf16.mxu1 %v2413_v19  ;;  %v2435_v33 = vld [vmem:[%s3797_s3 + $0x114] ss:$8 sps:$4 sm:$0xff]   ;;  %v2427_v34 = vld [vmem:[%s3797_s3 + $0x10] ss:$8 sps:$4 sm:$0xff]   ;;  %v2432_v36 = vld [vmem:[%s3797_s3 + $0x24] ss:$8 sps:$4 sm:$0xff]  }
  0x12   : > { %v2433_v35 = vld [vmem:[%s3797_s3 + $0x110] ss:$8 sps:$4 sm:$0xff]   ;;  %v2444_v37 = vld [vmem:[%s3797_s3 + $0x124] ss:$8 sps:$4 sm:$0xff]   ;;  %v2430_v40 = vld [vmem:[%s3797_s3 + $0x20] ss:$8 sps:$4 sm:$0xff]  }
  0x13   : > { %479 = vmatpush1.bf16.msra.mxu0 %v2396_v12  ;;  %v2416_v38 = vld [vmem:[%s2787_s8 + $0x18] sm:$0xff]   ;;  %v2417_v39 = vld [vmem:[%s2787_s8 + $0x20] sm:$0xff]   ;;  %v2418_v48 = vld [vmem:[%s2787_s8 + $0x28] sm:$0xff]  }
  0x14   : > { %2283 = vmatpush3.bf16.msra.mxu1 %v2395_v11  ;;  %480 = vmatprep.subr.bf16.mxu0 %v2397_v13  ;;  %v2442_v41 = vld [vmem:[%s3797_s3 + $0x120] ss:$8 sps:$4 sm:$0xff]   ;;  %v2438_v42 = vld [vmem:[%s3797_s3 + $0x34] ss:$8 sps:$4 sm:$0xff]   ;;  %v2436_v44 = vld [vmem:[%s3797_s3 + $0x30] ss:$8 sps:$4 sm:$0xff]  }
  0x15   : > { %2284 = vmatprep.subr.bf16.mxu1 %v2399_v14  ;;  %v2453_v43 = vld [vmem:[%s3797_s3 + $0x134] ss:$8 sps:$4 sm:$0xff]   ;;  %v2451_v45 = vld [vmem:[%s3797_s3 + $0x130] ss:$8 sps:$4 sm:$0xff]   ;;  %v2441_v46 = vld [vmem:[%s3797_s3 + $0x44] ss:$8 sps:$4 sm:$0xff]  }
  0x16   : > { %v2462_v47 = vld [vmem:[%s3797_s3 + $0x144] ss:$8 sps:$4 sm:$0xff]   ;;  %v2419_v49 = vld [vmem:[%s2787_s8 + $0x30] sm:$0xff]   ;;  %v2439_v50 = vld [vmem:[%s3797_s3 + $0x40] ss:$8 sps:$4 sm:$0xff]  }
  0x17   : > { %481 = vmatpush1.bf16.msra.mxu0 %v2400_v15  ;;  %v2460_v51 = vld [vmem:[%s3797_s3 + $0x140] ss:$8 sps:$4 sm:$0xff]   ;;  %v2447_v52 = vld [vmem:[%s3797_s3 + $0x54] ss:$8 sps:$4 sm:$0xff]   ;;  %v2445_v54 = vld [vmem:[%s3797_s3 + $0x50] ss:$8 sps:$4 sm:$0xff]  }
  0x18   : > { %2285 = vmatpush3.bf16.msra.mxu1 %v2399_v14  ;;  %482 = vmatprep.subr.bf16.mxu0 %v2401_v16  ;;  %v2471_v53 = vld [vmem:[%s3797_s3 + $0x154] ss:$8 sps:$4 sm:$0xff]   ;;  %v2469_v55 = vld [vmem:[%s3797_s3 + $0x150] ss:$8 sps:$4 sm:$0xff]   ;;  %v2450_v57 = vld [vmem:[%s3797_s3 + $0x64] ss:$8 sps:$4 sm:$0xff]  }
  0x19   : > { %2286 = vmatprep.subr.bf16.mxu1 %v2403_v17  ;;  %v2420_v56 = vld [vmem:[%s2787_s8 + $0x38] sm:$0xff]   ;;  %v2480_v58 = vld [vmem:[%s3797_s3 + $0x164] ss:$8 sps:$4 sm:$0xff]   ;;  %v2448_v59 = vld [vmem:[%s3797_s3 + $0x60] ss:$8 sps:$4 sm:$0xff]   ;;  %s3361_s8 = scalar_lea.vmem %s3799_s5, %s2259_s13 }
  0x1a   : > { %v2478_v60 = vld [vmem:[%s3797_s3 + $0x160] ss:$8 sps:$4 sm:$0xff]   ;;  %v2456_v61 = vld [vmem:[%s3797_s3 + $0x74] ss:$8 sps:$4 sm:$0xff]   ;;  %v2454_v62 = vld [vmem:[%s3797_s3 + $0x70] ss:$8 sps:$4 sm:$0xff]  }
  0x1b   : > { %483 = vmatpush1.bf16.msra.mxu0 %v2404_v18  ;;  %v2459_v63 = vld [vmem:[%s3797_s3 + $0x84] ss:$8 sps:$4 sm:$0xff]   ;;  %v2457_v0 = vld [vmem:[%s3797_s3 + $0x80] ss:$8 sps:$4 sm:$0xff]   ;;  %v2465_v1 = vld [vmem:[%s3797_s3 + $0x94] ss:$8 sps:$4 sm:$0xff]   ;;  %v281_v18 = vlaneseq }
  0x1c   : > { %2287 = vmatpush3.bf16.msra.mxu1 %v2403_v17  ;;  %484 = vmatprep.subr.bf16.mxu0 %v2405_v20  ;;  %v2463_v3 = vld [vmem:[%s3797_s3 + $0x90] ss:$8 sps:$4 sm:$0xff]   ;;  %v2468_v4 = vld [vmem:[%s3797_s3 + $0xa4] ss:$8 sps:$4 sm:$0xff]   ;;  %v2466_v5 = vld [vmem:[%s3797_s3 + $0xa0] ss:$8 sps:$4 sm:$0xff]  }
  0x1d   : > { %2288 = vmatprep.subr.bf16.mxu1 %v2407_v21  ;;  %v2474_v6 = vld [vmem:[%s3797_s3 + $0xb4] ss:$8 sps:$4 sm:$0xff]   ;;  %v2472_v7 = vld [vmem:[%s3797_s3 + $0xb0] ss:$8 sps:$4 sm:$0xff]   ;;  %v2477_v8 = vld [vmem:[%s3797_s3 + $0xc4] ss:$8 sps:$4 sm:$0xff]  }
  0x1e   : > { %v2475_v9 = vld [vmem:[%s3797_s3 + $0xc0] ss:$8 sps:$4 sm:$0xff]   ;;  %v2483_v10 = vld [vmem:[%s3797_s3 + $0xd4] ss:$8 sps:$4 sm:$0xff]   ;;  %v2481_v11 = vld [vmem:[%s3797_s3 + $0xd0] ss:$8 sps:$4 sm:$0xff]  }
  0x1f   : > { %485 = vmatpush1.bf16.msra.mxu0 %v2408_v22  ;;  %v2486_v12 = vld [vmem:[%s3797_s3 + $0xe4] ss:$8 sps:$4 sm:$0xff]   ;;  %v2484_v13 = vld [vmem:[%s3797_s3 + $0xe0] ss:$8 sps:$4 sm:$0xff]   ;;  %v2489_v14 = vld [vmem:[%s3797_s3 + $0x174] ss:$8 sps:$4 sm:$0xff]  }
  0x20   : > { %2289 = vmatpush3.bf16.msra.mxu1 %v2407_v21  ;;  %486 = vmatprep.subr.bf16.mxu0 %v2409_v23  ;;  %v2487_v15 = vld [vmem:[%s3797_s3 + $0x170] ss:$8 sps:$4 sm:$0xff]   ;;  %v2492_v16 = vld [vmem:[%s3797_s3 + $0xf4] ss:$8 sps:$4 sm:$0xff]   ;;  %v279_v22 = vld [vmem:[%s3796_s2] sm:$0x7] }
  0x21   : > { %2290 = vmatprep.subr.bf16.mxu1 %v2411_v24  ;;  %v2490_v17 = vld [vmem:[%s3797_s3 + $0xf0] ss:$8 sps:$4 sm:$0xff]  }
  0x23   : > { %487 = vmatpush1.bf16.msra.mxu0 %v2412_v25 }
  0x24   : > { %2291 = vmatpush3.bf16.msra.mxu1 %v2411_v24  ;;  %1167 = vmatprep.subr.bf16.mxu0 %v2426_v27 }
  0x25   : > { %1054 = vmatprep.subr.bf16.mxu1 %v2423_v26 }
  0x26   : > { %505 = vmatmul.mubr.bf16.vlgmr.msra.gmra.mrb[0].mxu0 %v2413_v19  ;;  %v2974_v19 = vshrl.u32 %v281_v18, 7 }
  0x27   : > { %2293 = vmatmul.mubr.bf16.vlgmr.msra.gmra.mrb[0].mxu1 %v2414_v28  ;;  %514 = vmatprep.mubr.bf16.mxu0 %v2693_v2 }
  0x28   : > { %2296 = vmatprep.mubr.bf16.mxu1 %v2415_v29  ;;  %1055 = vmatpush1.bf16.msra.mxu1 %v2421_v30  ;;  %v283_v20 = vsub.s32 0, %v2974_v19  ;;  %v291_v21 = vsub.s32 2, %v2974_v19  ;;  %v287_v23 = vsub.s32 1, %v2974_v19 }
  0x29   : > { %1168 = vmatpush1.bf16.msra.mxu0 %v2424_v31  ;;  %1056 = vmatprep.subr.bf16.mxu1 %v2429_v32 }
  0x2a   : > { %1169 = vmatprep.subr.bf16.mxu0 %v2435_v33  ;;  %v2984_v24 = vrot.slane %v279_v22, %v283_v20  ;;  %v2986_v25 = vrot.slane %v279_v22, %v291_v21  ;;  %v2990_v26 = vrot.slane %v279_v22, %v287_v23 }
  0x2c   : > { %1057 = vmatpush1.bf16.msra.mxu1 %v2427_v34 }
  0x2d   : > { %1170 = vmatpush1.bf16.msra.mxu0 %v2433_v35  ;;  %1058 = vmatprep.subr.bf16.mxu1 %v2432_v36 }
  0x2e   : > { %1171 = vmatprep.subr.bf16.mxu0 %v2444_v37  ;;  %515 = vmatmul.mubr.bf16.gmra.mrb[4].mxu0 %v2414_v28 }
  0x2f   : > { %2297 = vmatmul.mubr.bf16.gmra.mrb[4].mxu1 %v2416_v38  ;;  %524 = vmatprep.mubr.bf16.mxu0 %v2693_v2 }
  0x30   : > { %2300 = vmatprep.mubr.bf16.mxu1 %v2417_v39  ;;  %1059 = vmatpush1.bf16.msra.mxu1 %v2430_v40 }
  0x31   : > { %1172 = vmatpush1.bf16.msra.mxu0 %v2442_v41  ;;  %1060 = vmatprep.subr.bf16.mxu1 %v2438_v42 }
  0x32   : > { %1173 = vmatprep.subr.bf16.mxu0 %v2453_v43 }
  0x34   : > { %1061 = vmatpush1.bf16.msra.mxu1 %v2436_v44 }
  0x35   : > { %1174 = vmatpush1.bf16.msra.mxu0 %v2451_v45  ;;  %1062 = vmatprep.subr.bf16.mxu1 %v2441_v46 }
  0x36   : > { %1175 = vmatprep.subr.bf16.mxu0 %v2462_v47  ;;  %525 = vmatmul.mubr.bf16.gmra.mrb[8].mxu0 %v2415_v29 }
  0x37   : > { %2301 = vmatmul.mubr.bf16.gmra.mrb[8].mxu1 %v2418_v48  ;;  %534 = vmatprep.mubr.bf16.mxu0 %v2693_v2 }
  0x38   : > { %2304 = vmatprep.mubr.bf16.mxu1 %v2419_v49  ;;  %1063 = vmatpush1.bf16.msra.mxu1 %v2439_v50 }
  0x39   : > { %1176 = vmatpush1.bf16.msra.mxu0 %v2460_v51  ;;  %1064 = vmatprep.subr.bf16.mxu1 %v2447_v52 }
  0x3a   : > { %1177 = vmatprep.subr.bf16.mxu0 %v2471_v53 }
  0x3c   : > { %1065 = vmatpush1.bf16.msra.mxu1 %v2445_v54 }
  0x3d   : > { %1178 = vmatpush1.bf16.msra.mxu0 %v2469_v55  ;;  %1066 = vmatprep.subr.bf16.mxu1 %v2450_v57 }
  0x3e   : > { %1179 = vmatprep.subr.bf16.mxu0 %v2480_v58  ;;  %535 = vmatmul.mubr.bf16.gmra.mrb[12].mxu0 %v2416_v38 }
  0x3f   : > { %2305 = vmatmul.mubr.bf16.gmra.mrb[12].mxu1 %v2420_v56  ;;  %544 = vmatprep.mubr.bf16.mxu0 %v2693_v2 }
  0x40   : > { %1067 = vmatpush1.bf16.msra.mxu1 %v2448_v59 }
  0x41   : > { %1180 = vmatpush1.bf16.msra.mxu0 %v2478_v60  ;;  %1068 = vmatprep.subr.bf16.mxu1 %v2456_v61 }
  0x42   : > { %1181 = vmatprep.subr.bf16.mxu0 %v2489_v14 }
  0x44   : > { %1069 = vmatpush1.bf16.msra.mxu1 %v2454_v62 }
  0x45   : > { %1070 = vmatprep.subr.bf16.mxu1 %v2459_v63  ;;  %1182 = vmatpush1.bf16.msra.mxu0 %v2487_v15 }
  0x46   : > { %545 = vmatmul.mubr.bf16.gmra.mrb[16].mxu0 %v2417_v39 }
  0x47   : > { %554 = vmatprep.mubr.bf16.mxu0 %v2693_v2 }
  0x48   : > { %1071 = vmatpush1.bf16.msra.mxu1 %v2457_v0 }
  0x49   : > { %1072 = vmatprep.subr.bf16.mxu1 %v2465_v1 }
  0x4c   : > { %1073 = vmatpush1.bf16.msra.mxu1 %v2463_v3 }
  0x4d   : > { %1074 = vmatprep.subr.bf16.mxu1 %v2468_v4 }
  0x4e   : > { %555 = vmatmul.mubr.bf16.gmra.mrb[20].mxu0 %v2418_v48 }
  0x4f   : > { %564 = vmatprep.mubr.bf16.mxu0 %v2693_v2 }
  0x50   : > { %1075 = vmatpush1.bf16.msra.mxu1 %v2466_v5 }
  0x51   : > { %1076 = vmatprep.subr.bf16.mxu1 %v2474_v6 }
  0x54   : > { %1077 = vmatpush1.bf16.msra.mxu1 %v2472_v7 }
  0x55   : > { %1078 = vmatprep.subr.bf16.mxu1 %v2477_v8 }
  0x56   : > { %565 = vmatmul.mubr.bf16.gmra.mrb[24].mxu0 %v2419_v49 }
  0x57   : > { %574 = vmatprep.mubr.bf16.mxu0 %v2693_v2 }
  0x58   : > { %1079 = vmatpush1.bf16.msra.mxu1 %v2475_v9 }
  0x59   : > { %1080 = vmatprep.subr.bf16.mxu1 %v2483_v10 }
  0x5c   : > { %1081 = vmatpush1.bf16.msra.mxu1 %v2481_v11 }
  0x5d   : > { %1082 = vmatprep.subr.bf16.mxu1 %v2486_v12 }
  0x5e   : > { %575 = vmatmul.mubr.bf16.gmra.mrb[28].mxu0 %v2420_v56 }
  0x5f   : > { %1199 = vmatprep.mubr.bf16.mxu0 %v2693_v2 }
  0x60   : > { %1083 = vmatpush1.bf16.msra.mxu1 %v2484_v13 }
  0x61   : > { %1084 = vmatprep.subr.bf16.mxu1 %v2492_v16 }
  0x64   : > { %1085 = vmatpush1.bf16.msra.mxu1 %v2490_v17 }
  0xf9   : > { %v506_v27 = vpop.f32.mrb[0].mxu0 }
  0xfa   : > { %v2294_v28 = vpop.f32.mrb[0].mxu1  ;;  %v507_v29 = vadd.f32 %v506_v27, %v2984_v24  ;;  %v508_v31 = vpop.f32.mrb[1].mxu0 }
  0xfb   : > { %v628_v30 = vadd.f32 %v2294_v28, %v2986_v25  ;;  %v619_v32 = vpop.f32.mrb[1].mxu1  ;;  %v509_v33 = vadd.f32 %v508_v31, %v2990_v26  ;;  %v510_v35 = vpop.f32.mrb[2].mxu0 }
  0xfc   : > { %v620_v34 = vadd.f32 %v619_v32, %v2986_v25  ;;  %v2295_v36 = vpop.f32.mrb[2].mxu1  ;;  %v511_v38 = vadd.f32 %v510_v35, %v2984_v24  ;;  %v512_v40 = vpop.f32.mrb[3].mxu0  ;;  %v682_v45 = vmax.f32 %v507_v29, 0.0 }
  0xfd   : > { %v690_v37 = vmax.f32 %v628_v30, 0.0  ;;  %v631_v39 = vadd.f32 %v2295_v36, %v2986_v25  ;;  %v622_v41 = vpop.f32.mrb[3].mxu1  ;;  %v513_v43 = vadd.f32 %v512_v40, %v2990_v26  ;;  %v683_v48 = vmax.f32 %v509_v33, 0.0 }
  0xfe   : > { %v684_v42 = vmax.f32 %v620_v34, 0.0  ;;  %v623_v44 = vadd.f32 %v622_v41, %v2986_v25  ;;  %v685_v46 = vmax.f32 %v511_v38, 0.0 }
  0xff   : > { %v693_v47 = vmax.f32 %v631_v39, 0.0  ;;  %v686_v49 = vmax.f32 %v513_v43, 0.0 }
 0x100   : > { %v687_v50 = vmax.f32 %v623_v44, 0.0  ;;  %v730_v51 = vpack.c.bf16 %v685_v46, %v682_v45 }
 0x101   : > { %v735_v52 = vpack.c.bf16 %v693_v47, %v690_v37  ;;  %v731_v53 = vpack.c.bf16 %v686_v49, %v683_v48  ;;  %v516_v55 = vpop.f32.mrb[4].mxu0 }
 0x102   : > { %v732_v54 = vpack.c.bf16 %v687_v50, %v684_v42  ;;  %v2298_v56 = vpop.f32.mrb[4].mxu1  ;;  %v517_v57 = vadd.f32 %v516_v55, %v2984_v24  ;;  %v518_v58 = vpop.f32.mrb[5].mxu0 }
 0x103   : > { %v644_v59 = vadd.f32 %v2298_v56, %v2986_v25  ;;  %v635_v60 = vpop.f32.mrb[5].mxu1  ;;  %v519_v61 = vadd.f32 %v518_v58, %v2990_v26  ;;  %v520_v62 = vpop.f32.mrb[6].mxu0  ;;  %1086 = vmatprep.mubr.bf16.mxu1 %v731_v53 }
 0x104   : > { %1200 = vmatmul.mubr.bf16.vlgmr.msra.gmra.mrb[32].mxu0 %v732_v54  ;;  %v636_v63 = vadd.f32 %v635_v60, %v2986_v25  ;;  %v2299_v0 = vpop.f32.mrb[6].mxu1  ;;  %v521_v1 = vadd.f32 %v520_v62, %v2984_v24  ;;  %v522_v3 = vpop.f32.mrb[7].mxu0  ;;  %1087 = vmatmul.mubr.bf16.vlgmr.msra.gmra.mrb[16].mxu1 %v730_v51  ;;  %v688_v10 = vmax.f32 %v517_v57, 0.0 }
 0x105   : > { %v702_v4 = vmax.f32 %v644_v59, 0.0  ;;  %1209 = vmatprep.mubr.bf16.mxu0 %v2693_v2  ;;  %v647_v5 = vadd.f32 %v2299_v0, %v2986_v25  ;;  %v638_v6 = vpop.f32.mrb[7].mxu1  ;;  %v523_v7 = vadd.f32 %v522_v3, %v2990_v26  ;;  %v689_v13 = vmax.f32 %v519_v61, 0.0 }
 0x106   : > { %v696_v8 = vmax.f32 %v636_v63, 0.0  ;;  %v639_v9 = vadd.f32 %v638_v6, %v2986_v25  ;;  %v691_v11 = vmax.f32 %v521_v1, 0.0 }
 0x107   : > { %v705_v12 = vmax.f32 %v647_v5, 0.0  ;;  %v692_v14 = vmax.f32 %v523_v7, 0.0 }
 0x108   : > { %v699_v15 = vmax.f32 %v639_v9, 0.0  ;;  %v733_v16 = vpack.c.bf16 %v691_v11, %v688_v10 }
 0x109   : > { %v3009_v17 = vpack.c.bf16 %v705_v12, %v702_v4  ;;  %v734_v21 = vpack.c.bf16 %v692_v14, %v689_v13  ;;  %v526_v22 = vpop.f32.mrb[8].mxu0 }
 0x10a   : > { %v738_v27 = vpack.c.bf16 %v699_v15, %v696_v8  ;;  %v2302_v28 = vpop.f32.mrb[8].mxu1  ;;  %v527_v29 = vadd.f32 %v526_v22, %v2984_v24  ;;  %v528_v30 = vpop.f32.mrb[9].mxu0 }
 0x10b   : > { %v660_v31 = vadd.f32 %v2302_v28, %v2986_v25  ;;  %v651_v32 = vpop.f32.mrb[9].mxu1  ;;  %v529_v33 = vadd.f32 %v528_v30, %v2990_v26  ;;  %v530_v34 = vpop.f32.mrb[10].mxu0  ;;  %1096 = vmatprep.mubr.bf16.mxu1 %v734_v21 }
 0x10c   : > { %1210 = vmatmul.mubr.bf16.gmra.mrb[36].mxu0 %v735_v52  ;;  %v652_v35 = vadd.f32 %v651_v32, %v2986_v25  ;;  %v2303_v36 = vpop.f32.mrb[10].mxu1  ;;  %v694_v37 = vmax.f32 %v527_v29, 0.0  ;;  %v531_v38 = vadd.f32 %v530_v34, %v2984_v24  ;;  %v532_v39 = vpop.f32.mrb[11].mxu0  ;;  %1097 = vmatmul.mubr.bf16.gmra.mrb[20].mxu1 %v733_v16 }
 0x10d   : > { %1219 = vmatprep.mubr.bf16.mxu0 %v2693_v2  ;;  %v714_v40 = vmax.f32 %v660_v31, 0.0  ;;  %v663_v41 = vadd.f32 %v2303_v36, %v2986_v25  ;;  %v654_v42 = vpop.f32.mrb[11].mxu1  ;;  %v695_v43 = vmax.f32 %v529_v33, 0.0  ;;  %v533_v44 = vadd.f32 %v532_v39, %v2990_v26 }
 0x10e   : > { %v708_v45 = vmax.f32 %v652_v35, 0.0  ;;  %v655_v46 = vadd.f32 %v654_v42, %v2986_v25  ;;  %v697_v47 = vmax.f32 %v531_v38, 0.0 }
 0x10f   : > { %v717_v48 = vmax.f32 %v663_v41, 0.0  ;;  %v698_v49 = vmax.f32 %v533_v44, 0.0 }
 0x110   : > { %v711_v50 = vmax.f32 %v655_v46, 0.0  ;;  %v736_v51 = vpack.c.bf16 %v697_v47, %v694_v37 }
 0x111   : > { %v3020_v52 = vpack.c.bf16 %v717_v48, %v714_v40  ;;  %v737_v53 = vpack.c.bf16 %v698_v49, %v695_v43  ;;  %v536_v54 = vpop.f32.mrb[12].mxu0 }
 0x112   : > { %v744_v55 = vpack.c.bf16 %v711_v50, %v708_v45  ;;  %v2306_v56 = vpop.f32.mrb[12].mxu1  ;;  %v537_v57 = vadd.f32 %v536_v54, %v2984_v24  ;;  %v538_v58 = vpop.f32.mrb[13].mxu0 }
 0x113   : > { %v676_v59 = vadd.f32 %v2306_v56, %v2986_v25  ;;  %v667_v60 = vpop.f32.mrb[13].mxu1  ;;  %v539_v61 = vadd.f32 %v538_v58, %v2990_v26  ;;  %v540_v62 = vpop.f32.mrb[14].mxu0  ;;  %1106 = vmatprep.mubr.bf16.mxu1 %v737_v53 }
 0x114   : > { %1220 = vmatmul.mubr.bf16.gmra.mrb[40].mxu0 %v738_v27  ;;  %v668_v63 = vadd.f32 %v667_v60, %v2986_v25  ;;  %v2307_v0 = vpop.f32.mrb[14].mxu1  ;;  %v700_v1 = vmax.f32 %v537_v57, 0.0  ;;  %v541_v3 = vadd.f32 %v540_v62, %v2984_v24  ;;  %v542_v4 = vpop.f32.mrb[15].mxu0  ;;  %1107 = vmatmul.mubr.bf16.gmra.mrb[24].mxu1 %v736_v51 }
 0x115   : > { %1229 = vmatprep.mubr.bf16.mxu0 %v2693_v2  ;;  %v726_v5 = vmax.f32 %v676_v59, 0.0  ;;  %v679_v6 = vadd.f32 %v2307_v0, %v2986_v25  ;;  %v670_v7 = vpop.f32.mrb[15].mxu1  ;;  %v701_v8 = vmax.f32 %v539_v61, 0.0  ;;  %v543_v9 = vadd.f32 %v542_v4, %v2990_v26 }
 0x116   : > { %v720_v10 = vmax.f32 %v668_v63, 0.0  ;;  %v671_v11 = vadd.f32 %v670_v7, %v2986_v25  ;;  %v703_v12 = vmax.f32 %v541_v3, 0.0 }
 0x117   : > { %v729_v13 = vmax.f32 %v679_v6, 0.0  ;;  %v704_v14 = vmax.f32 %v543_v9, 0.0 }
 0x118   : > { %v723_v15 = vmax.f32 %v671_v11, 0.0  ;;  %v739_v16 = vpack.c.bf16 %v703_v12, %v700_v1 }
 0x119   : > { %v3031_v21 = vpack.c.bf16 %v729_v13, %v726_v5  ;;  %v740_v22 = vpack.c.bf16 %v704_v14, %v701_v8  ;;  %v546_v27 = vpop.f32.mrb[16].mxu0 }
 0x11a   : > { %v750_v28 = vpack.c.bf16 %v723_v15, %v720_v10  ;;  %v547_v29 = vadd.f32 %v546_v27, %v2984_v24  ;;  %v548_v30 = vpop.f32.mrb[17].mxu0 }
 0x11b   : > { %1116 = vmatprep.mubr.bf16.mxu1 %v740_v22  ;;  %v549_v31 = vadd.f32 %v548_v30, %v2990_v26  ;;  %v550_v32 = vpop.f32.mrb[18].mxu0 }
 0x11c   : > { %1230 = vmatmul.mubr.bf16.gmra.mrb[44].mxu0 %v3009_v17  ;;  %v706_v25 = vmax.f32 %v547_v29, 0.0  ;;  %1117 = vmatmul.mubr.bf16.gmra.mrb[28].mxu1 %v739_v16  ;;  %v551_v33 = vadd.f32 %v550_v32, %v2984_v24  ;;  %v552_v34 = vpop.f32.mrb[19].mxu0 }
 0x11d   : > { %1239 = vmatprep.mubr.bf16.mxu0 %v2693_v2  ;;  %v707_v35 = vmax.f32 %v549_v31, 0.0  ;;  %v553_v36 = vadd.f32 %v552_v34, %v2990_v26 }
 0x11e   : > { %v709_v37 = vmax.f32 %v551_v33, 0.0 }
 0x11f   : > { %v710_v38 = vmax.f32 %v553_v36, 0.0 }
 0x120   : > { %v742_v39 = vpack.c.bf16 %v709_v37, %v706_v25 }
 0x121   : > { %v743_v40 = vpack.c.bf16 %v710_v38, %v707_v35  ;;  %v556_v41 = vpop.f32.mrb[20].mxu0 }
 0x122   : > { %v557_v17 = vadd.f32 %v556_v41, %v2984_v24  ;;  %v558_v42 = vpop.f32.mrb[21].mxu0 }
 0x123   : > { %v559_v43 = vadd.f32 %v558_v42, %v2990_v26  ;;  %v560_v44 = vpop.f32.mrb[22].mxu0  ;;  %1126 = vmatprep.mubr.bf16.mxu1 %v743_v40 }
 0x124   : > { %1240 = vmatmul.mubr.bf16.gmra.mrb[48].mxu0 %v744_v55  ;;  %v712_v45 = vmax.f32 %v557_v17, 0.0  ;;  %v561_v46 = vadd.f32 %v560_v44, %v2984_v24  ;;  %v562_v47 = vpop.f32.mrb[23].mxu0  ;;  %1127 = vmatmul.mubr.bf16.gmra.mrb[32].mxu1 %v742_v39 }
 0x125   : > { %1249 = vmatprep.mubr.bf16.mxu0 %v2693_v2  ;;  %v713_v48 = vmax.f32 %v559_v43, 0.0  ;;  %v563_v49 = vadd.f32 %v562_v47, %v2990_v26 }
 0x126   : > { %v715_v50 = vmax.f32 %v561_v46, 0.0 }
 0x127   : > { %v716_v51 = vmax.f32 %v563_v49, 0.0 }
 0x128   : > { %v745_v53 = vpack.c.bf16 %v715_v50, %v712_v45 }
 0x129   : > { %v746_v54 = vpack.c.bf16 %v716_v51, %v713_v48  ;;  %v566_v56 = vpop.f32.mrb[24].mxu0 }
 0x12a   : > { %v567_v57 = vadd.f32 %v566_v56, %v2984_v24  ;;  %v568_v58 = vpop.f32.mrb[25].mxu0 }
 0x12b   : > { %1136 = vmatprep.mubr.bf16.mxu1 %v746_v54  ;;  %v569_v55 = vadd.f32 %v568_v58, %v2990_v26  ;;  %v570_v59 = vpop.f32.mrb[26].mxu0 }
 0x12c   : > { %1250 = vmatmul.mubr.bf16.gmra.mrb[52].mxu0 %v3020_v52  ;;  %1137 = vmatmul.mubr.bf16.gmra.mrb[36].mxu1 %v745_v53  ;;  %v718_v60 = vmax.f32 %v567_v57, 0.0  ;;  %v571_v61 = vadd.f32 %v570_v59, %v2984_v24  ;;  %v572_v62 = vpop.f32.mrb[27].mxu0 }
 0x12d   : > { %1259 = vmatprep.mubr.bf16.mxu0 %v2693_v2  ;;  %v719_v63 = vmax.f32 %v569_v55, 0.0  ;;  %v573_v0 = vadd.f32 %v572_v62, %v2990_v26 }
 0x12e   : > { %v721_v1 = vmax.f32 %v571_v61, 0.0 }
 0x12f   : > { %v722_v3 = vmax.f32 %v573_v0, 0.0 }
 0x130   : > { %v748_v4 = vpack.c.bf16 %v721_v1, %v718_v60 }
 0x131   : > { %v749_v5 = vpack.c.bf16 %v722_v3, %v719_v63  ;;  %v576_v6 = vpop.f32.mrb[28].mxu0 }
 0x132   : > { %v577_v52 = vadd.f32 %v576_v6, %v2984_v24  ;;  %v578_v7 = vpop.f32.mrb[29].mxu0 }
 0x133   : > { %v579_v8 = vadd.f32 %v578_v7, %v2990_v26  ;;  %v580_v9 = vpop.f32.mrb[30].mxu0  ;;  %1146 = vmatprep.mubr.bf16.mxu1 %v749_v5 }
 0x134   : > { %1260 = vmatmul.mubr.bf16.gmra.mrb[56].mxu0 %v750_v28  ;;  %v724_v10 = vmax.f32 %v577_v52, 0.0  ;;  %v581_v11 = vadd.f32 %v580_v9, %v2984_v24  ;;  %v582_v12 = vpop.f32.mrb[31].mxu0  ;;  %1147 = vmatmul.mubr.bf16.gmra.mrb[40].mxu1 %v748_v4  ;;  %v802_v28 = vld [vmem:[%s3798_s4] sm:$0x3] }
 0x135   : > { %1269 = vmatprep.mubr.bf16.mxu0 %v2693_v2  ;;  %v725_v13 = vmax.f32 %v579_v8, 0.0  ;;  %v583_v14 = vadd.f32 %v582_v12, %v2990_v26  ;;  %v3061_v24 = vrot.slane %v802_v28, %v283_v20  ;;  %v3065_v2 = vrot.slane %v802_v28, %v287_v23 }
 0x136   : > { %v727_v15 = vmax.f32 %v581_v11, 0.0  ;;  %v1281_v26 = vand.u32 127, %v281_v18 }
 0x137   : > { %v728_v16 = vmax.f32 %v583_v14, 0.0 }
 0x138   : > { %v751_v22 = vpack.c.bf16 %v727_v15, %v724_v10  ;;  %v3070_v36 = vadd.s32 128, %v1281_v26 }
 0x139   : > { %v752_v27 = vpack.c.bf16 %v728_v16, %v725_v13 }
 0x13a   : > { %vm1290_vm0 = vcmp.eq.s32.totalorder %v3070_v36, 135  ;;  %vm1286_vm1 = vcmp.lt.s32.totalorder %v3070_v36, 132 }
 0x13b   : > { %1156 = vmatprep.mubr.bf16.mxu1 %v752_v27 }
 0x13c   : > { %1270 = vmatmul.mubr.bf16.gmra.mrb[60].mxu0 %v3031_v21  ;;  %1157 = vmatmul.mubr.bf16.gmra.mrb[44].mxu1 %v751_v22 }
 0x1d7   : > { %v1201_v29 = vpop.f32.mrb[32].mxu0  ;;  %v1088_v30 = vpop.f32.mrb[16].mxu1 }
 0x1d8   : > { %v1203_v31 = vpop.f32.mrb[33].mxu0  ;;  %v1089_v21 = vadd.f32 %v1088_v30, %v3061_v24  ;;  %v1090_v32 = vpop.f32.mrb[17].mxu1 }
 0x1d9   : > { %v1205_v25 = vpop.f32.mrb[34].mxu0  ;;  %v1091_v33 = vadd.f32 %v1090_v32, %v3065_v2  ;;  %v1092_v34 = vpop.f32.mrb[18].mxu1 }
 0x1da   : > { %v1207_v35 = vpop.f32.mrb[35].mxu0  ;;  %v1093_v20 = vadd.f32 %v1092_v34, %v3061_v24  ;;  %v1094_v19 = vpop.f32.mrb[19].mxu1  ;;  %v3073_v23 = vadd.f32 %v1201_v29, %v1089_v21 }
 0x1db   : > { %v3075_v37 = vadd.f32 %v1203_v31, %v1091_v33  ;;  %v1095_v18 = vadd.f32 %v1094_v19, %v3065_v2 }
 0x1dc   : > { %v1291_v38 = vmul.f32 %v3073_v23, %v3073_v23  ;;  %v3080_v39 = vadd.f32 %v1205_v25, %v1093_v20 }
 0x1dd   : > { %v3082_v40 = vadd.f32 %v1207_v35, %v1095_v18  ;;  %v1756_v50 = vsel %vm1290_vm0, %v3075_v37, 0.0  ;;  %v1292_v51 = vmul.f32 %v3075_v37, %v3075_v37 }
 0x1de   : > { %1323 = vadd.xlane.f32.xlu0 %v1291_v38  ;;  %v1293_v17 = vmul.f32 %v3080_v39, %v3080_v39 }
 0x1df   : > { %v1211_v41 = vpop.f32.mrb[36].mxu0  ;;  %v1098_v42 = vpop.f32.mrb[20].mxu1  ;;  %v1758_v55 = vsel %vm1290_vm0, %v3082_v40, 0.0  ;;  %v1356_v61 = vsel %vm1286_vm1, %v1292_v51, 0.0  ;;  %v1294_v63 = vmul.f32 %v3082_v40, %v3082_v40 }
 0x1e0   : > { %v1213_v43 = vpop.f32.mrb[37].mxu0  ;;  %v1099_v44 = vadd.f32 %v1098_v42, %v3061_v24  ;;  %v1100_v45 = vpop.f32.mrb[21].mxu1  ;;  %1325 = vadd.xlane.f32.xlu1 %v1293_v17 }
 0x1e1   : > { %v1215_v46 = vpop.f32.mrb[38].mxu0  ;;  %v1101_v47 = vadd.f32 %v1100_v45, %v3065_v2  ;;  %v1102_v48 = vpop.f32.mrb[22].mxu1  ;;  %v1358_v9 = vsel %vm1286_vm1, %v1294_v63, 0.0 }
 0x1e2   : > { %v1217_v49 = vpop.f32.mrb[39].mxu0  ;;  %v3095_v53 = vadd.f32 %v1211_v41, %v1099_v44  ;;  %v1103_v54 = vadd.f32 %v1102_v48, %v3061_v24  ;;  %v1104_v56 = vpop.f32.mrb[23].mxu1  ;;  %1788 = vadd.xlane.f32.xlu0 %v1756_v50 }
 0x1e3   : > { %v3098_v57 = vadd.f32 %v1213_v43, %v1101_v47  ;;  %v1105_v58 = vadd.f32 %v1104_v56, %v3065_v2 }
 0x1e4   : > { %v3104_v59 = vadd.f32 %v1215_v46, %v1103_v54  ;;  %1791 = vadd.xlane.f32.xlu1 %v1758_v55  ;;  %v1295_v27 = vmul.f32 %v3095_v53, %v3095_v53 }
 0x1e5   : > { %v3106_v60 = vadd.f32 %v1217_v49, %v1105_v58  ;;  %v1296_v62 = vmul.f32 %v3098_v57, %v3098_v57  ;;  %v1760_v19 = vsel %vm1290_vm0, %v3098_v57, 0.0 }
 0x1e6   : > { %1388 = vadd.xlane.f32.xlu0 %v1356_v61  ;;  %v1297_v14 = vmul.f32 %v3104_v59, %v3104_v59 }
 0x1e7   : > { %v1221_v0 = vpop.f32.mrb[40].mxu0  ;;  %v1108_v1 = vpop.f32.mrb[24].mxu1  ;;  %v1360_v3 = vsel %vm1286_vm1, %v1296_v62, 0.0  ;;  %v1762_v31 = vsel %vm1290_vm0, %v3106_v60, 0.0  ;;  %v1298_v21 = vmul.f32 %v3106_v60, %v3106_v60 }
 0x1e8   : > { %v1223_v4 = vpop.f32.mrb[41].mxu0  ;;  %v1109_v5 = vadd.f32 %v1108_v1, %v3061_v24  ;;  %1394 = vadd.xlane.f32.xlu1 %v1360_v3  ;;  %v1110_v6 = vpop.f32.mrb[25].mxu1 }
 0x1e9   : > { %v1225_v52 = vpop.f32.mrb[42].mxu0  ;;  %v1111_v7 = vadd.f32 %v1110_v6, %v3065_v2  ;;  %v1112_v8 = vpop.f32.mrb[26].mxu1  ;;  %v1362_v43 = vsel %vm1286_vm1, %v1298_v21, 0.0 }
 0x1ea   : > { %v1227_v10 = vpop.f32.mrb[43].mxu0  ;;  %v1113_v11 = vadd.f32 %v1112_v8, %v3061_v24  ;;  %v3121_v12 = vadd.f32 %v1221_v0, %v1109_v5  ;;  %1391 = vadd.xlane.f32.xlu0 %v1358_v9  ;;  %v1114_v13 = vpop.f32.mrb[27].mxu1 }
 0x1eb   : > { %v1115_v15 = vadd.f32 %v1114_v13, %v3065_v2  ;;  %v3126_v16 = vadd.f32 %v1223_v4, %v1111_v7 }
 0x1ec   : > { %v3128_v22 = vadd.f32 %v1225_v52, %v1113_v11  ;;  %1329 = vadd.xlane.f32.xlu1 %v1297_v14  ;;  %v1299_v45 = vmul.f32 %v3121_v12, %v3121_v12 }
 0x1ed   : > { %v3132_v28 = vadd.f32 %v1227_v10, %v1115_v15  ;;  %v1764_v58 = vsel %vm1290_vm0, %v3126_v16, 0.0  ;;  %v1300_v61 = vmul.f32 %v3126_v16, %v3126_v16 }
 0x1ee   : > { %1327 = vadd.xlane.f32.xlu0 %v1295_v27  ;;  %v1301_v47 = vmul.f32 %v3128_v22, %v3128_v22 }
 0x1ef   : > { %v1231_v26 = vpop.f32.mrb[44].mxu0  ;;  %v1118_v29 = vpop.f32.mrb[28].mxu1  ;;  %v1766_v4 = vsel %vm1290_vm0, %v3132_v28, 0.0  ;;  %v1302_v52 = vmul.f32 %v3132_v28, %v3132_v28  ;;  %v1364_v8 = vsel %vm1286_vm1, %v1300_v61, 0.0 }
 0x1f0   : > { %v1233_v30 = vpop.f32.mrb[45].mxu0  ;;  %v1119_v32 = vadd.f32 %v1118_v29, %v3061_v24  ;;  %v1120_v25 = vpop.f32.mrb[29].mxu1  ;;  %1797 = vadd.xlane.f32.xlu1 %v1762_v31 }
 0x1f1   : > { %v1235_v33 = vpop.f32.mrb[46].mxu0  ;;  %v1121_v34 = vadd.f32 %v1120_v25, %v3065_v2  ;;  %v1122_v35 = vpop.f32.mrb[30].mxu1  ;;  %v1366_v11 = vsel %vm1286_vm1, %v1302_v52, 0.0 }
 0x1f2   : > { %v1237_v20 = vpop.f32.mrb[47].mxu0  ;;  %v3144_v18 = vadd.f32 %v1231_v26, %v1119_v32  ;;  %v1123_v38 = vadd.f32 %v1122_v35, %v3061_v24  ;;  %v1124_v41 = vpop.f32.mrb[31].mxu1  ;;  %1794 = vadd.xlane.f32.xlu0 %v1760_v19 }
 0x1f3   : > { %v3147_v17 = vadd.f32 %v1233_v30, %v1121_v34  ;;  %v1125_v42 = vadd.f32 %v1124_v41, %v3065_v2 }
 0x1f4   : > { %v3152_v44 = vadd.f32 %v1235_v33, %v1123_v38  ;;  %1397 = vadd.xlane.f32.xlu1 %v1362_v43  ;;  %v1303_v26 = vmul.f32 %v3144_v18, %v3144_v18 }
 0x1f5   : > { %v3156_v46 = vadd.f32 %v1237_v20, %v1125_v42  ;;  %v1768_v41 = vsel %vm1290_vm0, %v3147_v17, 0.0  ;;  %v1304_v42 = vmul.f32 %v3147_v17, %v3147_v17 }
 0x1f6   : > { %1331 = vadd.xlane.f32.xlu0 %v1299_v45  ;;  %v1305_v34 = vmul.f32 %v3152_v44, %v3152_v44 }
 0x1f7   : > { %v1241_v48 = vpop.f32.mrb[48].mxu0  ;;  %v1128_v49 = vpop.f32.mrb[32].mxu1  ;;  %v1770_v45 = vsel %vm1290_vm0, %v3156_v46, 0.0 }
 0x1f8   : > { %v1243_v50 = vpop.f32.mrb[49].mxu0  ;;  %1333 = vadd.xlane.f32.xlu1 %v1301_v47  ;;  %v1129_v51 = vadd.f32 %v1128_v49, %v3061_v24  ;;  %v1130_v54 = vpop.f32.mrb[33].mxu1  ;;  %v1306_v47 = vmul.f32 %v3156_v46, %v3156_v46 }
 0x1f9   : > { %v1245_v56 = vpop.f32.mrb[50].mxu0  ;;  %v1131_v55 = vadd.f32 %v1130_v54, %v3065_v2  ;;  %v1132_v62 = vpop.f32.mrb[34].mxu1 }
 0x1fa   : > { %v1247_v63 = vpop.f32.mrb[51].mxu0  ;;  %1800 = vadd.xlane.f32.xlu0 %v1764_v58  ;;  %v1133_v0 = vadd.f32 %v1132_v62, %v3061_v24  ;;  %v3168_v1 = vadd.f32 %v1241_v48, %v1129_v51  ;;  %v1134_v3 = vpop.f32.mrb[35].mxu1 }
 0x1fb   : > { %v1135_v5 = vadd.f32 %v1134_v3, %v3065_v2  ;;  %v3174_v6 = vadd.f32 %v1243_v50, %v1131_v55  ;;  %v1370_v3 = vsel %vm1286_vm1, %v1306_v47, 0.0 }
 0x1fc   : > { %1803 = vadd.xlane.f32.xlu1 %v1766_v4  ;;  %v3178_v7 = vadd.f32 %v1245_v56, %v1133_v0  ;;  %v1368_v56 = vsel %vm1286_vm1, %v1304_v42, 0.0  ;;  %v1307_v52 = vmul.f32 %v3168_v1, %v3168_v1 }
 0x1fd   : > { %v3182_v9 = vadd.f32 %v1247_v63, %v1135_v5 }
 0x1fe   : > { %1400 = vadd.xlane.f32.xlu0 %v1364_v8 }
 0x1ff   : > { %v1251_v10 = vpop.f32.mrb[52].mxu0  ;;  %v1138_v13 = vpop.f32.mrb[36].mxu1  ;;  %v1774_v42 = vsel %vm1290_vm0, %v3182_v9, 0.0 }
 0x200   : > { %v1253_v14 = vpop.f32.mrb[53].mxu0  ;;  %1403 = vadd.xlane.f32.xlu1 %v1366_v11  ;;  %v1139_v15 = vadd.f32 %v1138_v13, %v3061_v24  ;;  %v1140_v27 = vpop.f32.mrb[37].mxu1  ;;  %v1309_v11 = vmul.f32 %v3178_v7, %v3178_v7 }
 0x201   : > { %v1255_v29 = vpop.f32.mrb[54].mxu0  ;;  %v1141_v30 = vadd.f32 %v1140_v27, %v3065_v2  ;;  %v1142_v31 = vpop.f32.mrb[38].mxu1 }
 0x202   : > { %v1257_v21 = vpop.f32.mrb[55].mxu0  ;;  %1335 = vadd.xlane.f32.xlu0 %v1303_v26  ;;  %v1143_v32 = vadd.f32 %v1142_v31, %v3061_v24  ;;  %v3191_v25 = vadd.f32 %v1251_v10, %v1139_v15  ;;  %v1144_v33 = vpop.f32.mrb[39].mxu1  ;;  %v1308_v31 = vmul.f32 %v3174_v6, %v3174_v6 }
 0x203   : > { %v1145_v35 = vadd.f32 %v1144_v33, %v3065_v2  ;;  %v3196_v20 = vadd.f32 %v1253_v14, %v1141_v30  ;;  %v1772_v30 = vsel %vm1290_vm0, %v3174_v6, 0.0 }
 0x204   : > { %1337 = vadd.xlane.f32.xlu1 %v1305_v34  ;;  %v3198_v19 = vadd.f32 %v1255_v29, %v1143_v32 }
 0x205   : > { %v3200_v38 = vadd.f32 %v1257_v21, %v1145_v35 }
 0x206   : > { %1806 = vadd.xlane.f32.xlu0 %v1768_v41 }
 0x207   : > { %v1261_v43 = vpop.f32.mrb[56].mxu0  ;;  %v1148_v48 = vpop.f32.mrb[40].mxu1 }
 0x208   : > { %v1263_v49 = vpop.f32.mrb[57].mxu0  ;;  %1809 = vadd.xlane.f32.xlu1 %v1770_v45  ;;  %v1149_v50 = vadd.f32 %v1148_v48, %v3061_v24  ;;  %v1150_v51 = vpop.f32.mrb[41].mxu1 }
 0x209   : > { %v1265_v54 = vpop.f32.mrb[58].mxu0  ;;  %v1151_v58 = vadd.f32 %v1150_v51, %v3065_v2  ;;  %v1152_v55 = vpop.f32.mrb[42].mxu1  ;;  %v1311_v51 = vmul.f32 %v3191_v25, %v3191_v25 }
 0x20a   : > { %v1267_v61 = vpop.f32.mrb[59].mxu0  ;;  %1406 = vadd.xlane.f32.xlu0 %v1368_v56  ;;  %v1153_v62 = vadd.f32 %v1152_v55, %v3061_v24  ;;  %v3217_v63 = vadd.f32 %v1261_v43, %v1149_v50  ;;  %v1154_v0 = vpop.f32.mrb[43].mxu1  ;;  %v1310_v43 = vmul.f32 %v3182_v9, %v3182_v9  ;;  %v1312_v56 = vmul.f32 %v3196_v20, %v3196_v20 }
 0x20b   : > { %v1155_v4 = vadd.f32 %v1154_v0, %v3065_v2  ;;  %v3222_v5 = vadd.f32 %v1263_v49, %v1151_v58  ;;  %v1778_v58 = vsel %vm1290_vm0, %v3200_v38, 0.0  ;;  %v1314_v55 = vmul.f32 %v3200_v38, %v3200_v38 }
 0x20c   : > { %1409 = vadd.xlane.f32.xlu1 %v1370_v3  ;;  %v3226_v8 = vadd.f32 %v1265_v54, %v1153_v62  ;;  %v1374_v50 = vsel %vm1286_vm1, %v1310_v43, 0.0  ;;  %v1776_v54 = vsel %vm1290_vm0, %v3196_v20, 0.0  ;;  %v1315_v0 = vmul.f32 %v3217_v63, %v3217_v63 }
 0x20d   : > { %v3228_v10 = vadd.f32 %v1267_v61, %v1155_v4  ;;  %v1376_v61 = vsel %vm1286_vm1, %v1312_v56, 0.0  ;;  %v1378_v62 = vsel %vm1286_vm1, %v1314_v55, 0.0  ;;  %v1316_v3 = vmul.f32 %v3222_v5, %v3222_v5 }
 0x20e   : > { %1339 = vadd.xlane.f32.xlu0 %v1307_v52  ;;  %v1317_v4 = vmul.f32 %v3226_v8, %v3226_v8 }
 0x20f   : > { %v1271_v13 = vpop.f32.mrb[60].mxu0  ;;  %v1158_v14 = vpop.f32.mrb[44].mxu1  ;;  %v1318_v52 = vmul.f32 %v3228_v10, %v3228_v10 }
 0x210   : > { %v1273_v15 = vpop.f32.mrb[61].mxu0  ;;  %1341 = vadd.xlane.f32.xlu1 %v1309_v11  ;;  %v1159_v27 = vadd.f32 %v1158_v14, %v3061_v24  ;;  %v1160_v26 = vpop.f32.mrb[45].mxu1  ;;  %v1380_v11 = vsel %vm1286_vm1, %v1316_v3, 0.0 }
 0x211   : > { %v1275_v29 = vpop.f32.mrb[62].mxu0  ;;  %v1161_v21 = vadd.f32 %v1160_v26, %v3065_v2  ;;  %v1162_v32 = vpop.f32.mrb[46].mxu1 }
 0x212   : > { %v1277_v33 = vpop.f32.mrb[63].mxu0  ;;  %1812 = vadd.xlane.f32.xlu0 %v1772_v30  ;;  %v1163_v34 = vadd.f32 %v1162_v32, %v3061_v24  ;;  %v3240_v35 = vadd.f32 %v1271_v13, %v1159_v27  ;;  %v1164_v41 = vpop.f32.mrb[47].mxu1  ;;  %v1372_v24 = vsel %vm1286_vm1, %v1308_v31, 0.0  ;;  %v1382_v13 = vsel %vm1286_vm1, %v1318_v52, 0.0 }
 0x213   : > { %v1165_v45 = vadd.f32 %v1164_v41, %v3065_v2  ;;  %v3248_v47 = vadd.f32 %v1273_v15, %v1161_v21  ;;  %v1313_v2 = vmul.f32 %v3198_v19, %v3198_v19  ;;  %v1780_v31 = vsel %vm1290_vm0, %v3222_v5, 0.0 }
 0x214   : > { %1815 = vadd.xlane.f32.xlu1 %v1774_v42  ;;  %v3250_v48 = vadd.f32 %v1275_v29, %v1163_v34  ;;  %v1319_v14 = vmul.f32 %v3240_v35, %v3240_v35  ;;  %v1782_v21 = vsel %vm1290_vm0, %v3228_v10, 0.0 }
 0x215   : > { %v3254_v49 = vadd.f32 %v1277_v33, %v1165_v45  ;;  %v1320_v15 = vmul.f32 %v3248_v47, %v3248_v47  ;;  %v1784_v32 = vsel %vm1290_vm0, %v3248_v47, 0.0 }
 0x216   : > { %1412 = vadd.xlane.f32.xlu0 %v1372_v24  ;;  %v1321_v27 = vmul.f32 %v3250_v48, %v3250_v48 }
 0x217   : > { %v1322_v26 = vmul.f32 %v3254_v49, %v3254_v49  ;;  %v1384_v29 = vsel %vm1286_vm1, %v1320_v15, 0.0  ;;  %v1786_v33 = vsel %vm1290_vm0, %v3254_v49, 0.0 }
 0x218   : > { %1415 = vadd.xlane.f32.xlu1 %v1374_v50 }
 0x219   : > { %v1386_v30 = vsel %vm1286_vm1, %v1322_v26, 0.0 }
 0x21a   : > { %1343 = vadd.xlane.f32.xlu0 %v1311_v51 }
 0x21c   : > { %1345 = vadd.xlane.f32.xlu1 %v1313_v2 }
 0x21e   : > { %1818 = vadd.xlane.f32.xlu0 %v1776_v54 }
 0x220   : > { %1821 = vadd.xlane.f32.xlu1 %v1778_v58 }
 0x222   : > { %1418 = vadd.xlane.f32.xlu0 %v1376_v61 }
 0x224   : > { %1421 = vadd.xlane.f32.xlu1 %v1378_v62 }
 0x226   : > { %1347 = vadd.xlane.f32.xlu0 %v1315_v0 }
 0x228   : > { %1349 = vadd.xlane.f32.xlu1 %v1317_v4 }
 0x22a   : > { %1424 = vadd.xlane.f32.xlu0 %v1380_v11 }
 0x22c   : > { %1427 = vadd.xlane.f32.xlu1 %v1382_v13 }
 0x22e   : > { %1351 = vadd.xlane.f32.xlu0 %v1319_v14 }
 0x230   : > { %1353 = vadd.xlane.f32.xlu1 %v1321_v27 }
 0x232   : > { %1430 = vadd.xlane.f32.xlu0 %v1384_v29 }
 0x234   : > { %1433 = vadd.xlane.f32.xlu1 %v1386_v30 }
 0x236   : > { %1824 = vadd.xlane.f32.xlu0 %v1780_v31 }
 0x238   : > { %1827 = vadd.xlane.f32.xlu1 %v1782_v21 }
 0x23a   : > { %1830 = vadd.xlane.f32.xlu0 %v1784_v32 }
 0x23c   : > { %1833 = vadd.xlane.f32.xlu1 %v1786_v33 }
 0x26b   : > { %v1324_v34 = vpop.xlane.xlu0 %1323 }
 0x26c   : > { %2493 = vrsqrt.f32 %v1324_v34  ;;  %vm1437_vm2 = vcmp.eq.f32.partialorder %v1324_v34, inf  ;;  %v1440_v55 = vand.u32 2147483648, %v1324_v34  ;;  %vm1439_vm3 = vcmp.eq.f32.partialorder %v1324_v34, 0.0 }
 0x26d   : > { %v1326_v41 = vpop.xlane.xlu1 %1325 }
 0x26e   : > { %2495 = vrsqrt.f32 %v1326_v41  ;;  %vm1444_vm4 = vcmp.eq.f32.partialorder %v1326_v41, inf  ;;  %v1447_v4 = vand.u32 2147483648, %v1326_v41  ;;  %vm1446_vm5 = vcmp.eq.f32.partialorder %v1326_v41, 0.0 }
 0x26f   : > { %v1789_v42 = vpop.xlane.xlu0 %1788 }
 0x270   : > { %v2241_v43 = vmul.f32 -1.442695, %v1789_v42 }
 0x271   : > { %v1792_v45 = vpop.xlane.xlu1 %1791 }
 0x272   : > { %2497 = vpow2.f32 %v2241_v43  ;;  %v2242_v50 = vmul.f32 -1.442695, %v1792_v45 }
 0x273   : > { %v1389_v24 = vpop.xlane.xlu0 %1388 }
 0x274   : > { %2499 = vrsqrt.f32 %v1389_v24  ;;  %vm1597_vm6 = vcmp.eq.f32.partialorder %v1389_v24, inf  ;;  %vm1599_vm7 = vcmp.eq.f32.partialorder %v1389_v24, 0.0  ;;  %v1600_v21 = vand.u32 2147483648, %v1389_v24 }
 0x275   : > { %v3312_v51 = vpop.xlane.xlu1 %1394 }
 0x276   : > { %v2494_v2 = vpop.eup %2493  ;;  %2501 = vrsqrt.f32 %v3312_v51  ;;  %vm1611_vm8 = vcmp.eq.f32.partialorder %v3312_v51, inf  ;;  %vm1613_vm9 = vcmp.eq.f32.partialorder %v3312_v51, 0.0 }
 0x277   : > { %v1436_v54 = vmul.f32 %v2494_v2, %v1324_v34  ;;  %v3315_v56 = vpop.xlane.xlu0 %1391 }
 0x278   : > { %v2496_v58 = vpop.eup %2495  ;;  %2503 = vrsqrt.f32 %v3315_v56  ;;  %vm1604_vm10 = vcmp.eq.f32.partialorder %v3315_v56, inf  ;;  %vm1606_vm11 = vcmp.eq.f32.partialorder %v3315_v56, 0.0  ;;  %v1607_v45 = vand.u32 2147483648, %v3315_v56 }
 0x279   : > { %v1438_v61 = vsel %vm1437_vm2, %v1324_v34, %v1436_v54  ;;  %v1443_v62 = vmul.f32 %v2496_v58, %v1326_v41  ;;  %2505 = vpow2.f32 %v2242_v50  ;;  %v3318_v0 = vpop.xlane.xlu1 %1329 }
 0x27a   : > { %v1441_v3 = vsel %vm1439_vm3, %v1440_v55, %v1438_v61  ;;  %2507 = vrsqrt.f32 %v3318_v0  ;;  %vm1458_vm12 = vcmp.eq.f32.partialorder %v3318_v0, inf  ;;  %vm1460_vm13 = vcmp.eq.f32.partialorder %v3318_v0, 0.0 }
 0x27b   : > { %v1547_v52 = vmax.f32 %v1441_v3, 1e-12  ;;  %v1445_v11 = vsel %vm1444_vm4, %v1326_v41, %v1443_v62  ;;  %v3321_v13 = vpop.xlane.xlu0 %1327  ;;  %v1614_v41 = vand.u32 2147483648, %v3312_v51 }
 0x27c   : > { %v2498_v14 = vpop.eup %2497  ;;  %v1448_v15 = vsel %vm1446_vm5, %v1447_v4, %v1445_v11  ;;  %2509 = vrsqrt.f32 %v3321_v13  ;;  %vm1451_vm14 = vcmp.eq.f32.partialorder %v3321_v13, inf  ;;  %vm1453_vm15 = vcmp.eq.f32.partialorder %v3321_v13, 0.0 }
 0x27d   : > { %2511 = vrcp.f32 %v1547_v52  ;;  %v1548_v27 = vmax.f32 %v1448_v15, 1e-12  ;;  %v1883_v26 = vadd.f32 1.0, %v2498_v14  ;;  %v1798_v29 = vpop.xlane.xlu1 %1797  ;;  %v1461_v14 = vand.u32 2147483648, %v3318_v0 }
 0x27e   : > { %v2244_v30 = vmul.f32 -1.442695, %v1798_v29  ;;  %v2500_v31 = vpop.eup %2499 }
 0x27f   : > { %2513 = vrcp.f32 %v1548_v27  ;;  %v1795_v32 = vpop.xlane.xlu0 %1794  ;;  %v1596_v34 = vmul.f32 %v2500_v31, %v1389_v24 }
 0x280   : > { %v2502_v33 = vpop.eup %2501  ;;  %v2243_v42 = vmul.f32 -1.442695, %v1795_v32  ;;  %2515 = vrcp.f32 %v1883_v26 }
 0x281   : > { %v1610_v43 = vmul.f32 %v2502_v33, %v3312_v51  ;;  %v3331_v50 = vpop.xlane.xlu1 %1397  ;;  %v1598_v54 = vsel %vm1597_vm6, %v1389_v24, %v1596_v34  ;;  %2517 = vpow2.f32 %v2244_v30 }
 0x282   : > { %v2504_v2 = vpop.eup %2503  ;;  %v1601_v55 = vsel %vm1599_vm7, %v1600_v21, %v1598_v54  ;;  %2519 = vpow2.f32 %v2243_v42  ;;  %v1454_v42 = vand.u32 2147483648, %v3321_v13  ;;  %vm1618_vm2 = vcmp.eq.f32.partialorder %v3331_v50, inf }
 0x283   : > { %v2506_v58 = vpop.eup %2505  ;;  %v1612_v61 = vsel %vm1611_vm8, %v3312_v51, %v1610_v43  ;;  %v1603_v62 = vmul.f32 %v2504_v2, %v3315_v56  ;;  %v3341_v3 = vpop.xlane.xlu0 %1331  ;;  %v1707_v52 = vmax.f32 %v1601_v55, 1e-12  ;;  %2521 = vrsqrt.f32 %v3331_v50 }
 0x284   : > { %v2508_v4 = vpop.eup %2507  ;;  %v1615_v11 = vsel %vm1613_vm9, %v1614_v41, %v1612_v61  ;;  %2523 = vrsqrt.f32 %v3341_v3  ;;  %v1884_v30 = vadd.f32 1.0, %v2506_v58  ;;  %vm1620_vm3 = vcmp.eq.f32.partialorder %v3331_v50, 0.0 }
 0x285   : > { %v1709_v24 = vmax.f32 %v1615_v11, 1e-12  ;;  %v1605_v15 = vsel %vm1604_vm10, %v3315_v56, %v1603_v62  ;;  %v1457_v27 = vmul.f32 %v2508_v4, %v3318_v0  ;;  %v3353_v26 = vpop.xlane.xlu1 %1333  ;;  %2525 = vrcp.f32 %v1707_v52 }
 0x286   : > { %v2510_v29 = vpop.eup %2509  ;;  %v1608_v51 = vsel %vm1606_vm11, %v1607_v45, %v1605_v15  ;;  %vm1465_vm4 = vcmp.eq.f32.partialorder %v3341_v3, inf  ;;  %vm1467_vm5 = vcmp.eq.f32.partialorder %v3341_v3, 0.0  ;;  %vm1472_vm6 = vcmp.eq.f32.partialorder %v3353_v26, inf }
 0x287   : > { %v2512_v31 = vpop.eup %2511  ;;  %2527 = vrcp.f32 %v1709_v24  ;;  %v1708_v21 = vmax.f32 %v1608_v51, 1e-12  ;;  %v1459_v32 = vsel %vm1458_vm12, %v3318_v0, %v1457_v27  ;;  %v1450_v33 = vmul.f32 %v2510_v29, %v3321_v13  ;;  %v1801_v34 = vpop.xlane.xlu0 %1800 }
 0x288   : > { %v1997_v56 = vmul.f32 %v2512_v31, %v3073_v23  ;;  %v1462_v41 = vsel %vm1460_vm13, %v1461_v14, %v1459_v32  ;;  %2529 = vrsqrt.f32 %v3353_v26  ;;  %v2245_v61 = vmul.f32 -1.442695, %v1801_v34 }
 0x289   : > { %v2514_v43 = vpop.eup %2513  ;;  %2531 = vrcp.f32 %v1708_v21  ;;  %v1550_v45 = vmax.f32 %v1462_v41, 1e-12  ;;  %v1452_v2 = vsel %vm1451_vm14, %v3321_v13, %v1450_v33  ;;  %v1804_v54 = vpop.xlane.xlu1 %1803  ;;  %vm1474_vm7 = vcmp.eq.f32.partialorder %v3353_v26, 0.0 }
 0x28a   : > { %2061 = vst [vmem:[%s3361_s8] sm:$0xff] %v1997_v56  ;;  %v1999_v58 = vmul.f32 %v2514_v43, %v3080_v39  ;;  %2533 = vrcp.f32 %v1884_v30  ;;  %v1455_v23 = vsel %vm1453_vm15, %v1454_v42, %v1452_v2  ;;  %v2516_v0 = vpop.eup %2515  ;;  %v1621_v39 = vand.u32 2147483648, %v3331_v50 }
 0x28b   : > { %2535 = vrcp.f32 %v1550_v45  ;;  %v1549_v55 = vmax.f32 %v1455_v23, 1e-12  ;;  %v3376_v62 = vpop.xlane.xlu0 %1400  ;;  %v2518_v4 = vpop.eup %2517  ;;  %v2246_v13 = vmul.f32 -1.442695, %v1804_v54  ;;  %v1468_v30 = vand.u32 2147483648, %v3341_v3 }
 0x28c   : > { %2063 = vst [vmem:[%s3361_s8 + $0x10] sm:$0xff] %v1999_v58  ;;  %2537 = vrsqrt.f32 %v3376_v62  ;;  %v2520_v52 = vpop.eup %2519  ;;  %v1886_v27 = vadd.f32 1.0, %v2518_v4  ;;  %v1475_v32 = vand.u32 2147483648, %v3353_v26  ;;  %vm1625_vm8 = vcmp.eq.f32.partialorder %v3376_v62, inf }
 0x28d   : > { %2539 = vrcp.f32 %v1549_v55  ;;  %v3383_v11 = vpop.xlane.xlu1 %1403  ;;  %v2522_v14 = vpop.eup %2521  ;;  %v1885_v24 = vadd.f32 1.0, %v2520_v52  ;;  %vm1627_vm9 = vcmp.eq.f32.partialorder %v3376_v62, 0.0 }
 0x28e   : > { %2541 = vpow2.f32 %v2245_v61  ;;  %v2524_v15 = vpop.eup %2523  ;;  %v1617_v29 = vmul.f32 %v2522_v14, %v3331_v50  ;;  %vm1632_vm10 = vcmp.eq.f32.partialorder %v3383_v11, inf  ;;  %vm1634_vm11 = vcmp.eq.f32.partialorder %v3383_v11, 0.0 }
 0x28f   : > { %v3390_v51 = vpop.xlane.xlu0 %1335  ;;  %v2526_v31 = vpop.eup %2525  ;;  %2543 = vrcp.f32 %v1885_v24  ;;  %v1464_v21 = vmul.f32 %v2524_v15, %v3341_v3 }
 0x290   : > { %v1934_v34 = vsel %vm1286_vm1, %v2526_v31, 1.0  ;;  %v1619_v56 = vsel %vm1618_vm2, %v3331_v50, %v1617_v29  ;;  %2545 = vpow2.f32 %v2246_v13  ;;  %v1628_v29 = vand.u32 2147483648, %v3376_v62 }
 0x291   : > { %v2528_v33 = vpop.eup %2527  ;;  %v3401_v41 = vpop.xlane.xlu1 %1337  ;;  %v1998_v43 = vmul.f32 %v1934_v34, %v3075_v37  ;;  %v1622_v45 = vsel %vm1620_vm3, %v1621_v39, %v1619_v56  ;;  %v1466_v2 = vsel %vm1465_vm4, %v3341_v3, %v1464_v21  ;;  %2547 = vrcp.f32 %v1886_v27 }
 0x292   : > { %v2530_v42 = vpop.eup %2529  ;;  %v1710_v58 = vmax.f32 %v1622_v45, 1e-12  ;;  %v1469_v23 = vsel %vm1467_vm5, %v1468_v30, %v1466_v2  ;;  %2549 = vrsqrt.f32 %v3383_v11  ;;  %v1938_v13 = vsel %vm1286_vm1, %v2528_v33, 1.0 }
 0x293   : > { %v2532_v54 = vpop.eup %2531  ;;  %v1471_v55 = vmul.f32 %v2530_v42, %v3353_v26  ;;  %v1807_v61 = vpop.xlane.xlu0 %1806  ;;  %v2030_v50 = vsel %vm1290_vm0, %v2516_v0, %v1998_v43  ;;  %v1551_v52 = vmax.f32 %v1469_v23, 1e-12  ;;  %vm1479_vm12 = vcmp.eq.f32.partialorder %v3390_v51, inf }
 0x294   : > { %v2534_v37 = vpop.eup %2533  ;;  %v1936_v4 = vsel %vm1286_vm1, %v2532_v54, 1.0  ;;  %2062 = vst [vmem:[%s3361_s8 + $0x8] sm:$0xff] %v2030_v50  ;;  %2551 = vrcp.f32 %v1710_v58  ;;  %vm1481_vm13 = vcmp.eq.f32.partialorder %v3390_v51, 0.0  ;;  %vm1486_vm14 = vcmp.eq.f32.partialorder %v3401_v41, inf }
 0x295   : > { %v2536_v39 = vpop.eup %2535  ;;  %v2000_v3 = vmul.f32 %v1936_v4, %v3082_v40  ;;  %v1473_v14 = vsel %vm1472_vm6, %v3353_v26, %v1471_v55  ;;  %v1810_v0 = vpop.xlane.xlu1 %1809  ;;  %2553 = vrcp.f32 %v1551_v52  ;;  %v1482_v4 = vand.u32 2147483648, %v3390_v51 }
 0x296   : > { %v2538_v24 = vpop.eup %2537  ;;  %v2003_v15 = vmul.f32 %v2536_v39, %v3104_v59  ;;  %v1476_v27 = vsel %vm1474_vm7, %v1475_v32, %v1473_v14  ;;  %2555 = vrsqrt.f32 %v3390_v51  ;;  %v2002_v59 = vmul.f32 %v1938_v13, %v3098_v57 }
 0x297   : > { %v2540_v30 = vpop.eup %2539  ;;  %v2032_v40 = vsel %vm1290_vm0, %v2534_v37, %v2000_v3  ;;  %v1552_v31 = vmax.f32 %v1476_v27, 1e-12  ;;  %v1624_v21 = vmul.f32 %v2538_v24, %v3376_v62  ;;  %v3433_v33 = vpop.xlane.xlu0 %1406  ;;  %2557 = vrsqrt.f32 %v3401_v41 }
 0x298   : > { %v2542_v34 = vpop.eup %2541  ;;  %2064 = vst [vmem:[%s3361_s8 + $0x18] sm:$0xff] %v2032_v40  ;;  %2067 = vst [vmem:[%s3361_s8 + $0x30] sm:$0xff] %v2003_v15  ;;  %v2001_v26 = vmul.f32 %v2540_v30, %v3095_v53  ;;  %v2247_v32 = vmul.f32 -1.442695, %v1807_v61  ;;  %v2248_v43 = vmul.f32 -1.442695, %v1810_v0 }
 0x299   : > { %2559 = vrcp.f32 %v1552_v31  ;;  %v1887_v56 = vadd.f32 1.0, %v2542_v34  ;;  %v1626_v42 = vsel %vm1625_vm8, %v3376_v62, %v1624_v21  ;;  %v3443_v45 = vpop.xlane.xlu1 %1409  ;;  %v2544_v2 = vpop.eup %2543  ;;  %v1635_v62 = vand.u32 2147483648, %v3383_v11 }
 0x29a   : > { %2065 = vst [vmem:[%s3361_s8 + $0x20] sm:$0xff] %v2001_v26  ;;  %v1629_v57 = vsel %vm1627_vm9, %v1628_v29, %v1626_v42  ;;  %2561 = vpow2.f32 %v2247_v32  ;;  %v2546_v53 = vpop.eup %2545  ;;  %v2034_v54 = vsel %vm1290_vm0, %v2544_v2, %v2002_v59  ;;  %vm1488_vm15 = vcmp.eq.f32.partialorder %v3401_v41, 0.0 }
 0x29b   : > { %2563 = vrcp.f32 %v1887_v56  ;;  %v1711_v58 = vmax.f32 %v1629_v57, 1e-12  ;;  %v3450_v23 = vpop.xlane.xlu0 %1339  ;;  %2066 = vst [vmem:[%s3361_s8 + $0x28] sm:$0xff] %v2034_v54  ;;  %v1888_v55 = vadd.f32 1.0, %v2546_v53  ;;  %v2548_v61 = vpop.eup %2547  ;;  %v1489_v13 = vand.u32 2147483648, %v3401_v41 }
 0x29c   : > { %2565 = vpow2.f32 %v2248_v43  ;;  %v2550_v50 = vpop.eup %2549  ;;  %v1642_v24 = vand.u32 2147483648, %v3433_v33  ;;  %vm1639_vm2 = vcmp.eq.f32.partialorder %v3433_v33, inf  ;;  %vm1641_vm3 = vcmp.eq.f32.partialorder %v3433_v33, 0.0 }
 0x29d   : > { %2567 = vrcp.f32 %v1711_v58  ;;  %v3457_v37 = vpop.xlane.xlu1 %1341  ;;  %v1631_v39 = vmul.f32 %v2550_v50, %v3383_v11  ;;  %vm1646_vm4 = vcmp.eq.f32.partialorder %v3443_v45, inf  ;;  %vm1648_vm5 = vcmp.eq.f32.partialorder %v3443_v45, 0.0 }
 0x29e   : > { %2569 = vrcp.f32 %v1888_v55  ;;  %v2552_v52 = vpop.eup %2551  ;;  %vm1493_vm6 = vcmp.eq.f32.partialorder %v3450_v23, inf  ;;  %vm1495_vm7 = vcmp.eq.f32.partialorder %v3450_v23, 0.0  ;;  %vm1500_vm8 = vcmp.eq.f32.partialorder %v3457_v37, inf }
 0x29f   : > { %2571 = vrsqrt.f32 %v3433_v33  ;;  %v1813_v3 = vpop.xlane.xlu0 %1812  ;;  %v2554_v14 = vpop.eup %2553  ;;  %v1940_v0 = vsel %vm1286_vm1, %v2552_v52, 1.0  ;;  %v1633_v40 = vsel %vm1632_vm10, %v3383_v11, %v1631_v39  ;;  %v1649_v52 = vand.u32 2147483648, %v3443_v45 }
 0x2a0   : > { %2573 = vrsqrt.f32 %v3443_v45  ;;  %v2249_v15 = vmul.f32 -1.442695, %v1813_v3  ;;  %v2556_v27 = vpop.eup %2555  ;;  %v2004_v29 = vmul.f32 %v1940_v0, %v3106_v60  ;;  %v2005_v30 = vmul.f32 %v2554_v14, %v3121_v12 }
 0x2a1   : > { %2575 = vrsqrt.f32 %v3450_v23  ;;  %v1816_v31 = vpop.xlane.xlu1 %1815  ;;  %v2558_v21 = vpop.eup %2557  ;;  %v1636_v34 = vsel %vm1634_vm11, %v1635_v62, %v1633_v40  ;;  %v1478_v59 = vmul.f32 %v2556_v27, %v3390_v51  ;;  %v1496_v0 = vand.u32 2147483648, %v3450_v23 }
 0x2a2   : > { %2577 = vrsqrt.f32 %v3457_v37  ;;  %v2250_v26 = vmul.f32 -1.442695, %v1816_v31  ;;  %v2036_v12 = vsel %vm1290_vm0, %v2548_v61, %v2004_v29  ;;  %2069 = vst [vmem:[%s3361_s8 + $0x40] sm:$0xff] %v2005_v30  ;;  %v1712_v32 = vmax.f32 %v1636_v34, 1e-12 }
 0x2a3   : > { %v2560_v60 = vpop.eup %2559  ;;  %v1485_v56 = vmul.f32 %v2558_v21, %v3401_v41  ;;  %2579 = vpow2.f32 %v2249_v15  ;;  %v3485_v42 = vpop.xlane.xlu0 %1412  ;;  %2068 = vst [vmem:[%s3361_s8 + $0x38] sm:$0xff] %v2036_v12  ;;  %v1480_v2 = vsel %vm1479_vm12, %v3390_v51, %v1478_v59  ;;  %vm1502_vm9 = vcmp.eq.f32.partialorder %v3457_v37, 0.0 }
 0x2a4   : > { %v2562_v11 = vpop.eup %2561  ;;  %v2007_v43 = vmul.f32 %v2560_v60, %v3128_v22  ;;  %2581 = vpow2.f32 %v2250_v26  ;;  %v1483_v53 = vsel %vm1481_vm13, %v1482_v4, %v1480_v2  ;;  %v1503_v30 = vand.u32 2147483648, %v3457_v37 }
 0x2a5   : > { %v2564_v57 = vpop.eup %2563  ;;  %2583 = vrcp.f32 %v1712_v32  ;;  %v1487_v54 = vsel %vm1486_vm14, %v3401_v41, %v1485_v56  ;;  %v1889_v58 = vadd.f32 1.0, %v2562_v11  ;;  %v3499_v22 = vpop.xlane.xlu1 %1415  ;;  %v1553_v61 = vmax.f32 %v1483_v53, 1e-12 }
 0x2a6   : > { %v2566_v55 = vpop.eup %2565  ;;  %2071 = vst [vmem:[%s3361_s8 + $0x50] sm:$0xff] %v2007_v43  ;;  %v1490_v62 = vsel %vm1488_vm15, %v1489_v13, %v1487_v54  ;;  %2585 = vrsqrt.f32 %v3485_v42  ;;  %vm1653_vm10 = vcmp.eq.f32.partialorder %v3485_v42, inf  ;;  %vm1655_vm11 = vcmp.eq.f32.partialorder %v3485_v42, 0.0 }
 0x2a7   : > { %v2568_v50 = vpop.eup %2567  ;;  %v1554_v51 = vmax.f32 %v1490_v62, 1e-12  ;;  %2587 = vrcp.f32 %v1889_v58  ;;  %v1890_v4 = vadd.f32 1.0, %v2566_v55  ;;  %v3507_v39 = vpop.xlane.xlu0 %1343  ;;  %vm1660_vm12 = vcmp.eq.f32.partialorder %v3499_v22, inf }
 0x2a8   : > { %v3509_v3 = vpop.eup %2569  ;;  %v1942_v14 = vsel %vm1286_vm1, %v2568_v50, 1.0  ;;  %2589 = vrcp.f32 %v1553_v61  ;;  %vm1662_vm13 = vcmp.eq.f32.partialorder %v3499_v22, 0.0  ;;  %vm1507_vm14 = vcmp.eq.f32.partialorder %v3507_v39, inf }
 0x2a9   : > { %v2572_v41 = vpop.eup %2571  ;;  %v2006_v13 = vmul.f32 %v1942_v14, %v3126_v16  ;;  %2591 = vrcp.f32 %v1554_v51  ;;  %v3518_v15 = vpop.xlane.xlu1 %1345  ;;  %vm1509_vm15 = vcmp.eq.f32.partialorder %v3507_v39, 0.0 }
 0x2aa   : > { %v2574_v27 = vpop.eup %2573  ;;  %2593 = vrcp.f32 %v1890_v4  ;;  %v1638_v29 = vmul.f32 %v2572_v41, %v3433_v33 }
 0x2ab   : > { %v2576_v40 = vpop.eup %2575  ;;  %v2038_v16 = vsel %vm1290_vm0, %v2564_v57, %v2006_v13  ;;  %v1645_v31 = vmul.f32 %v2574_v27, %v3443_v45  ;;  %2595 = vrsqrt.f32 %v3499_v22  ;;  %v1819_v21 = vpop.xlane.xlu0 %1818  ;;  %v1656_v27 = vand.u32 2147483648, %v3485_v42 }
 0x2ac   : > { %v2578_v34 = vpop.eup %2577  ;;  %2070 = vst [vmem:[%s3361_s8 + $0x48] sm:$0xff] %v2038_v16  ;;  %v1640_v59 = vsel %vm1639_vm2, %v3433_v33, %v1638_v29  ;;  %v1492_v26 = vmul.f32 %v2576_v40, %v3450_v23  ;;  %2597 = vrsqrt.f32 %v3507_v39  ;;  %vm1514_vm2 = vcmp.eq.f32.partialorder %v3518_v15, inf }
 0x2ad   : > { %v2580_v60 = vpop.eup %2579  ;;  %v1643_v12 = vsel %vm1641_vm3, %v1642_v24, %v1640_v59  ;;  %v1647_v32 = vsel %vm1646_vm4, %v3443_v45, %v1645_v31  ;;  %v1499_v56 = vmul.f32 %v2578_v34, %v3457_v37  ;;  %2599 = vrsqrt.f32 %v3518_v15  ;;  %v1822_v11 = vpop.xlane.xlu1 %1821 }
 0x2ae   : > { %v2582_v43 = vpop.eup %2581  ;;  %v1713_v2 = vmax.f32 %v1643_v12, 1e-12  ;;  %v1650_v57 = vsel %vm1648_vm5, %v1649_v52, %v1647_v32  ;;  %v1494_v53 = vsel %vm1493_vm6, %v3450_v23, %v1492_v26  ;;  %v1891_v33 = vadd.f32 1.0, %v2580_v60 }
 0x2af   : > { %v2584_v24 = vpop.eup %2583  ;;  %v1714_v54 = vmax.f32 %v1650_v57, 1e-12  ;;  %v1497_v58 = vsel %vm1495_vm7, %v1496_v0, %v1494_v53  ;;  %v1501_v55 = vsel %vm1500_vm8, %v3457_v37, %v1499_v56  ;;  %v1892_v61 = vadd.f32 1.0, %v2582_v43  ;;  %v3554_v62 = vpop.xlane.xlu0 %1418 }
 0x2b0   : > { %v2586_v50 = vpop.eup %2585  ;;  %v1944_v45 = vsel %vm1286_vm1, %v2584_v24, 1.0  ;;  %2601 = vrcp.f32 %v1713_v2  ;;  %v1555_v51 = vmax.f32 %v1497_v58, 1e-12  ;;  %v1504_v4 = vsel %vm1502_vm9, %v1503_v30, %v1501_v55 }
 0x2b1   : > { %v3560_v52 = vpop.eup %2587  ;;  %v2008_v23 = vmul.f32 %v1944_v45, %v3132_v28  ;;  %2603 = vrcp.f32 %v1714_v54  ;;  %v1556_v14 = vmax.f32 %v1504_v4, 1e-12  ;;  %v1652_v41 = vmul.f32 %v2586_v50, %v3485_v42  ;;  %v3564_v13 = vpop.xlane.xlu1 %1421 }
 0x2b2   : > { %v2590_v0 = vpop.eup %2589  ;;  %2605 = vrcp.f32 %v1555_v51  ;;  %v2251_v37 = vmul.f32 -1.442695, %v1819_v21  ;;  %v2252_v59 = vmul.f32 -1.442695, %v1822_v11  ;;  %v1663_v26 = vand.u32 2147483648, %v3499_v22 }
 0x2b3   : > { %v2592_v29 = vpop.eup %2591  ;;  %v2040_v28 = vsel %vm1290_vm0, %v3509_v3, %v2008_v23  ;;  %v2009_v30 = vmul.f32 %v2590_v0, %v3144_v18  ;;  %2607 = vrcp.f32 %v1556_v14  ;;  %v1654_v40 = vsel %vm1653_vm10, %v3485_v42, %v1652_v41  ;;  %v3575_v16 = vpop.xlane.xlu0 %1347 }
 0x2b4   : > { %v2594_v31 = vpop.eup %2593  ;;  %2072 = vst [vmem:[%s3361_s8 + $0x58] sm:$0xff] %v2040_v28  ;;  %v2011_v34 = vmul.f32 %v2592_v29, %v3152_v44  ;;  %2609 = vrcp.f32 %v1891_v33  ;;  %v1657_v21 = vsel %vm1655_vm11, %v1656_v27, %v1654_v40  ;;  %v1510_v56 = vand.u32 2147483648, %v3507_v39 }
 0x2b5   : > { %v2596_v3 = vpop.eup %2595  ;;  %2073 = vst [vmem:[%s3361_s8 + $0x60] sm:$0xff] %v2009_v30  ;;  %2611 = vrcp.f32 %v1892_v61  ;;  %v1715_v18 = vmax.f32 %v1657_v21, 1e-12  ;;  %v3584_v60 = vpop.xlane.xlu1 %1349  ;;  %vm1516_vm3 = vcmp.eq.f32.partialorder %v3518_v15, 0.0  ;;  %v1517_v33 = vand.u32 2147483648, %v3518_v15 }
 0x2b6   : > { %v2598_v12 = vpop.eup %2597  ;;  %2075 = vst [vmem:[%s3361_s8 + $0x70] sm:$0xff] %v2011_v34  ;;  %v1659_v32 = vmul.f32 %v2596_v3, %v3499_v22  ;;  %2613 = vpow2.f32 %v2251_v37  ;;  %vm1667_vm4 = vcmp.eq.f32.partialorder %v3554_v62, inf  ;;  %vm1669_vm5 = vcmp.eq.f32.partialorder %v3554_v62, 0.0 }
 0x2b7   : > { %v2600_v44 = vpop.eup %2599  ;;  %2615 = vrcp.f32 %v1715_v18  ;;  %v1506_v42 = vmul.f32 %v2598_v12, %v3507_v39  ;;  %v3593_v11 = vpop.xlane.xlu0 %1424  ;;  %vm1674_vm6 = vcmp.eq.f32.partialorder %v3564_v13, inf  ;;  %vm1676_vm7 = vcmp.eq.f32.partialorder %v3564_v13, 0.0 }
 0x2b8   : > { %v1661_v43 = vsel %vm1660_vm12, %v3499_v22, %v1659_v32  ;;  %v1513_v2 = vmul.f32 %v2600_v44, %v3518_v15  ;;  %2617 = vpow2.f32 %v2252_v59  ;;  %v1677_v34 = vand.u32 2147483648, %v3564_v13 }
 0x2b9   : > { %v1664_v57 = vsel %vm1662_vm13, %v1663_v26, %v1661_v43  ;;  %v1508_v53 = vsel %vm1507_vm14, %v3507_v39, %v1506_v42  ;;  %2619 = vrsqrt.f32 %v3554_v62  ;;  %v3609_v61 = vpop.xlane.xlu1 %1427  ;;  %vm1521_vm8 = vcmp.eq.f32.partialorder %v3575_v16, inf }
 0x2ba   : > { %v2602_v24 = vpop.eup %2601  ;;  %v1716_v54 = vmax.f32 %v1664_v57, 1e-12  ;;  %v1511_v58 = vsel %vm1509_vm15, %v1510_v56, %v1508_v53  ;;  %v1515_v55 = vsel %vm1514_vm2, %v3518_v15, %v1513_v2  ;;  %2621 = vrsqrt.f32 %v3564_v13 }
 0x2bb   : > { %v2604_v50 = vpop.eup %2603  ;;  %v1946_v22 = vsel %vm1286_vm1, %v2602_v24, 1.0  ;;  %v1557_v45 = vmax.f32 %v1511_v58, 1e-12  ;;  %v1518_v51 = vsel %vm1516_vm3, %v1517_v33, %v1515_v55  ;;  %2623 = vrsqrt.f32 %v3575_v16  ;;  %v3619_v27 = vpop.xlane.xlu0 %1351 }
 0x2bc   : > { %v2606_v4 = vpop.eup %2605  ;;  %v2010_v23 = vmul.f32 %v1946_v22, %v3147_v17  ;;  %v1948_v39 = vsel %vm1286_vm1, %v2604_v50, 1.0  ;;  %2625 = vrcp.f32 %v1716_v54  ;;  %v1558_v15 = vmax.f32 %v1518_v51, 1e-12 }
 0x2bd   : > { %v2608_v14 = vpop.eup %2607  ;;  %v2012_v41 = vmul.f32 %v1948_v39, %v3156_v46  ;;  %v2013_v0 = vmul.f32 %v2606_v4, %v3168_v1  ;;  %2627 = vrcp.f32 %v1557_v45  ;;  %v3636_v1 = vpop.xlane.xlu1 %1353  ;;  %vm1523_vm9 = vcmp.eq.f32.partialorder %v3575_v16, 0.0 }
 0x2be   : > { %v2610_v37 = vpop.eup %2609  ;;  %v2042_v17 = vsel %vm1290_vm0, %v3560_v52, %v2010_v23  ;;  %v2015_v29 = vmul.f32 %v2608_v14, %v3178_v7  ;;  %2629 = vrcp.f32 %v1558_v15  ;;  %v1670_v52 = vand.u32 2147483648, %v3554_v62 }
 0x2bf   : > { %v3625_v28 = vpop.eup %2611  ;;  %2074 = vst [vmem:[%s3361_s8 + $0x68] sm:$0xff] %v2042_v17  ;;  %v2044_v30 = vsel %vm1290_vm0, %v2594_v31, %v2012_v41  ;;  %2077 = vst [vmem:[%s3361_s8 + $0x80] sm:$0xff] %v2013_v0  ;;  %2631 = vrsqrt.f32 %v3584_v60  ;;  %v3650_v18 = vpop.xlane.xlu0 %1430  ;;  %v1524_v32 = vand.u32 2147483648, %v3575_v16  ;;  %vm1528_vm10 = vcmp.eq.f32.partialorder %v3584_v60, inf }
 0x2c0   : > { %v2614_v46 = vpop.eup %2613  ;;  %2076 = vst [vmem:[%s3361_s8 + $0x78] sm:$0xff] %v2044_v30  ;;  %2079 = vst [vmem:[%s3361_s8 + $0x90] sm:$0xff] %v2015_v29  ;;  %2633 = vrsqrt.f32 %v3593_v11  ;;  %vm1530_vm11 = vcmp.eq.f32.partialorder %v3584_v60, 0.0  ;;  %v1531_v56 = vand.u32 2147483648, %v3584_v60  ;;  %v1684_v53 = vand.u32 2147483648, %v3593_v11 }
 0x2c1   : > { %v2616_v7 = vpop.eup %2615  ;;  %2635 = vrsqrt.f32 %v3609_v61  ;;  %v1893_v3 = vadd.f32 1.0, %v2614_v46  ;;  %v3668_v33 = vpop.xlane.xlu1 %1433  ;;  %vm1681_vm12 = vcmp.eq.f32.partialorder %v3593_v11, inf  ;;  %vm1688_vm13 = vcmp.eq.f32.partialorder %v3609_v61, inf }
 0x2c2   : > { %v2618_v40 = vpop.eup %2617  ;;  %v1950_v31 = vsel %vm1286_vm1, %v2616_v7, 1.0  ;;  %2637 = vrsqrt.f32 %v3619_v27  ;;  %vm1683_vm14 = vcmp.eq.f32.partialorder %v3593_v11, 0.0  ;;  %vm1535_vm15 = vcmp.eq.f32.partialorder %v3619_v27, inf }
 0x2c3   : > { %v2620_v21 = vpop.eup %2619  ;;  %v2014_v59 = vmul.f32 %v1950_v31, %v3174_v6  ;;  %2639 = vrsqrt.f32 %v3636_v1  ;;  %v1894_v39 = vadd.f32 1.0, %v2618_v40  ;;  %v1825_v17 = vpop.xlane.xlu0 %1824  ;;  %vm1690_vm2 = vcmp.eq.f32.partialorder %v3609_v61, 0.0 }
 0x2c4   : > { %v2622_v26 = vpop.eup %2621  ;;  %v1666_v12 = vmul.f32 %v2620_v21, %v3554_v62  ;;  %2641 = vrsqrt.f32 %v3650_v18  ;;  %vm1537_vm3 = vcmp.eq.f32.partialorder %v3619_v27, 0.0 }
 0x2c5   : > { %v2624_v44 = vpop.eup %2623  ;;  %v2046_v6 = vsel %vm1290_vm0, %v2610_v37, %v2014_v59  ;;  %v1673_v42 = vmul.f32 %v2622_v26, %v3564_v13  ;;  %2643 = vrcp.f32 %v1893_v3  ;;  %v1691_v37 = vand.u32 2147483648, %v3609_v61  ;;  %v1828_v30 = vpop.xlane.xlu1 %1827 }
 0x2c6   : > { %v2626_v43 = vpop.eup %2625  ;;  %2078 = vst [vmem:[%s3361_s8 + $0x88] sm:$0xff] %v2046_v6  ;;  %v1668_v2 = vsel %vm1667_vm4, %v3554_v62, %v1666_v12  ;;  %v1520_v57 = vmul.f32 %v2624_v44, %v3575_v16  ;;  %vm1542_vm4 = vcmp.eq.f32.partialorder %v3636_v1, inf }
 0x2c7   : > { %v2628_v24 = vpop.eup %2627  ;;  %v1952_v54 = vsel %vm1286_vm1, %v2626_v43, 1.0  ;;  %v1671_v58 = vsel %vm1669_vm5, %v1670_v52, %v1668_v2  ;;  %v1675_v55 = vsel %vm1674_vm6, %v3564_v13, %v1673_v42  ;;  %v1538_v52 = vand.u32 2147483648, %v3619_v27  ;;  %v1831_v43 = vpop.xlane.xlu0 %1830 }
 0x2c8   : > { %v2630_v50 = vpop.eup %2629  ;;  %v2016_v22 = vmul.f32 %v1952_v54, %v3182_v9  ;;  %v2017_v45 = vmul.f32 %v2628_v24, %v3191_v25  ;;  %v1717_v51 = vmax.f32 %v1671_v58, 1e-12  ;;  %v1678_v4 = vsel %vm1676_vm7, %v1677_v34, %v1675_v55 }
 0x2c9   : > { %v2632_v62 = vpop.eup %2631  ;;  %v2019_v23 = vmul.f32 %v2630_v50, %v3198_v19  ;;  %v1718_v15 = vmax.f32 %v1678_v4, 1e-12  ;;  %v1522_v14 = vsel %vm1521_vm8, %v3575_v16, %v1520_v57  ;;  %vm1544_vm5 = vcmp.eq.f32.partialorder %v3636_v1, 0.0 }
 0x2ca   : > { %v2634_v9 = vpop.eup %2633  ;;  %v2048_v25 = vsel %vm1290_vm0, %v3625_v28, %v2016_v22  ;;  %2081 = vst [vmem:[%s3361_s8 + $0xa0] sm:$0xff] %v2017_v45  ;;  %2645 = vrcp.f32 %v1717_v51  ;;  %v1525_v13 = vsel %vm1523_vm9, %v1524_v32, %v1522_v14  ;;  %v1527_v19 = vmul.f32 %v2632_v62, %v3584_v60 }
 0x2cb   : > { %v2636_v41 = vpop.eup %2635  ;;  %2080 = vst [vmem:[%s3361_s8 + $0x98] sm:$0xff] %v2048_v25  ;;  %2083 = vst [vmem:[%s3361_s8 + $0xb0] sm:$0xff] %v2019_v23  ;;  %2647 = vrcp.f32 %v1718_v15  ;;  %v1559_v0 = vmax.f32 %v1525_v13, 1e-12  ;;  %v1680_v28 = vmul.f32 %v2634_v9, %v3593_v11  ;;  %v2253_v32 = vmul.f32 -1.442695, %v1825_v17 }
 0x2cc   : > { %v2638_v29 = vpop.eup %2637  ;;  %v1529_v16 = vsel %vm1528_vm10, %v3584_v60, %v1527_v19  ;;  %2649 = vrsqrt.f32 %v3668_v33  ;;  %v1687_v34 = vmul.f32 %v2636_v41, %v3609_v61  ;;  %v1545_v60 = vand.u32 2147483648, %v3636_v1 }
 0x2cd   : > { %2651 = vrcp.f32 %v1559_v0  ;;  %v1532_v46 = vsel %vm1530_vm11, %v1531_v56, %v1529_v16  ;;  %v1534_v7 = vmul.f32 %v2638_v29, %v3619_v27  ;;  %v2640_v40 = vpop.eup %2639  ;;  %v1682_v26 = vsel %vm1681_vm12, %v3593_v11, %v1680_v28 }
 0x2ce   : > { %2653 = vrcp.f32 %v1894_v39  ;;  %v1560_v31 = vmax.f32 %v1532_v46, 1e-12  ;;  %v1541_v59 = vmul.f32 %v2640_v40, %v3636_v1  ;;  %v2642_v3 = vpop.eup %2641  ;;  %vm1695_vm6 = vcmp.eq.f32.partialorder %v3650_v18, inf }
 0x2cf   : > { %v1536_v21 = vsel %vm1535_vm15, %v3619_v27, %v1534_v7  ;;  %v2644_v44 = vpop.eup %2643  ;;  %v1694_v56 = vmul.f32 %v2642_v3, %v3650_v18  ;;  %v1689_v2 = vsel %vm1688_vm13, %v3609_v61, %v1687_v34  ;;  %vm1697_vm7 = vcmp.eq.f32.partialorder %v3650_v18, 0.0  ;;  %v1834_v27 = vpop.xlane.xlu1 %1833 }
 0x2d0   : > { %2655 = vrcp.f32 %v1560_v31  ;;  %v1539_v12 = vsel %vm1537_vm3, %v1538_v52, %v1536_v21  ;;  %v1543_v42 = vsel %vm1542_vm4, %v3636_v1, %v1541_v59  ;;  %v2254_v24 = vmul.f32 -1.442695, %v1828_v30 }
 0x2d1   : > { %v1561_v6 = vmax.f32 %v1539_v12, 1e-12  ;;  %v1546_v57 = vsel %vm1544_vm5, %v1545_v60, %v1543_v42  ;;  %v1685_v54 = vsel %vm1683_vm14, %v1684_v53, %v1682_v26  ;;  %v1698_v58 = vand.u32 2147483648, %v3650_v18 }
 0x2d2   : > { %v1562_v1 = vmax.f32 %v1546_v57, 1e-12  ;;  %v1696_v50 = vsel %vm1695_vm6, %v3650_v18, %v1694_v56  ;;  %vm1702_vm8 = vcmp.eq.f32.partialorder %v3668_v33, inf  ;;  %v2255_v22 = vmul.f32 -1.442695, %v1831_v43 }
 0x2d3   : > { %2657 = vrcp.f32 %v1561_v6  ;;  %v1692_v4 = vsel %vm1690_vm2, %v1691_v37, %v1689_v2  ;;  %v2256_v11 = vmul.f32 -1.442695, %v1834_v27  ;;  %v1719_v39 = vmax.f32 %v1685_v54, 1e-12 }
 0x2d4   : > { %v2646_v55 = vpop.eup %2645  ;;  %2659 = vpow2.f32 %v2253_v32  ;;  %v1699_v61 = vsel %vm1697_vm7, %v1698_v58, %v1696_v50  ;;  %v1705_v25 = vand.u32 2147483648, %v3668_v33  ;;  %v1720_v41 = vmax.f32 %v1692_v4, 1e-12 }
 0x2d5   : > { %v2648_v45 = vpop.eup %2647  ;;  %v1954_v51 = vsel %vm1286_vm1, %v2646_v55, 1.0  ;;  %2661 = vrcp.f32 %v1562_v1  ;;  %vm1704_vm9 = vcmp.eq.f32.partialorder %v3668_v33, 0.0 }
 0x2d6   : > { %v2650_v53 = vpop.eup %2649  ;;  %v2018_v62 = vmul.f32 %v1954_v51, %v3196_v20  ;;  %v1956_v23 = vsel %vm1286_vm1, %v2648_v45, 1.0  ;;  %2663 = vpow2.f32 %v2254_v24 }
 0x2d7   : > { %v2652_v15 = vpop.eup %2651  ;;  %v2020_v14 = vmul.f32 %v1956_v23, %v3200_v38  ;;  %v1701_v9 = vmul.f32 %v2650_v53, %v3668_v33  ;;  %2665 = vpow2.f32 %v2255_v22 }
 0x2d8   : > { %v2654_v13 = vpop.eup %2653  ;;  %v2050_v20 = vsel %vm1290_vm0, %v2644_v44, %v2018_v62  ;;  %v2021_v19 = vmul.f32 %v2652_v15, %v3217_v63  ;;  %2667 = vpow2.f32 %v2256_v11  ;;  %v1721_v63 = vmax.f32 %v1699_v61, 1e-12 }
 0x2d9   : > { %2082 = vst [vmem:[%s3361_s8 + $0xa8] sm:$0xff] %v2050_v20  ;;  %v2052_v38 = vsel %vm1290_vm0, %v2654_v13, %v2020_v14  ;;  %v1703_v18 = vsel %vm1702_vm8, %v3668_v33, %v1701_v9  ;;  %2669 = vrcp.f32 %v1719_v39 }
 0x2da   : > { %v2656_v0 = vpop.eup %2655  ;;  %2084 = vst [vmem:[%s3361_s8 + $0xb8] sm:$0xff] %v2052_v38  ;;  %2085 = vst [vmem:[%s3361_s8 + $0xc0] sm:$0xff] %v2021_v19  ;;  %v1706_v37 = vsel %vm1704_vm9, %v1705_v25, %v1703_v18  ;;  %2671 = vrcp.f32 %v1720_v41 }
 0x2db   : > { %v2023_v17 = vmul.f32 %v2656_v0, %v3226_v8  ;;  %v1722_v29 = vmax.f32 %v1706_v37, 1e-12  ;;  %2673 = vrcp.f32 %v1721_v63 }
 0x2dd   : > { %v2658_v16 = vpop.eup %2657  ;;  %2087 = vst [vmem:[%s3361_s8 + $0xd0] sm:$0xff] %v2023_v17  ;;  %2675 = vrcp.f32 %v1722_v29 }
 0x2de   : > { %v2660_v28 = vpop.eup %2659  ;;  %v2025_v30 = vmul.f32 %v2658_v16, %v3240_v35 }
 0x2df   : > { %v2662_v33 = vpop.eup %2661  ;;  %v1895_v46 = vadd.f32 1.0, %v2660_v28 }
 0x2e0   : > { %v2664_v7 = vpop.eup %2663  ;;  %2089 = vst [vmem:[%s3361_s8 + $0xe0] sm:$0xff] %v2025_v30  ;;  %v2027_v52 = vmul.f32 %v2662_v33, %v3250_v48 }
 0x2e1   : > { %2677 = vrcp.f32 %v1895_v46  ;;  %v1896_v40 = vadd.f32 1.0, %v2664_v7  ;;  %v2666_v31 = vpop.eup %2665 }
 0x2e2   : > { %2091 = vst [vmem:[%s3361_s8 + $0xf0] sm:$0xff] %v2027_v52  ;;  %v2668_v8 = vpop.eup %2667  ;;  %v1897_v34 = vadd.f32 1.0, %v2666_v31 }
 0x2e3   : > { %2679 = vrcp.f32 %v1896_v40  ;;  %v2670_v21 = vpop.eup %2669  ;;  %v1898_v59 = vadd.f32 1.0, %v2668_v8 }
 0x2e4   : > { %2681 = vrcp.f32 %v1897_v34  ;;  %v2672_v35 = vpop.eup %2671  ;;  %v1958_v60 = vsel %vm1286_vm1, %v2670_v21, 1.0 }
 0x2e5   : > { %2683 = vrcp.f32 %v1898_v59  ;;  %v2674_v3 = vpop.eup %2673  ;;  %v1960_v48 = vsel %vm1286_vm1, %v2672_v35, 1.0  ;;  %v2022_v12 = vmul.f32 %v1958_v60, %v3222_v5 }
 0x2e6   : > { %v1962_v44 = vsel %vm1286_vm1, %v2674_v3, 1.0  ;;  %v2024_v6 = vmul.f32 %v1960_v48, %v3228_v10 }
 0x2e7   : > { %v2676_v26 = vpop.eup %2675  ;;  %v2026_v2 = vmul.f32 %v1962_v44, %v3248_v47 }
 0x2e8   : > { %v1964_v42 = vsel %vm1286_vm1, %v2676_v26, 1.0 }
 0x2e9   : > { %v2028_v24 = vmul.f32 %v1964_v42, %v3254_v49 }
 0x2eb   : > { %v2678_v32 = vpop.eup %2677 }
 0x2ec   : > { %v2054_v56 = vsel %vm1290_vm0, %v2678_v32, %v2022_v12 }
 0x2ed   : > { %v2680_v43 = vpop.eup %2679  ;;  %2086 = vst [vmem:[%s3361_s8 + $0xc8] sm:$0xff] %v2054_v56 }
 0x2ee   : > { %v2056_v5 = vsel %vm1290_vm0, %v2680_v43, %v2024_v6  ;;  %v2682_v57 = vpop.eup %2681 }
 0x2ef   : > { %2088 = vst [vmem:[%s3361_s8 + $0xd8] sm:$0xff] %v2056_v5  ;;  %v2684_v27 = vpop.eup %2683  ;;  %v2058_v10 = vsel %vm1290_vm0, %v2682_v57, %v2026_v2 }
 0x2f0   : > { %2090 = vst [vmem:[%s3361_s8 + $0xe8] sm:$0xff] %v2058_v10  ;;  %v2060_v54 = vsel %vm1290_vm0, %v2684_v27, %v2028_v24 }
 0x2f1   : > { %2092 = vst [vmem:[%s3361_s8 + $0xf8] sm:$0xff] %v2060_v54 }
 0x2f2 PF: > { %s15_s18 = sadd.s32 1, %s2691_s18  }
 0x2f3   : > { %p12_p4 = scmp.ge.s32.totalorder %s15_s18, 6  }
 0x2f5   :  { %14 = sbr.rel (!%p12_p4) target bundleno = 1 (0x1), region = 70 }

// kernel: sub.13
= control target key start
LH: loop header
LB: loop body
LE: loop exit
PB: predicated region body
PF: predicated region fallthrough
CT: control target
= control target key end

     0   :  { %s34_s0 = inlined_call_operand.vmem [shape: f32[2,3], index: 0, kind: input, shape index: {}]   ;;  %s35_s1 = inlined_call_operand.vmem [shape: f32[2,3], index: 1, kind: input, shape index: {}]   ;;  %s36_s2 = inlined_call_operand.vmem [shape: f32[2,3], index: 2, kind: output, shape index: {}]  }
   0x1   :  { %v3_v0 = vld [vmem:[%s34_s0] sm:$0x3] }
   0x2   :  { %v4_v1 = vld [vmem:[%s35_s1] sm:$0x3] }
   0x3   :  { %v7_v2 = vsub.f32 %v3_v0, %v4_v1 }
   0x5   :  { %9 = vst [vmem:[%s36_s2] sm:$0x3] %v7_v2 }

// kernel: cosypose_detection_head.1
= control target key start
LH: loop header
LB: loop body
LE: loop exit
PB: predicated region body
PF: predicated region fallthrough
CT: control target
= control target key end

     0   :  { %s2724_s18 = smov 0   ;;  %s3794_s0 = inlined_call_operand.vmem [shape: bf16[512,128], index: 0, kind: input, shape index: {}]   ;;  %s3795_s1 = inlined_call_operand.vmem [shape: bf16[128,384], index: 1, kind: input, shape index: {}]   ;;  %s3796_s2 = inlined_call_operand.vmem [shape: f32[1,384], index: 2, kind: input, shape index: {}]   ;;  %s3797_s3 = inlined_call_operand.vmem [shape: bf16[384,256], index: 3, kind: input, shape index: {}]   ;;  %s3798_s4 = inlined_call_operand.vmem [shape: f32[1,256], index: 4, kind: input, shape index: {}]   ;;  %s3799_s5 = inlined_call_operand.vmem [shape: f32[512,256], index: 5, kind: output, shape index: {}]  }
   0x1 LB: > { %s2151_s19 = sadd.s32 4294967295, %s2691_s18   ;;  %p2155_p0 = scmp.ge.s32.totalorder %s2691_s18, 1  ;;  %s2691_s18 = sphi %s2724_s18, %s15_s18  }
   0x2   : > { %p188_p1 = scmp.lt.s32.totalorder %s2691_s18, 5 }
   0x4   : > { %p189_p2 = pnand %p2155_p0, %p188_p1 }
   0x5   : > { %v2381_v0 = vld [vmem:[%s3795_s1 + $0x4] ss:$12 sps:$4 sm:$0xff] (!%p189_p2)   ;;  %s2156_s22 = sshll.u32 (!%p189_p2), %s2151_s19, 4  ;;  %v2383_v1 = vld [vmem:[%s3795_s1 + $0x8] ss:$12 sps:$4 sm:$0xff] (!%p189_p2)   ;;  %v2693_v2 = vmov (!%p189_p2), 0  }
   0x6   : > { %192 = sbr.rel (%p189_p2) target bundleno = 754 (0x2f2), region = 40  ;;  %504 = vmatprep.mubr.bf16.mxu0 (!%p189_p2), %v2693_v2  ;;  %472 = vmatprep.subr.bf16.mxu0 (!%p189_p2), %v2381_v0  ;;  %v2384_v3 = vld [vmem:[%s3795_s1] ss:$12 sps:$4 sm:$0xff] (!%p189_p2)   ;;  %p218_p3 = scmp.lt.s32.totalorder (!%p189_p2), %s2156_s22, 63  ;;  %v2385_v4 = vld [vmem:[%s3795_s1 + $0x1c] ss:$12 sps:$4 sm:$0xff] (!%p189_p2)  }
   0x7   : > { %2276 = vmatprep.subr.bf16.mxu1 (!%p189_p2), %v2383_v1  ;;  %473 = vmatpush1.bf16.msra.mxu0 (!%p189_p2), %v2384_v3  ;;  %v2387_v5 = vld [vmem:[%s3795_s1 + $0x20] ss:$12 sps:$4 sm:$0xff] (!%p189_p2)   ;;  %v2388_v6 = vld [vmem:[%s3795_s1 + $0x18] ss:$12 sps:$4 sm:$0xff] (!%p189_p2)   ;;  %v2392_v9 = vld [vmem:[%s3795_s1 + $0x30] ss:$12 sps:$4 sm:$0xff] (!%p189_p2)  }
   0x8   : > { %2277 = vmatpush3.bf16.msra.mxu1 (!%p189_p2), %v2383_v1  ;;  %474 = vmatprep.subr.bf16.mxu0 (!%p189_p2), %v2385_v4  ;;  %v2389_v7 = vld [vmem:[%s3795_s1 + $0x34] ss:$12 sps:$4 sm:$0xff] (!%p189_p2)   ;;  %v2391_v8 = vld [vmem:[%s3795_s1 + $0x38] ss:$12 sps:$4 sm:$0xff] (!%p189_p2)   ;;  %v2395_v11 = vld [vmem:[%s3795_s1 + $0x50] ss:$12 sps:$4 sm:$0xff] (!%p189_p2)  }
   0x9   : > { %2278 = vmatprep.subr.bf16.mxu1 (!%p189_p2), %v2387_v5  ;;  %v2393_v10 = vld [vmem:[%s3795_s1 + $0x4c] ss:$12 sps:$4 sm:$0xff] (!%p189_p2)   ;;  %v2396_v12 = vld [vmem:[%s3795_s1 + $0x48] ss:$12 sps:$4 sm:$0xff] (!%p189_p2)   ;;  %v2397_v13 = vld [vmem:[%s3795_s1 + $0x64] ss:$12 sps:$4 sm:$0xff] (!%p189_p2)  }
   0xa   : > { %v2399_v14 = vld [vmem:[%s3795_s1 + $0x68] ss:$12 sps:$4 sm:$0xff] (!%p189_p2)   ;;  %v2400_v15 = vld [vmem:[%s3795_s1 + $0x60] ss:$12 sps:$4 sm:$0xff] (!%p189_p2)   ;;  %v2404_v18 = vld [vmem:[%s3795_s1 + $0x78] ss:$12 sps:$4 sm:$0xff] (!%p189_p2)  }
   0xb   : > { %475 = vmatpush1.bf16.msra.mxu0 (!%p189_p2), %v2388_v6  ;;  %v2401_v16 = vld [vmem:[%s3795_s1 + $0x7c] ss:$12 sps:$4 sm:$0xff] (!%p189_p2)   ;;  %v2403_v17 = vld [vmem:[%s3795_s1 + $0x80] ss:$12 sps:$4 sm:$0xff] (!%p189_p2)   ;;  %v2407_v21 = vld [vmem:[%s3795_s1 + $0x98] ss:$12 sps:$4 sm:$0xff] (!%p189_p2)  }
   0xc   : > { %2279 = vmatpush3.bf16.msra.mxu1 (!%p189_p2), %v2387_v5  ;;  %476 = vmatprep.subr.bf16.mxu0 (!%p189_p2), %v2389_v7  ;;  %v2405_v20 = vld [vmem:[%s3795_s1 + $0x94] ss:$12 sps:$4 sm:$0xff] (!%p189_p2)   ;;  %v2408_v22 = vld [vmem:[%s3795_s1 + $0x90] ss:$12 sps:$4 sm:$0xff] (!%p189_p2)   ;;  %v2409_v23 = vld [vmem:[%s3795_s1 + $0xac] ss:$12 sps:$4 sm:$0xff] (!%p189_p2)  }
   0xd   : > { %s3801_s22 = smov (!%p218_p3, %s2156_s22), 63  ;;  %2280 = vmatprep.subr.bf16.mxu1 %v2391_v8  ;;  %v2411_v24 = vld [vmem:[%s3795_s1 + $0xb0] ss:$12 sps:$4 sm:$0xff]   ;;  %v2412_v25 = vld [vmem:[%s3795_s1 + $0xa8] ss:$12 sps:$4 sm:$0xff]  }
   0xe   : > { %s2157_s21 = sshll.u32 %s3801_s22, 2  ;;  %v2423_v26 = vld [vmem:[%s3797_s3 + $0x4] ss:$8 sps:$4 sm:$0xff]   ;;  %v2421_v30 = vld [vmem:[%s3797_s3] ss:$8 sps:$4 sm:$0xff]   ;;  %s2259_s13 = sshll.u32 %s3801_s22, 4 }
   0xf   : > { %477 = vmatpush1.bf16.msra.mxu0 %v2392_v9  ;;  %s2787_s8 = scalar_lea.vmem %s3794_s0, %s2157_s21  ;;  %v2426_v27 = vld [vmem:[%s3797_s3 + $0x104] ss:$8 sps:$4 sm:$0xff]   ;;  %v2424_v31 = vld [vmem:[%s3797_s3 + $0x100] ss:$8 sps:$4 sm:$0xff]   ;;  %v2429_v32 = vld [vmem:[%s3797_s3 + $0x14] ss:$8 sps:$4 sm:$0xff]  }
  0x10   : > { %2281 = vmatpush3.bf16.msra.mxu1 %v2391_v8  ;;  %478 = vmatprep.subr.bf16.mxu0 %v2393_v10  ;;  %v2413_v19 = vld [vmem:[%s2787_s8] sm:$0xff]   ;;  %v2414_v28 = vld [vmem:[%s2787_s8 + $0x8] sm:$0xff]   ;;  %v2415_v29 = vld [vmem:[%s2787_s8 + $0x10] sm:$0xff]  }
  0x11   : > { %2282 = vmatprep.subr.bf16.mxu1 %v2395_v11  ;;  %2292 = vmatprep.mubr.bf16.mxu1 %v2413_v19  ;;  %v2435_v33 = vld [vmem:[%s3797_s3 + $0x114] ss:$8 sps:$4 sm:$0xff]   ;;  %v2427_v34 = vld [vmem:[%s3797_s3 + $0x10] ss:$8 sps:$4 sm:$0xff]   ;;  %v2432_v36 = vld [vmem:[%s3797_s3 + $0x24] ss:$8 sps:$4 sm:$0xff]  }
  0x12   : > { %v2433_v35 = vld [vmem:[%s3797_s3 + $0x110] ss:$8 sps:$4 sm:$0xff]   ;;  %v2444_v37 = vld [vmem:[%s3797_s3 + $0x124] ss:$8 sps:$4 sm:$0xff]   ;;  %v2430_v40 = vld [vmem:[%s3797_s3 + $0x20] ss:$8 sps:$4 sm:$0xff]  }
  0x13   : > { %479 = vmatpush1.bf16.msra.mxu0 %v2396_v12  ;;  %v2416_v38 = vld [vmem:[%s2787_s8 + $0x18] sm:$0xff]   ;;  %v2417_v39 = vld [vmem:[%s2787_s8 + $0x20] sm:$0xff]   ;;  %v2418_v48 = vld [vmem:[%s2787_s8 + $0x28] sm:$0xff]  }
  0x14   : > { %2283 = vmatpush3.bf16.msra.mxu1 %v2395_v11  ;;  %480 = vmatprep.subr.bf16.mxu0 %v2397_v13  ;;  %v2442_v41 = vld [vmem:[%s3797_s3 + $0x120] ss:$8 sps:$4 sm:$0xff]   ;;  %v2438_v42 = vld [vmem:[%s3797_s3 + $0x34] ss:$8 sps:$4 sm:$0xff]   ;;  %v2436_v44 = vld [vmem:[%s3797_s3 + $0x30] ss:$8 sps:$4 sm:$0xff]  }
  0x15   : > { %2284 = vmatprep.subr.bf16.mxu1 %v2399_v14  ;;  %v2453_v43 = vld [vmem:[%s3797_s3 + $0x134] ss:$8 sps:$4 sm:$0xff]   ;;  %v2451_v45 = vld [vmem:[%s3797_s3 + $0x130] ss:$8 sps:$4 sm:$0xff]   ;;  %v2441_v46 = vld [vmem:[%s3797_s3 + $0x44] ss:$8 sps:$4 sm:$0xff]  }
  0x16   : > { %v2462_v47 = vld [vmem:[%s3797_s3 + $0x144] ss:$8 sps:$4 sm:$0xff]   ;;  %v2419_v49 = vld [vmem:[%s2787_s8 + $0x30] sm:$0xff]   ;;  %v2439_v50 = vld [vmem:[%s3797_s3 + $0x40] ss:$8 sps:$4 sm:$0xff]  }
  0x17   : > { %481 = vmatpush1.bf16.msra.mxu0 %v2400_v15  ;;  %v2460_v51 = vld [vmem:[%s3797_s3 + $0x140] ss:$8 sps:$4 sm:$0xff]   ;;  %v2447_v52 = vld [vmem:[%s3797_s3 + $0x54] ss:$8 sps:$4 sm:$0xff]   ;;  %v2445_v54 = vld [vmem:[%s3797_s3 + $0x50] ss:$8 sps:$4 sm:$0xff]  }
  0x18   : > { %2285 = vmatpush3.bf16.msra.mxu1 %v2399_v14  ;;  %482 = vmatprep.subr.bf16.mxu0 %v2401_v16  ;;  %v2471_v53 = vld [vmem:[%s3797_s3 + $0x154] ss:$8 sps:$4 sm:$0xff]   ;;  %v2469_v55 = vld [vmem:[%s3797_s3 + $0x150] ss:$8 sps:$4 sm:$0xff]   ;;  %v2450_v57 = vld [vmem:[%s3797_s3 + $0x64] ss:$8 sps:$4 sm:$0xff]  }
  0x19   : > { %2286 = vmatprep.subr.bf16.mxu1 %v2403_v17  ;;  %v2420_v56 = vld [vmem:[%s2787_s8 + $0x38] sm:$0xff]   ;;  %v2480_v58 = vld [vmem:[%s3797_s3 + $0x164] ss:$8 sps:$4 sm:$0xff]   ;;  %v2448_v59 = vld [vmem:[%s3797_s3 + $0x60] ss:$8 sps:$4 sm:$0xff]   ;;  %s3361_s8 = scalar_lea.vmem %s3799_s5, %s2259_s13 }
  0x1a   : > { %v2478_v60 = vld [vmem:[%s3797_s3 + $0x160] ss:$8 sps:$4 sm:$0xff]   ;;  %v2456_v61 = vld [vmem:[%s3797_s3 + $0x74] ss:$8 sps:$4 sm:$0xff]   ;;  %v2454_v62 = vld [vmem:[%s3797_s3 + $0x70] ss:$8 sps:$4 sm:$0xff]  }
  0x1b   : > { %483 = vmatpush1.bf16.msra.mxu0 %v2404_v18  ;;  %v2459_v63 = vld [vmem:[%s3797_s3 + $0x84] ss:$8 sps:$4 sm:$0xff]   ;;  %v2457_v0 = vld [vmem:[%s3797_s3 + $0x80] ss:$8 sps:$4 sm:$0xff]   ;;  %v2465_v1 = vld [vmem:[%s3797_s3 + $0x94] ss:$8 sps:$4 sm:$0xff]   ;;  %v281_v18 = vlaneseq }
  0x1c   : > { %2287 = vmatpush3.bf16.msra.mxu1 %v2403_v17  ;;  %484 = vmatprep.subr.bf16.mxu0 %v2405_v20  ;;  %v2463_v3 = vld [vmem:[%s3797_s3 + $0x90] ss:$8 sps:$4 sm:$0xff]   ;;  %v2468_v4 = vld [vmem:[%s3797_s3 + $0xa4] ss:$8 sps:$4 sm:$0xff]   ;;  %v2466_v5 = vld [vmem:[%s3797_s3 + $0xa0] ss:$8 sps:$4 sm:$0xff]  }
  0x1d   : > { %2288 = vmatprep.subr.bf16.mxu1 %v2407_v21  ;;  %v2474_v6 = vld [vmem:[%s3797_s3 + $0xb4] ss:$8 sps:$4 sm:$0xff]   ;;  %v2472_v7 = vld [vmem:[%s3797_s3 + $0xb0] ss:$8 sps:$4 sm:$0xff]   ;;  %v2477_v8 = vld [vmem:[%s3797_s3 + $0xc4] ss:$8 sps:$4 sm:$0xff]  }
  0x1e   : > { %v2475_v9 = vld [vmem:[%s3797_s3 + $0xc0] ss:$8 sps:$4 sm:$0xff]   ;;  %v2483_v10 = vld [vmem:[%s3797_s3 + $0xd4] ss:$8 sps:$4 sm:$0xff]   ;;  %v2481_v11 = vld [vmem:[%s3797_s3 + $0xd0] ss:$8 sps:$4 sm:$0xff]  }
  0x1f   : > { %485 = vmatpush1.bf16.msra.mxu0 %v2408_v22  ;;  %v2486_v12 = vld [vmem:[%s3797_s3 + $0xe4] ss:$8 sps:$4 sm:$0xff]   ;;  %v2484_v13 = vld [vmem:[%s3797_s3 + $0xe0] ss:$8 sps:$4 sm:$0xff]   ;;  %v2489_v14 = vld [vmem:[%s3797_s3 + $0x174] ss:$8 sps:$4 sm:$0xff]  }
  0x20   : > { %2289 = vmatpush3.bf16.msra.mxu1 %v2407_v21  ;;  %486 = vmatprep.subr.bf16.mxu0 %v2409_v23  ;;  %v2487_v15 = vld [vmem:[%s3797_s3 + $0x170] ss:$8 sps:$4 sm:$0xff]   ;;  %v2492_v16 = vld [vmem:[%s3797_s3 + $0xf4] ss:$8 sps:$4 sm:$0xff]   ;;  %v279_v22 = vld [vmem:[%s3796_s2] sm:$0x7] }
  0x21   : > { %2290 = vmatprep.subr.bf16.mxu1 %v2411_v24  ;;  %v2490_v17 = vld [vmem:[%s3797_s3 + $0xf0] ss:$8 sps:$4 sm:$0xff]  }
  0x23   : > { %487 = vmatpush1.bf16.msra.mxu0 %v2412_v25 }
  0x24   : > { %2291 = vmatpush3.bf16.msra.mxu1 %v2411_v24  ;;  %1167 = vmatprep.subr.bf16.mxu0 %v2426_v27 }
  0x25   : > { %1054 = vmatprep.subr.bf16.mxu1 %v2423_v26 }
  0x26   : > { %505 = vmatmul.mubr.bf16.vlgmr.msra.gmra.mrb[0].mxu0 %v2413_v19  ;;  %v2974_v19 = vshrl.u32 %v281_v18, 7 }
  0x27   : > { %2293 = vmatmul.mubr.bf16.vlgmr.msra.gmra.mrb[0].mxu1 %v2414_v28  ;;  %514 = vmatprep.mubr.bf16.mxu0 %v2693_v2 }
  0x28   : > { %2296 = vmatprep.mubr.bf16.mxu1 %v2415_v29  ;;  %1055 = vmatpush1.bf16.msra.mxu1 %v2421_v30  ;;  %v283_v20 = vsub.s32 0, %v2974_v19  ;;  %v291_v21 = vsub.s32 2, %v2974_v19  ;;  %v287_v23 = vsub.s32 1, %v2974_v19 }
  0x29   : > { %1168 = vmatpush1.bf16.msra.mxu0 %v2424_v31  ;;  %1056 = vmatprep.subr.bf16.mxu1 %v2429_v32 }
  0x2a   : > { %1169 = vmatprep.subr.bf16.mxu0 %v2435_v33  ;;  %v2984_v24 = vrot.slane %v279_v22, %v283_v20  ;;  %v2986_v25 = vrot.slane %v279_v22, %v291_v21  ;;  %v2990_v26 = vrot.slane %v279_v22, %v287_v23 }
  0x2c   : > { %1057 = vmatpush1.bf16.msra.mxu1 %v2427_v34 }
  0x2d   : > { %1170 = vmatpush1.bf16.msra.mxu0 %v2433_v35  ;;  %1058 = vmatprep.subr.bf16.mxu1 %v2432_v36 }
  0x2e   : > { %1171 = vmatprep.subr.bf16.mxu0 %v2444_v37  ;;  %515 = vmatmul.mubr.bf16.gmra.mrb[4].mxu0 %v2414_v28 }
  0x2f   : > { %2297 = vmatmul.mubr.bf16.gmra.mrb[4].mxu1 %v2416_v38  ;;  %524 = vmatprep.mubr.bf16.mxu0 %v2693_v2 }
  0x30   : > { %2300 = vmatprep.mubr.bf16.mxu1 %v2417_v39  ;;  %1059 = vmatpush1.bf16.msra.mxu1 %v2430_v40 }
  0x31   : > { %1172 = vmatpush1.bf16.msra.mxu0 %v2442_v41  ;;  %1060 = vmatprep.subr.bf16.mxu1 %v2438_v42 }
  0x32   : > { %1173 = vmatprep.subr.bf16.mxu0 %v2453_v43 }
  0x34   : > { %1061 = vmatpush1.bf16.msra.mxu1 %v2436_v44 }
  0x35   : > { %1174 = vmatpush1.bf16.msra.mxu0 %v2451_v45  ;;  %1062 = vmatprep.subr.bf16.mxu1 %v2441_v46 }
  0x36   : > { %1175 = vmatprep.subr.bf16.mxu0 %v2462_v47  ;;  %525 = vmatmul.mubr.bf16.gmra.mrb[8].mxu0 %v2415_v29 }
  0x37   : > { %2301 = vmatmul.mubr.bf16.gmra.mrb[8].mxu1 %v2418_v48  ;;  %534 = vmatprep.mubr.bf16.mxu0 %v2693_v2 }
  0x38   : > { %2304 = vmatprep.mubr.bf16.mxu1 %v2419_v49  ;;  %1063 = vmatpush1.bf16.msra.mxu1 %v2439_v50 }
  0x39   : > { %1176 = vmatpush1.bf16.msra.mxu0 %v2460_v51  ;;  %1064 = vmatprep.subr.bf16.mxu1 %v2447_v52 }
  0x3a   : > { %1177 = vmatprep.subr.bf16.mxu0 %v2471_v53 }
  0x3c   : > { %1065 = vmatpush1.bf16.msra.mxu1 %v2445_v54 }
  0x3d   : > { %1178 = vmatpush1.bf16.msra.mxu0 %v2469_v55  ;;  %1066 = vmatprep.subr.bf16.mxu1 %v2450_v57 }
  0x3e   : > { %1179 = vmatprep.subr.bf16.mxu0 %v2480_v58  ;;  %535 = vmatmul.mubr.bf16.gmra.mrb[12].mxu0 %v2416_v38 }
  0x3f   : > { %2305 = vmatmul.mubr.bf16.gmra.mrb[12].mxu1 %v2420_v56  ;;  %544 = vmatprep.mubr.bf16.mxu0 %v2693_v2 }
  0x40   : > { %1067 = vmatpush1.bf16.msra.mxu1 %v2448_v59 }
  0x41   : > { %1180 = vmatpush1.bf16.msra.mxu0 %v2478_v60  ;;  %1068 = vmatprep.subr.bf16.mxu1 %v2456_v61 }
  0x42   : > { %1181 = vmatprep.subr.bf16.mxu0 %v2489_v14 }
  0x44   : > { %1069 = vmatpush1.bf16.msra.mxu1 %v2454_v62 }
  0x45   : > { %1070 = vmatprep.subr.bf16.mxu1 %v2459_v63  ;;  %1182 = vmatpush1.bf16.msra.mxu0 %v2487_v15 }
  0x46   : > { %545 = vmatmul.mubr.bf16.gmra.mrb[16].mxu0 %v2417_v39 }
  0x47   : > { %554 = vmatprep.mubr.bf16.mxu0 %v2693_v2 }
  0x48   : > { %1071 = vmatpush1.bf16.msra.mxu1 %v2457_v0 }
  0x49   : > { %1072 = vmatprep.subr.bf16.mxu1 %v2465_v1 }
  0x4c   : > { %1073 = vmatpush1.bf16.msra.mxu1 %v2463_v3 }
  0x4d   : > { %1074 = vmatprep.subr.bf16.mxu1 %v2468_v4 }
  0x4e   : > { %555 = vmatmul.mubr.bf16.gmra.mrb[20].mxu0 %v2418_v48 }
  0x4f   : > { %564 = vmatprep.mubr.bf16.mxu0 %v2693_v2 }
  0x50   : > { %1075 = vmatpush1.bf16.msra.mxu1 %v2466_v5 }
  0x51   : > { %1076 = vmatprep.subr.bf16.mxu1 %v2474_v6 }
  0x54   : > { %1077 = vmatpush1.bf16.msra.mxu1 %v2472_v7 }
  0x55   : > { %1078 = vmatprep.subr.bf16.mxu1 %v2477_v8 }
  0x56   : > { %565 = vmatmul.mubr.bf16.gmra.mrb[24].mxu0 %v2419_v49 }
  0x57   : > { %574 = vmatprep.mubr.bf16.mxu0 %v2693_v2 }
  0x58   : > { %1079 = vmatpush1.bf16.msra.mxu1 %v2475_v9 }
  0x59   : > { %1080 = vmatprep.subr.bf16.mxu1 %v2483_v10 }
  0x5c   : > { %1081 = vmatpush1.bf16.msra.mxu1 %v2481_v11 }
  0x5d   : > { %1082 = vmatprep.subr.bf16.mxu1 %v2486_v12 }
  0x5e   : > { %575 = vmatmul.mubr.bf16.gmra.mrb[28].mxu0 %v2420_v56 }
  0x5f   : > { %1199 = vmatprep.mubr.bf16.mxu0 %v2693_v2 }
  0x60   : > { %1083 = vmatpush1.bf16.msra.mxu1 %v2484_v13 }
  0x61   : > { %1084 = vmatprep.subr.bf16.mxu1 %v2492_v16 }
  0x64   : > { %1085 = vmatpush1.bf16.msra.mxu1 %v2490_v17 }
  0xf9   : > { %v506_v27 = vpop.f32.mrb[0].mxu0 }
  0xfa   : > { %v2294_v28 = vpop.f32.mrb[0].mxu1  ;;  %v507_v29 = vadd.f32 %v506_v27, %v2984_v24  ;;  %v508_v31 = vpop.f32.mrb[1].mxu0 }
  0xfb   : > { %v628_v30 = vadd.f32 %v2294_v28, %v2986_v25  ;;  %v619_v32 = vpop.f32.mrb[1].mxu1  ;;  %v509_v33 = vadd.f32 %v508_v31, %v2990_v26  ;;  %v510_v35 = vpop.f32.mrb[2].mxu0 }
  0xfc   : > { %v620_v34 = vadd.f32 %v619_v32, %v2986_v25  ;;  %v2295_v36 = vpop.f32.mrb[2].mxu1  ;;  %v511_v38 = vadd.f32 %v510_v35, %v2984_v24  ;;  %v512_v40 = vpop.f32.mrb[3].mxu0  ;;  %v682_v45 = vmax.f32 %v507_v29, 0.0 }
  0xfd   : > { %v690_v37 = vmax.f32 %v628_v30, 0.0  ;;  %v631_v39 = vadd.f32 %v2295_v36, %v2986_v25  ;;  %v622_v41 = vpop.f32.mrb[3].mxu1  ;;  %v513_v43 = vadd.f32 %v512_v40, %v2990_v26  ;;  %v683_v48 = vmax.f32 %v509_v33, 0.0 }
  0xfe   : > { %v684_v42 = vmax.f32 %v620_v34, 0.0  ;;  %v623_v44 = vadd.f32 %v622_v41, %v2986_v25  ;;  %v685_v46 = vmax.f32 %v511_v38, 0.0 }
  0xff   : > { %v693_v47 = vmax.f32 %v631_v39, 0.0  ;;  %v686_v49 = vmax.f32 %v513_v43, 0.0 }
 0x100   : > { %v687_v50 = vmax.f32 %v623_v44, 0.0  ;;  %v730_v51 = vpack.c.bf16 %v685_v46, %v682_v45 }
 0x101   : > { %v735_v52 = vpack.c.bf16 %v693_v47, %v690_v37  ;;  %v731_v53 = vpack.c.bf16 %v686_v49, %v683_v48  ;;  %v516_v55 = vpop.f32.mrb[4].mxu0 }
 0x102   : > { %v732_v54 = vpack.c.bf16 %v687_v50, %v684_v42  ;;  %v2298_v56 = vpop.f32.mrb[4].mxu1  ;;  %v517_v57 = vadd.f32 %v516_v55, %v2984_v24  ;;  %v518_v58 = vpop.f32.mrb[5].mxu0 }
 0x103   : > { %v644_v59 = vadd.f32 %v2298_v56, %v2986_v25  ;;  %v635_v60 = vpop.f32.mrb[5].mxu1  ;;  %v519_v61 = vadd.f32 %v518_v58, %v2990_v26  ;;  %v520_v62 = vpop.f32.mrb[6].mxu0  ;;  %1086 = vmatprep.mubr.bf16.mxu1 %v731_v53 }
 0x104   : > { %1200 = vmatmul.mubr.bf16.vlgmr.msra.gmra.mrb[32].mxu0 %v732_v54  ;;  %v636_v63 = vadd.f32 %v635_v60, %v2986_v25  ;;  %v2299_v0 = vpop.f32.mrb[6].mxu1  ;;  %v521_v1 = vadd.f32 %v520_v62, %v2984_v24  ;;  %v522_v3 = vpop.f32.mrb[7].mxu0  ;;  %1087 = vmatmul.mubr.bf16.vlgmr.msra.gmra.mrb[16].mxu1 %v730_v51  ;;  %v688_v10 = vmax.f32 %v517_v57, 0.0 }
 0x105   : > { %v702_v4 = vmax.f32 %v644_v59, 0.0  ;;  %1209 = vmatprep.mubr.bf16.mxu0 %v2693_v2  ;;  %v647_v5 = vadd.f32 %v2299_v0, %v2986_v25  ;;  %v638_v6 = vpop.f32.mrb[7].mxu1  ;;  %v523_v7 = vadd.f32 %v522_v3, %v2990_v26  ;;  %v689_v13 = vmax.f32 %v519_v61, 0.0 }
 0x106   : > { %v696_v8 = vmax.f32 %v636_v63, 0.0  ;;  %v639_v9 = vadd.f32 %v638_v6, %v2986_v25  ;;  %v691_v11 = vmax.f32 %v521_v1, 0.0 }
 0x107   : > { %v705_v12 = vmax.f32 %v647_v5, 0.0  ;;  %v692_v14 = vmax.f32 %v523_v7, 0.0 }
 0x108   : > { %v699_v15 = vmax.f32 %v639_v9, 0.0  ;;  %v733_v16 = vpack.c.bf16 %v691_v11, %v688_v10 }
 0x109   : > { %v3009_v17 = vpack.c.bf16 %v705_v12, %v702_v4  ;;  %v734_v21 = vpack.c.bf16 %v692_v14, %v689_v13  ;;  %v526_v22 = vpop.f32.mrb[8].mxu0 }
 0x10a   : > { %v738_v27 = vpack.c.bf16 %v699_v15, %v696_v8  ;;  %v2302_v28 = vpop.f32.mrb[8].mxu1  ;;  %v527_v29 = vadd.f32 %v526_v22, %v2984_v24  ;;  %v528_v30 = vpop.f32.mrb[9].mxu0 }
 0x10b   : > { %v660_v31 = vadd.f32 %v2302_v28, %v2986_v25  ;;  %v651_v32 = vpop.f32.mrb[9].mxu1  ;;  %v529_v33 = vadd.f32 %v528_v30, %v2990_v26  ;;  %v530_v34 = vpop.f32.mrb[10].mxu0  ;;  %1096 = vmatprep.mubr.bf16.mxu1 %v734_v21 }
 0x10c   : > { %1210 = vmatmul.mubr.bf16.gmra.mrb[36].mxu0 %v735_v52  ;;  %v652_v35 = vadd.f32 %v651_v32, %v2986_v25  ;;  %v2303_v36 = vpop.f32.mrb[10].mxu1  ;;  %v694_v37 = vmax.f32 %v527_v29, 0.0  ;;  %v531_v38 = vadd.f32 %v530_v34, %v2984_v24  ;;  %v532_v39 = vpop.f32.mrb[11].mxu0  ;;  %1097 = vmatmul.mubr.bf16.gmra.mrb[20].mxu1 %v733_v16 }
 0x10d   : > { %1219 = vmatprep.mubr.bf16.mxu0 %v2693_v2  ;;  %v714_v40 = vmax.f32 %v660_v31, 0.0  ;;  %v663_v41 = vadd.f32 %v2303_v36, %v2986_v25  ;;  %v654_v42 = vpop.f32.mrb[11].mxu1  ;;  %v695_v43 = vmax.f32 %v529_v33, 0.0  ;;  %v533_v44 = vadd.f32 %v532_v39, %v2990_v26 }
 0x10e   : > { %v708_v45 = vmax.f32 %v652_v35, 0.0  ;;  %v655_v46 = vadd.f32 %v654_v42, %v2986_v25  ;;  %v697_v47 = vmax.f32 %v531_v38, 0.0 }
 0x10f   : > { %v717_v48 = vmax.f32 %v663_v41, 0.0  ;;  %v698_v49 = vmax.f32 %v533_v44, 0.0 }
 0x110   : > { %v711_v50 = vmax.f32 %v655_v46, 0.0  ;;  %v736_v51 = vpack.c.bf16 %v697_v47, %v694_v37 }
 0x111   : > { %v3020_v52 = vpack.c.bf16 %v717_v48, %v714_v40  ;;  %v737_v53 = vpack.c.bf16 %v698_v49, %v695_v43  ;;  %v536_v54 = vpop.f32.mrb[12].mxu0 }
 0x112   : > { %v744_v55 = vpack.c.bf16 %v711_v50, %v708_v45  ;;  %v2306_v56 = vpop.f32.mrb[12].mxu1  ;;  %v537_v57 = vadd.f32 %v536_v54, %v2984_v24  ;;  %v538_v58 = vpop.f32.mrb[13].mxu0 }
 0x113   : > { %v676_v59 = vadd.f32 %v2306_v56, %v2986_v25  ;;  %v667_v60 = vpop.f32.mrb[13].mxu1  ;;  %v539_v61 = vadd.f32 %v538_v58, %v2990_v26  ;;  %v540_v62 = vpop.f32.mrb[14].mxu0  ;;  %1106 = vmatprep.mubr.bf16.mxu1 %v737_v53 }
 0x114   : > { %1220 = vmatmul.mubr.bf16.gmra.mrb[40].mxu0 %v738_v27  ;;  %v668_v63 = vadd.f32 %v667_v60, %v2986_v25  ;;  %v2307_v0 = vpop.f32.mrb[14].mxu1  ;;  %v700_v1 = vmax.f32 %v537_v57, 0.0  ;;  %v541_v3 = vadd.f32 %v540_v62, %v2984_v24  ;;  %v542_v4 = vpop.f32.mrb[15].mxu0  ;;  %1107 = vmatmul.mubr.bf16.gmra.mrb[24].mxu1 %v736_v51 }
 0x115   : > { %1229 = vmatprep.mubr.bf16.mxu0 %v2693_v2  ;;  %v726_v5 = vmax.f32 %v676_v59, 0.0  ;;  %v679_v6 = vadd.f32 %v2307_v0, %v2986_v25  ;;  %v670_v7 = vpop.f32.mrb[15].mxu1  ;;  %v701_v8 = vmax.f32 %v539_v61, 0.0  ;;  %v543_v9 = vadd.f32 %v542_v4, %v2990_v26 }
 0x116   : > { %v720_v10 = vmax.f32 %v668_v63, 0.0  ;;  %v671_v11 = vadd.f32 %v670_v7, %v2986_v25  ;;  %v703_v12 = vmax.f32 %v541_v3, 0.0 }
 0x117   : > { %v729_v13 = vmax.f32 %v679_v6, 0.0  ;;  %v704_v14 = vmax.f32 %v543_v9, 0.0 }
 0x118   : > { %v723_v15 = vmax.f32 %v671_v11, 0.0  ;;  %v739_v16 = vpack.c.bf16 %v703_v12, %v700_v1 }
 0x119   : > { %v3031_v21 = vpack.c.bf16 %v729_v13, %v726_v5  ;;  %v740_v22 = vpack.c.bf16 %v704_v14, %v701_v8  ;;  %v546_v27 = vpop.f32.mrb[16].mxu0 }
 0x11a   : > { %v750_v28 = vpack.c.bf16 %v723_v15, %v720_v10  ;;  %v547_v29 = vadd.f32 %v546_v27, %v2984_v24  ;;  %v548_v30 = vpop.f32.mrb[17].mxu0 }
 0x11b   : > { %1116 = vmatprep.mubr.bf16.mxu1 %v740_v22  ;;  %v549_v31 = vadd.f32 %v548_v30, %v2990_v26  ;;  %v550_v32 = vpop.f32.mrb[18].mxu0 }
 0x11c   : > { %1230 = vmatmul.mubr.bf16.gmra.mrb[44].mxu0 %v3009_v17  ;;  %v706_v25 = vmax.f32 %v547_v29, 0.0  ;;  %1117 = vmatmul.mubr.bf16.gmra.mrb[28].mxu1 %v739_v16  ;;  %v551_v33 = vadd.f32 %v550_v32, %v2984_v24  ;;  %v552_v34 = vpop.f32.mrb[19].mxu0 }
 0x11d   : > { %1239 = vmatprep.mubr.bf16.mxu0 %v2693_v2  ;;  %v707_v35 = vmax.f32 %v549_v31, 0.0  ;;  %v553_v36 = vadd.f32 %v552_v34, %v2990_v26 }
 0x11e   : > { %v709_v37 = vmax.f32 %v551_v33, 0.0 }
 0x11f   : > { %v710_v38 = vmax.f32 %v553_v36, 0.0 }
 0x120   : > { %v742_v39 = vpack.c.bf16 %v709_v37, %v706_v25 }
 0x121   : > { %v743_v40 = vpack.c.bf16 %v710_v38, %v707_v35  ;;  %v556_v41 = vpop.f32.mrb[20].mxu0 }
 0x122   : > { %v557_v17 = vadd.f32 %v556_v41, %v2984_v24  ;;  %v558_v42 = vpop.f32.mrb[21].mxu0 }
 0x123   : > { %v559_v43 = vadd.f32 %v558_v42, %v2990_v26  ;;  %v560_v44 = vpop.f32.mrb[22].mxu0  ;;  %1126 = vmatprep.mubr.bf16.mxu1 %v743_v40 }
 0x124   : > { %1240 = vmatmul.mubr.bf16.gmra.mrb[48].mxu0 %v744_v55  ;;  %v712_v45 = vmax.f32 %v557_v17, 0.0  ;;  %v561_v46 = vadd.f32 %v560_v44, %v2984_v24  ;;  %v562_v47 = vpop.f32.mrb[23].mxu0  ;;  %1127 = vmatmul.mubr.bf16.gmra.mrb[32].mxu1 %v742_v39 }
 0x125   : > { %1249 = vmatprep.mubr.bf16.mxu0 %v2693_v2  ;;  %v713_v48 = vmax.f32 %v559_v43, 0.0  ;;  %v563_v49 = vadd.f32 %v562_v47, %v2990_v26 }
 0x126   : > { %v715_v50 = vmax.f32 %v561_v46, 0.0 }
 0x127   : > { %v716_v51 = vmax.f32 %v563_v49, 0.0 }
 0x128   : > { %v745_v53 = vpack.c.bf16 %v715_v50, %v712_v45 }
 0x129   : > { %v746_v54 = vpack.c.bf16 %v716_v51, %v713_v48  ;;  %v566_v56 = vpop.f32.mrb[24].mxu0 }
 0x12a   : > { %v567_v57 = vadd.f32 %v566_v56, %v2984_v24  ;;  %v568_v58 = vpop.f32.mrb[25].mxu0 }
 0x12b   : > { %1136 = vmatprep.mubr.bf16.mxu1 %v746_v54  ;;  %v569_v55 = vadd.f32 %v568_v58, %v2990_v26  ;;  %v570_v59 = vpop.f32.mrb[26].mxu0 }
 0x12c   : > { %1250 = vmatmul.mubr.bf16.gmra.mrb[52].mxu0 %v3020_v52  ;;  %1137 = vmatmul.mubr.bf16.gmra.mrb[36].mxu1 %v745_v53  ;;  %v718_v60 = vmax.f32 %v567_v57, 0.0  ;;  %v571_v61 = vadd.f32 %v570_v59, %v2984_v24  ;;  %v572_v62 = vpop.f32.mrb[27].mxu0 }
 0x12d   : > { %1259 = vmatprep.mubr.bf16.mxu0 %v2693_v2  ;;  %v719_v63 = vmax.f32 %v569_v55, 0.0  ;;  %v573_v0 = vadd.f32 %v572_v62, %v2990_v26 }
 0x12e   : > { %v721_v1 = vmax.f32 %v571_v61, 0.0 }
 0x12f   : > { %v722_v3 = vmax.f32 %v573_v0, 0.0 }
 0x130   : > { %v748_v4 = vpack.c.bf16 %v721_v1, %v718_v60 }
 0x131   : > { %v749_v5 = vpack.c.bf16 %v722_v3, %v719_v63  ;;  %v576_v6 = vpop.f32.mrb[28].mxu0 }
 0x132   : > { %v577_v52 = vadd.f32 %v576_v6, %v2984_v24  ;;  %v578_v7 = vpop.f32.mrb[29].mxu0 }
 0x133   : > { %v579_v8 = vadd.f32 %v578_v7, %v2990_v26  ;;  %v580_v9 = vpop.f32.mrb[30].mxu0  ;;  %1146 = vmatprep.mubr.bf16.mxu1 %v749_v5 }
 0x134   : > { %1260 = vmatmul.mubr.bf16.gmra.mrb[56].mxu0 %v750_v28  ;;  %v724_v10 = vmax.f32 %v577_v52, 0.0  ;;  %v581_v11 = vadd.f32 %v580_v9, %v2984_v24  ;;  %v582_v12 = vpop.f32.mrb[31].mxu0  ;;  %1147 = vmatmul.mubr.bf16.gmra.mrb[40].mxu1 %v748_v4  ;;  %v802_v28 = vld [vmem:[%s3798_s4] sm:$0x3] }
 0x135   : > { %1269 = vmatprep.mubr.bf16.mxu0 %v2693_v2  ;;  %v725_v13 = vmax.f32 %v579_v8, 0.0  ;;  %v583_v14 = vadd.f32 %v582_v12, %v2990_v26  ;;  %v3061_v24 = vrot.slane %v802_v28, %v283_v20  ;;  %v3065_v2 = vrot.slane %v802_v28, %v287_v23 }
 0x136   : > { %v727_v15 = vmax.f32 %v581_v11, 0.0  ;;  %v1281_v26 = vand.u32 127, %v281_v18 }
 0x137   : > { %v728_v16 = vmax.f32 %v583_v14, 0.0 }
 0x138   : > { %v751_v22 = vpack.c.bf16 %v727_v15, %v724_v10  ;;  %v3070_v36 = vadd.s32 128, %v1281_v26 }
 0x139   : > { %v752_v27 = vpack.c.bf16 %v728_v16, %v725_v13 }
 0x13a   : > { %vm1290_vm0 = vcmp.eq.s32.totalorder %v3070_v36, 135  ;;  %vm1286_vm1 = vcmp.lt.s32.totalorder %v3070_v36, 132 }
 0x13b   : > { %1156 = vmatprep.mubr.bf16.mxu1 %v752_v27 }
 0x13c   : > { %1270 = vmatmul.mubr.bf16.gmra.mrb[60].mxu0 %v3031_v21  ;;  %1157 = vmatmul.mubr.bf16.gmra.mrb[44].mxu1 %v751_v22 }
 0x1d7   : > { %v1201_v29 = vpop.f32.mrb[32].mxu0  ;;  %v1088_v30 = vpop.f32.mrb[16].mxu1 }
 0x1d8   : > { %v1203_v31 = vpop.f32.mrb[33].mxu0  ;;  %v1089_v21 = vadd.f32 %v1088_v30, %v3061_v24  ;;  %v1090_v32 = vpop.f32.mrb[17].mxu1 }
 0x1d9   : > { %v1205_v25 = vpop.f32.mrb[34].mxu0  ;;  %v1091_v33 = vadd.f32 %v1090_v32, %v3065_v2  ;;  %v1092_v34 = vpop.f32.mrb[18].mxu1 }
 0x1da   : > { %v1207_v35 = vpop.f32.mrb[35].mxu0  ;;  %v1093_v20 = vadd.f32 %v1092_v34, %v3061_v24  ;;  %v1094_v19 = vpop.f32.mrb[19].mxu1  ;;  %v3073_v23 = vadd.f32 %v1201_v29, %v1089_v21 }
 0x1db   : > { %v3075_v37 = vadd.f32 %v1203_v31, %v1091_v33  ;;  %v1095_v18 = vadd.f32 %v1094_v19, %v3065_v2 }
 0x1dc   : > { %v1291_v38 = vmul.f32 %v3073_v23, %v3073_v23  ;;  %v3080_v39 = vadd.f32 %v1205_v25, %v1093_v20 }
 0x1dd   : > { %v3082_v40 = vadd.f32 %v1207_v35, %v1095_v18  ;;  %v1756_v50 = vsel %vm1290_vm0, %v3075_v37, 0.0  ;;  %v1292_v51 = vmul.f32 %v3075_v37, %v3075_v37 }
 0x1de   : > { %1323 = vadd.xlane.f32.xlu0 %v1291_v38  ;;  %v1293_v17 = vmul.f32 %v3080_v39, %v3080_v39 }
 0x1df   : > { %v1211_v41 = vpop.f32.mrb[36].mxu0  ;;  %v1098_v42 = vpop.f32.mrb[20].mxu1  ;;  %v1758_v55 = vsel %vm1290_vm0, %v3082_v40, 0.0  ;;  %v1356_v61 = vsel %vm1286_vm1, %v1292_v51, 0.0  ;;  %v1294_v63 = vmul.f32 %v3082_v40, %v3082_v40 }
 0x1e0   : > { %v1213_v43 = vpop.f32.mrb[37].mxu0  ;;  %v1099_v44 = vadd.f32 %v1098_v42, %v3061_v24  ;;  %v1100_v45 = vpop.f32.mrb[21].mxu1  ;;  %1325 = vadd.xlane.f32.xlu1 %v1293_v17 }
 0x1e1   : > { %v1215_v46 = vpop.f32.mrb[38].mxu0  ;;  %v1101_v47 = vadd.f32 %v1100_v45, %v3065_v2  ;;  %v1102_v48 = vpop.f32.mrb[22].mxu1  ;;  %v1358_v9 = vsel %vm1286_vm1, %v1294_v63, 0.0 }
 0x1e2   : > { %v1217_v49 = vpop.f32.mrb[39].mxu0  ;;  %v3095_v53 = vadd.f32 %v1211_v41, %v1099_v44  ;;  %v1103_v54 = vadd.f32 %v1102_v48, %v3061_v24  ;;  %v1104_v56 = vpop.f32.mrb[23].mxu1  ;;  %1788 = vadd.xlane.f32.xlu0 %v1756_v50 }
 0x1e3   : > { %v3098_v57 = vadd.f32 %v1213_v43, %v1101_v47  ;;  %v1105_v58 = vadd.f32 %v1104_v56, %v3065_v2 }
 0x1e4   : > { %v3104_v59 = vadd.f32 %v1215_v46, %v1103_v54  ;;  %1791 = vadd.xlane.f32.xlu1 %v1758_v55  ;;  %v1295_v27 = vmul.f32 %v3095_v53, %v3095_v53 }
 0x1e5   : > { %v3106_v60 = vadd.f32 %v1217_v49, %v1105_v58  ;;  %v1296_v62 = vmul.f32 %v3098_v57, %v3098_v57  ;;  %v1760_v19 = vsel %vm1290_vm0, %v3098_v57, 0.0 }
 0x1e6   : > { %1388 = vadd.xlane.f32.xlu0 %v1356_v61  ;;  %v1297_v14 = vmul.f32 %v3104_v59, %v3104_v59 }
 0x1e7   : > { %v1221_v0 = vpop.f32.mrb[40].mxu0  ;;  %v1108_v1 = vpop.f32.mrb[24].mxu1  ;;  %v1360_v3 = vsel %vm1286_vm1, %v1296_v62, 0.0  ;;  %v1762_v31 = vsel %vm1290_vm0, %v3106_v60, 0.0  ;;  %v1298_v21 = vmul.f32 %v3106_v60, %v3106_v60 }
 0x1e8   : > { %v1223_v4 = vpop.f32.mrb[41].mxu0  ;;  %v1109_v5 = vadd.f32 %v1108_v1, %v3061_v24  ;;  %1394 = vadd.xlane.f32.xlu1 %v1360_v3  ;;  %v1110_v6 = vpop.f32.mrb[25].mxu1 }
 0x1e9   : > { %v1225_v52 = vpop.f32.mrb[42].mxu0  ;;  %v1111_v7 = vadd.f32 %v1110_v6, %v3065_v2  ;;  %v1112_v8 = vpop.f32.mrb[26].mxu1  ;;  %v1362_v43 = vsel %vm1286_vm1, %v1298_v21, 0.0 }
 0x1ea   : > { %v1227_v10 = vpop.f32.mrb[43].mxu0  ;;  %v1113_v11 = vadd.f32 %v1112_v8, %v3061_v24  ;;  %v3121_v12 = vadd.f32 %v1221_v0, %v1109_v5  ;;  %1391 = vadd.xlane.f32.xlu0 %v1358_v9  ;;  %v1114_v13 = vpop.f32.mrb[27].mxu1 }
 0x1eb   : > { %v1115_v15 = vadd.f32 %v1114_v13, %v3065_v2  ;;  %v3126_v16 = vadd.f32 %v1223_v4, %v1111_v7 }
 0x1ec   : > { %v3128_v22 = vadd.f32 %v1225_v52, %v1113_v11  ;;  %1329 = vadd.xlane.f32.xlu1 %v1297_v14  ;;  %v1299_v45 = vmul.f32 %v3121_v12, %v3121_v12 }
 0x1ed   : > { %v3132_v28 = vadd.f32 %v1227_v10, %v1115_v15  ;;  %v1764_v58 = vsel %vm1290_vm0, %v3126_v16, 0.0  ;;  %v1300_v61 = vmul.f32 %v3126_v16, %v3126_v16 }
 0x1ee   : > { %1327 = vadd.xlane.f32.xlu0 %v1295_v27  ;;  %v1301_v47 = vmul.f32 %v3128_v22, %v3128_v22 }
 0x1ef   : > { %v1231_v26 = vpop.f32.mrb[44].mxu0  ;;  %v1118_v29 = vpop.f32.mrb[28].mxu1  ;;  %v1766_v4 = vsel %vm1290_vm0, %v3132_v28, 0.0  ;;  %v1302_v52 = vmul.f32 %v3132_v28, %v3132_v28  ;;  %v1364_v8 = vsel %vm1286_vm1, %v1300_v61, 0.0 }
 0x1f0   : > { %v1233_v30 = vpop.f32.mrb[45].mxu0  ;;  %v1119_v32 = vadd.f32 %v1118_v29, %v3061_v24  ;;  %v1120_v25 = vpop.f32.mrb[29].mxu1  ;;  %1797 = vadd.xlane.f32.xlu1 %v1762_v31 }
 0x1f1   : > { %v1235_v33 = vpop.f32.mrb[46].mxu0  ;;  %v1121_v34 = vadd.f32 %v1120_v25, %v3065_v2  ;;  %v1122_v35 = vpop.f32.mrb[30].mxu1  ;;  %v1366_v11 = vsel %vm1286_vm1, %v1302_v52, 0.0 }
 0x1f2   : > { %v1237_v20 = vpop.f32.mrb[47].mxu0  ;;  %v3144_v18 = vadd.f32 %v1231_v26, %v1119_v32  ;;  %v1123_v38 = vadd.f32 %v1122_v35, %v3061_v24  ;;  %v1124_v41 = vpop.f32.mrb[31].mxu1  ;;  %1794 = vadd.xlane.f32.xlu0 %v1760_v19 }
 0x1f3   : > { %v3147_v17 = vadd.f32 %v1233_v30, %v1121_v34  ;;  %v1125_v42 = vadd.f32 %v1124_v41, %v3065_v2 }
 0x1f4   : > { %v3152_v44 = vadd.f32 %v1235_v33, %v1123_v38  ;;  %1397 = vadd.xlane.f32.xlu1 %v1362_v43  ;;  %v1303_v26 = vmul.f32 %v3144_v18, %v3144_v18 }
 0x1f5   : > { %v3156_v46 = vadd.f32 %v1237_v20, %v1125_v42  ;;  %v1768_v41 = vsel %vm1290_vm0, %v3147_v17, 0.0  ;;  %v1304_v42 = vmul.f32 %v3147_v17, %v3147_v17 }
 0x1f6   : > { %1331 = vadd.xlane.f32.xlu0 %v1299_v45  ;;  %v1305_v34 = vmul.f32 %v3152_v44, %v3152_v44 }
 0x1f7   : > { %v1241_v48 = vpop.f32.mrb[48].mxu0  ;;  %v1128_v49 = vpop.f32.mrb[32].mxu1  ;;  %v1770_v45 = vsel %vm1290_vm0, %v3156_v46, 0.0 }
 0x1f8   : > { %v1243_v50 = vpop.f32.mrb[49].mxu0  ;;  %1333 = vadd.xlane.f32.xlu1 %v1301_v47  ;;  %v1129_v51 = vadd.f32 %v1128_v49, %v3061_v24  ;;  %v1130_v54 = vpop.f32.mrb[33].mxu1  ;;  %v1306_v47 = vmul.f32 %v3156_v46, %v3156_v46 }
 0x1f9   : > { %v1245_v56 = vpop.f32.mrb[50].mxu0  ;;  %v1131_v55 = vadd.f32 %v1130_v54, %v3065_v2  ;;  %v1132_v62 = vpop.f32.mrb[34].mxu1 }
 0x1fa   : > { %v1247_v63 = vpop.f32.mrb[51].mxu0  ;;  %1800 = vadd.xlane.f32.xlu0 %v1764_v58  ;;  %v1133_v0 = vadd.f32 %v1132_v62, %v3061_v24  ;;  %v3168_v1 = vadd.f32 %v1241_v48, %v1129_v51  ;;  %v1134_v3 = vpop.f32.mrb[35].mxu1 }
 0x1fb   : > { %v1135_v5 = vadd.f32 %v1134_v3, %v3065_v2  ;;  %v3174_v6 = vadd.f32 %v1243_v50, %v1131_v55  ;;  %v1370_v3 = vsel %vm1286_vm1, %v1306_v47, 0.0 }
 0x1fc   : > { %1803 = vadd.xlane.f32.xlu1 %v1766_v4  ;;  %v3178_v7 = vadd.f32 %v1245_v56, %v1133_v0  ;;  %v1368_v56 = vsel %vm1286_vm1, %v1304_v42, 0.0  ;;  %v1307_v52 = vmul.f32 %v3168_v1, %v3168_v1 }
 0x1fd   : > { %v3182_v9 = vadd.f32 %v1247_v63, %v1135_v5 }
 0x1fe   : > { %1400 = vadd.xlane.f32.xlu0 %v1364_v8 }
 0x1ff   : > { %v1251_v10 = vpop.f32.mrb[52].mxu0  ;;  %v1138_v13 = vpop.f32.mrb[36].mxu1  ;;  %v1774_v42 = vsel %vm1290_vm0, %v3182_v9, 0.0 }
 0x200   : > { %v1253_v14 = vpop.f32.mrb[53].mxu0  ;;  %1403 = vadd.xlane.f32.xlu1 %v1366_v11  ;;  %v1139_v15 = vadd.f32 %v1138_v13, %v3061_v24  ;;  %v1140_v27 = vpop.f32.mrb[37].mxu1  ;;  %v1309_v11 = vmul.f32 %v3178_v7, %v3178_v7 }
 0x201   : > { %v1255_v29 = vpop.f32.mrb[54].mxu0  ;;  %v1141_v30 = vadd.f32 %v1140_v27, %v3065_v2  ;;  %v1142_v31 = vpop.f32.mrb[38].mxu1 }
 0x202   : > { %v1257_v21 = vpop.f32.mrb[55].mxu0  ;;  %1335 = vadd.xlane.f32.xlu0 %v1303_v26  ;;  %v1143_v32 = vadd.f32 %v1142_v31, %v3061_v24  ;;  %v3191_v25 = vadd.f32 %v1251_v10, %v1139_v15  ;;  %v1144_v33 = vpop.f32.mrb[39].mxu1  ;;  %v1308_v31 = vmul.f32 %v3174_v6, %v3174_v6 }
 0x203   : > { %v1145_v35 = vadd.f32 %v1144_v33, %v3065_v2  ;;  %v3196_v20 = vadd.f32 %v1253_v14, %v1141_v30  ;;  %v1772_v30 = vsel %vm1290_vm0, %v3174_v6, 0.0 }
 0x204   : > { %1337 = vadd.xlane.f32.xlu1 %v1305_v34  ;;  %v3198_v19 = vadd.f32 %v1255_v29, %v1143_v32 }
 0x205   : > { %v3200_v38 = vadd.f32 %v1257_v21, %v1145_v35 }
 0x206   : > { %1806 = vadd.xlane.f32.xlu0 %v1768_v41 }
 0x207   : > { %v1261_v43 = vpop.f32.mrb[56].mxu0  ;;  %v1148_v48 = vpop.f32.mrb[40].mxu1 }
 0x208   : > { %v1263_v49 = vpop.f32.mrb[57].mxu0  ;;  %1809 = vadd.xlane.f32.xlu1 %v1770_v45  ;;  %v1149_v50 = vadd.f32 %v1148_v48, %v3061_v24  ;;  %v1150_v51 = vpop.f32.mrb[41].mxu1 }
 0x209   : > { %v1265_v54 = vpop.f32.mrb[58].mxu0  ;;  %v1151_v58 = vadd.f32 %v1150_v51, %v3065_v2  ;;  %v1152_v55 = vpop.f32.mrb[42].mxu1  ;;  %v1311_v51 = vmul.f32 %v3191_v25, %v3191_v25 }
 0x20a   : > { %v1267_v61 = vpop.f32.mrb[59].mxu0  ;;  %1406 = vadd.xlane.f32.xlu0 %v1368_v56  ;;  %v1153_v62 = vadd.f32 %v1152_v55, %v3061_v24  ;;  %v3217_v63 = vadd.f32 %v1261_v43, %v1149_v50  ;;  %v1154_v0 = vpop.f32.mrb[43].mxu1  ;;  %v1310_v43 = vmul.f32 %v3182_v9, %v3182_v9  ;;  %v1312_v56 = vmul.f32 %v3196_v20, %v3196_v20 }
 0x20b   : > { %v1155_v4 = vadd.f32 %v1154_v0, %v3065_v2  ;;  %v3222_v5 = vadd.f32 %v1263_v49, %v1151_v58  ;;  %v1778_v58 = vsel %vm1290_vm0, %v3200_v38, 0.0  ;;  %v1314_v55 = vmul.f32 %v3200_v38, %v3200_v38 }
 0x20c   : > { %1409 = vadd.xlane.f32.xlu1 %v1370_v3  ;;  %v3226_v8 = vadd.f32 %v1265_v54, %v1153_v62  ;;  %v1374_v50 = vsel %vm1286_vm1, %v1310_v43, 0.0  ;;  %v1776_v54 = vsel %vm1290_vm0, %v3196_v20, 0.0  ;;  %v1315_v0 = vmul.f32 %v3217_v63, %v3217_v63 }
 0x20d   : > { %v3228_v10 = vadd.f32 %v1267_v61, %v1155_v4  ;;  %v1376_v61 = vsel %vm1286_vm1, %v1312_v56, 0.0  ;;  %v1378_v62 = vsel %vm1286_vm1, %v1314_v55, 0.0  ;;  %v1316_v3 = vmul.f32 %v3222_v5, %v3222_v5 }
 0x20e   : > { %1339 = vadd.xlane.f32.xlu0 %v1307_v52  ;;  %v1317_v4 = vmul.f32 %v3226_v8, %v3226_v8 }
 0x20f   : > { %v1271_v13 = vpop.f32.mrb[60].mxu0  ;;  %v1158_v14 = vpop.f32.mrb[44].mxu1  ;;  %v1318_v52 = vmul.f32 %v3228_v10, %v3228_v10 }
 0x210   : > { %v1273_v15 = vpop.f32.mrb[61].mxu0  ;;  %1341 = vadd.xlane.f32.xlu1 %v1309_v11  ;;  %v1159_v27 = vadd.f32 %v1158_v14, %v3061_v24  ;;  %v1160_v26 = vpop.f32.mrb[45].mxu1  ;;  %v1380_v11 = vsel %vm1286_vm1, %v1316_v3, 0.0 }
 0x211   : > { %v1275_v29 = vpop.f32.mrb[62].mxu0  ;;  %v1161_v21 = vadd.f32 %v1160_v26, %v3065_v2  ;;  %v1162_v32 = vpop.f32.mrb[46].mxu1 }
 0x212   : > { %v1277_v33 = vpop.f32.mrb[63].mxu0  ;;  %1812 = vadd.xlane.f32.xlu0 %v1772_v30  ;;  %v1163_v34 = vadd.f32 %v1162_v32, %v3061_v24  ;;  %v3240_v35 = vadd.f32 %v1271_v13, %v1159_v27  ;;  %v1164_v41 = vpop.f32.mrb[47].mxu1  ;;  %v1372_v24 = vsel %vm1286_vm1, %v1308_v31, 0.0  ;;  %v1382_v13 = vsel %vm1286_vm1, %v1318_v52, 0.0 }
 0x213   : > { %v1165_v45 = vadd.f32 %v1164_v41, %v3065_v2  ;;  %v3248_v47 = vadd.f32 %v1273_v15, %v1161_v21  ;;  %v1313_v2 = vmul.f32 %v3198_v19, %v3198_v19  ;;  %v1780_v31 = vsel %vm1290_vm0, %v3222_v5, 0.0 }
 0x214   : > { %1815 = vadd.xlane.f32.xlu1 %v1774_v42  ;;  %v3250_v48 = vadd.f32 %v1275_v29, %v1163_v34  ;;  %v1319_v14 = vmul.f32 %v3240_v35, %v3240_v35  ;;  %v1782_v21 = vsel %vm1290_vm0, %v3228_v10, 0.0 }
 0x215   : > { %v3254_v49 = vadd.f32 %v1277_v33, %v1165_v45  ;;  %v1320_v15 = vmul.f32 %v3248_v47, %v3248_v47  ;;  %v1784_v32 = vsel %vm1290_vm0, %v3248_v47, 0.0 }
 0x216   : > { %1412 = vadd.xlane.f32.xlu0 %v1372_v24  ;;  %v1321_v27 = vmul.f32 %v3250_v48, %v3250_v48 }
 0x217   : > { %v1322_v26 = vmul.f32 %v3254_v49, %v3254_v49  ;;  %v1384_v29 = vsel %vm1286_vm1, %v1320_v15, 0.0  ;;  %v1786_v33 = vsel %vm1290_vm0, %v3254_v49, 0.0 }
 0x218   : > { %1415 = vadd.xlane.f32.xlu1 %v1374_v50 }
 0x219   : > { %v1386_v30 = vsel %vm1286_vm1, %v1322_v26, 0.0 }
 0x21a   : > { %1343 = vadd.xlane.f32.xlu0 %v1311_v51 }
 0x21c   : > { %1345 = vadd.xlane.f32.xlu1 %v1313_v2 }
 0x21e   : > { %1818 = vadd.xlane.f32.xlu0 %v1776_v54 }
 0x220   : > { %1821 = vadd.xlane.f32.xlu1 %v1778_v58 }
 0x222   : > { %1418 = vadd.xlane.f32.xlu0 %v1376_v61 }
 0x224   : > { %1421 = vadd.xlane.f32.xlu1 %v1378_v62 }
 0x226   : > { %1347 = vadd.xlane.f32.xlu0 %v1315_v0 }
 0x228   : > { %1349 = vadd.xlane.f32.xlu1 %v1317_v4 }
 0x22a   : > { %1424 = vadd.xlane.f32.xlu0 %v1380_v11 }
 0x22c   : > { %1427 = vadd.xlane.f32.xlu1 %v1382_v13 }
 0x22e   : > { %1351 = vadd.xlane.f32.xlu0 %v1319_v14 }
 0x230   : > { %1353 = vadd.xlane.f32.xlu1 %v1321_v27 }
 0x232   : > { %1430 = vadd.xlane.f32.xlu0 %v1384_v29 }
 0x234   : > { %1433 = vadd.xlane.f32.xlu1 %v1386_v30 }
 0x236   : > { %1824 = vadd.xlane.f32.xlu0 %v1780_v31 }
 0x238   : > { %1827 = vadd.xlane.f32.xlu1 %v1782_v21 }
 0x23a   : > { %1830 = vadd.xlane.f32.xlu0 %v1784_v32 }
 0x23c   : > { %1833 = vadd.xlane.f32.xlu1 %v1786_v33 }
 0x26b   : > { %v1324_v34 = vpop.xlane.xlu0 %1323 }
 0x26c   : > { %2493 = vrsqrt.f32 %v1324_v34  ;;  %vm1437_vm2 = vcmp.eq.f32.partialorder %v1324_v34, inf  ;;  %v1440_v55 = vand.u32 2147483648, %v1324_v34  ;;  %vm1439_vm3 = vcmp.eq.f32.partialorder %v1324_v34, 0.0 }
 0x26d   : > { %v1326_v41 = vpop.xlane.xlu1 %1325 }
 0x26e   : > { %2495 = vrsqrt.f32 %v1326_v41  ;;  %vm1444_vm4 = vcmp.eq.f32.partialorder %v1326_v41, inf  ;;  %v1447_v4 = vand.u32 2147483648, %v1326_v41  ;;  %vm1446_vm5 = vcmp.eq.f32.partialorder %v1326_v41, 0.0 }
 0x26f   : > { %v1789_v42 = vpop.xlane.xlu0 %1788 }
 0x270   : > { %v2241_v43 = vmul.f32 -1.442695, %v1789_v42 }
 0x271   : > { %v1792_v45 = vpop.xlane.xlu1 %1791 }
 0x272   : > { %2497 = vpow2.f32 %v2241_v43  ;;  %v2242_v50 = vmul.f32 -1.442695, %v1792_v45 }
 0x273   : > { %v1389_v24 = vpop.xlane.xlu0 %1388 }
 0x274   : > { %2499 = vrsqrt.f32 %v1389_v24  ;;  %vm1597_vm6 = vcmp.eq.f32.partialorder %v1389_v24, inf  ;;  %vm1599_vm7 = vcmp.eq.f32.partialorder %v1389_v24, 0.0  ;;  %v1600_v21 = vand.u32 2147483648, %v1389_v24 }
 0x275   : > { %v3312_v51 = vpop.xlane.xlu1 %1394 }
 0x276   : > { %v2494_v2 = vpop.eup %2493  ;;  %2501 = vrsqrt.f32 %v3312_v51  ;;  %vm1611_vm8 = vcmp.eq.f32.partialorder %v3312_v51, inf  ;;  %vm1613_vm9 = vcmp.eq.f32.partialorder %v3312_v51, 0.0 }
 0x277   : > { %v1436_v54 = vmul.f32 %v2494_v2, %v1324_v34  ;;  %v3315_v56 = vpop.xlane.xlu0 %1391 }
 0x278   : > { %v2496_v58 = vpop.eup %2495  ;;  %2503 = vrsqrt.f32 %v3315_v56  ;;  %vm1604_vm10 = vcmp.eq.f32.partialorder %v3315_v56, inf  ;;  %vm1606_vm11 = vcmp.eq.f32.partialorder %v3315_v56, 0.0  ;;  %v1607_v45 = vand.u32 2147483648, %v3315_v56 }
 0x279   : > { %v1438_v61 = vsel %vm1437_vm2, %v1324_v34, %v1436_v54  ;;  %v1443_v62 = vmul.f32 %v2496_v58, %v1326_v41  ;;  %2505 = vpow2.f32 %v2242_v50  ;;  %v3318_v0 = vpop.xlane.xlu1 %1329 }
 0x27a   : > { %v1441_v3 = vsel %vm1439_vm3, %v1440_v55, %v1438_v61  ;;  %2507 = vrsqrt.f32 %v3318_v0  ;;  %vm1458_vm12 = vcmp.eq.f32.partialorder %v3318_v0, inf  ;;  %vm1460_vm13 = vcmp.eq.f32.partialorder %v3318_v0, 0.0 }
 0x27b   : > { %v1547_v52 = vmax.f32 %v1441_v3, 1e-12  ;;  %v1445_v11 = vsel %vm1444_vm4, %v1326_v41, %v1443_v62  ;;  %v3321_v13 = vpop.xlane.xlu0 %1327  ;;  %v1614_v41 = vand.u32 2147483648, %v3312_v51 }
 0x27c   : > { %v2498_v14 = vpop.eup %2497  ;;  %v1448_v15 = vsel %vm1446_vm5, %v1447_v4, %v1445_v11  ;;  %2509 = vrsqrt.f32 %v3321_v13  ;;  %vm1451_vm14 = vcmp.eq.f32.partialorder %v3321_v13, inf  ;;  %vm1453_vm15 = vcmp.eq.f32.partialorder %v3321_v13, 0.0 }
 0x27d   : > { %2511 = vrcp.f32 %v1547_v52  ;;  %v1548_v27 = vmax.f32 %v1448_v15, 1e-12  ;;  %v1883_v26 = vadd.f32 1.0, %v2498_v14  ;;  %v1798_v29 = vpop.xlane.xlu1 %1797  ;;  %v1461_v14 = vand.u32 2147483648, %v3318_v0 }
 0x27e   : > { %v2244_v30 = vmul.f32 -1.442695, %v1798_v29  ;;  %v2500_v31 = vpop.eup %2499 }
 0x27f   : > { %2513 = vrcp.f32 %v1548_v27  ;;  %v1795_v32 = vpop.xlane.xlu0 %1794  ;;  %v1596_v34 = vmul.f32 %v2500_v31, %v1389_v24 }
 0x280   : > { %v2502_v33 = vpop.eup %2501  ;;  %v2243_v42 = vmul.f32 -1.442695, %v1795_v32  ;;  %2515 = vrcp.f32 %v1883_v26 }
 0x281   : > { %v1610_v43 = vmul.f32 %v2502_v33, %v3312_v51  ;;  %v3331_v50 = vpop.xlane.xlu1 %1397  ;;  %v1598_v54 = vsel %vm1597_vm6, %v1389_v24, %v1596_v34  ;;  %2517 = vpow2.f32 %v2244_v30 }
 0x282   : > { %v2504_v2 = vpop.eup %2503  ;;  %v1601_v55 = vsel %vm1599_vm7, %v1600_v21, %v1598_v54  ;;  %2519 = vpow2.f32 %v2243_v42  ;;  %v1454_v42 = vand.u32 2147483648, %v3321_v13  ;;  %vm1618_vm2 = vcmp.eq.f32.partialorder %v3331_v50, inf }
 0x283   : > { %v2506_v58 = vpop.eup %2505  ;;  %v1612_v61 = vsel %vm1611_vm8, %v3312_v51, %v1610_v43  ;;  %v1603_v62 = vmul.f32 %v2504_v2, %v3315_v56  ;;  %v3341_v3 = vpop.xlane.xlu0 %1331  ;;  %v1707_v52 = vmax.f32 %v1601_v55, 1e-12  ;;  %2521 = vrsqrt.f32 %v3331_v50 }
 0x284   : > { %v2508_v4 = vpop.eup %2507  ;;  %v1615_v11 = vsel %vm1613_vm9, %v1614_v41, %v1612_v61  ;;  %2523 = vrsqrt.f32 %v3341_v3  ;;  %v1884_v30 = vadd.f32 1.0, %v2506_v58  ;;  %vm1620_vm3 = vcmp.eq.f32.partialorder %v3331_v50, 0.0 }
 0x285   : > { %v1709_v24 = vmax.f32 %v1615_v11, 1e-12  ;;  %v1605_v15 = vsel %vm1604_vm10, %v3315_v56, %v1603_v62  ;;  %v1457_v27 = vmul.f32 %v2508_v4, %v3318_v0  ;;  %v3353_v26 = vpop.xlane.xlu1 %1333  ;;  %2525 = vrcp.f32 %v1707_v52 }
 0x286   : > { %v2510_v29 = vpop.eup %2509  ;;  %v1608_v51 = vsel %vm1606_vm11, %v1607_v45, %v1605_v15  ;;  %vm1465_vm4 = vcmp.eq.f32.partialorder %v3341_v3, inf  ;;  %vm1467_vm5 = vcmp.eq.f32.partialorder %v3341_v3, 0.0  ;;  %vm1472_vm6 = vcmp.eq.f32.partialorder %v3353_v26, inf }
 0x287   : > { %v2512_v31 = vpop.eup %2511  ;;  %2527 = vrcp.f32 %v1709_v24  ;;  %v1708_v21 = vmax.f32 %v1608_v51, 1e-12  ;;  %v1459_v32 = vsel %vm1458_vm12, %v3318_v0, %v1457_v27  ;;  %v1450_v33 = vmul.f32 %v2510_v29, %v3321_v13  ;;  %v1801_v34 = vpop.xlane.xlu0 %1800 }
 0x288   : > { %v1997_v56 = vmul.f32 %v2512_v31, %v3073_v23  ;;  %v1462_v41 = vsel %vm1460_vm13, %v1461_v14, %v1459_v32  ;;  %2529 = vrsqrt.f32 %v3353_v26  ;;  %v2245_v61 = vmul.f32 -1.442695, %v1801_v34 }
 0x289   : > { %v2514_v43 = vpop.eup %2513  ;;  %2531 = vrcp.f32 %v1708_v21  ;;  %v1550_v45 = vmax.f32 %v1462_v41, 1e-12  ;;  %v1452_v2 = vsel %vm1451_vm14, %v3321_v13, %v1450_v33  ;;  %v1804_v54 = vpop.xlane.xlu1 %1803  ;;  %vm1474_vm7 = vcmp.eq.f32.partialorder %v3353_v26, 0.0 }
 0x28a   : > { %2061 = vst [vmem:[%s3361_s8] sm:$0xff] %v1997_v56  ;;  %v1999_v58 = vmul.f32 %v2514_v43, %v3080_v39  ;;  %2533 = vrcp.f32 %v1884_v30  ;;  %v1455_v23 = vsel %vm1453_vm15, %v1454_v42, %v1452_v2  ;;  %v2516_v0 = vpop.eup %2515  ;;  %v1621_v39 = vand.u32 2147483648, %v3331_v50 }
 0x28b   : > { %2535 = vrcp.f32 %v1550_v45  ;;  %v1549_v55 = vmax.f32 %v1455_v23, 1e-12  ;;  %v3376_v62 = vpop.xlane.xlu0 %1400  ;;  %v2518_v4 = vpop.eup %2517  ;;  %v2246_v13 = vmul.f32 -1.442695, %v1804_v54  ;;  %v1468_v30 = vand.u32 2147483648, %v3341_v3 }
 0x28c   : > { %2063 = vst [vmem:[%s3361_s8 + $0x10] sm:$0xff] %v1999_v58  ;;  %2537 = vrsqrt.f32 %v3376_v62  ;;  %v2520_v52 = vpop.eup %2519  ;;  %v1886_v27 = vadd.f32 1.0, %v2518_v4  ;;  %v1475_v32 = vand.u32 2147483648, %v3353_v26  ;;  %vm1625_vm8 = vcmp.eq.f32.partialorder %v3376_v62, inf }
 0x28d   : > { %2539 = vrcp.f32 %v1549_v55  ;;  %v3383_v11 = vpop.xlane.xlu1 %1403  ;;  %v2522_v14 = vpop.eup %2521  ;;  %v1885_v24 = vadd.f32 1.0, %v2520_v52  ;;  %vm1627_vm9 = vcmp.eq.f32.partialorder %v3376_v62, 0.0 }
 0x28e   : > { %2541 = vpow2.f32 %v2245_v61  ;;  %v2524_v15 = vpop.eup %2523  ;;  %v1617_v29 = vmul.f32 %v2522_v14, %v3331_v50  ;;  %vm1632_vm10 = vcmp.eq.f32.partialorder %v3383_v11, inf  ;;  %vm1634_vm11 = vcmp.eq.f32.partialorder %v3383_v11, 0.0 }
 0x28f   : > { %v3390_v51 = vpop.xlane.xlu0 %1335  ;;  %v2526_v31 = vpop.eup %2525  ;;  %2543 = vrcp.f32 %v1885_v24  ;;  %v1464_v21 = vmul.f32 %v2524_v15, %v3341_v3 }
 0x290   : > { %v1934_v34 = vsel %vm1286_vm1, %v2526_v31, 1.0  ;;  %v1619_v56 = vsel %vm1618_vm2, %v3331_v50, %v1617_v29  ;;  %2545 = vpow2.f32 %v2246_v13  ;;  %v1628_v29 = vand.u32 2147483648, %v3376_v62 }
 0x291   : > { %v2528_v33 = vpop.eup %2527  ;;  %v3401_v41 = vpop.xlane.xlu1 %1337  ;;  %v1998_v43 = vmul.f32 %v1934_v34, %v3075_v37  ;;  %v1622_v45 = vsel %vm1620_vm3, %v1621_v39, %v1619_v56  ;;  %v1466_v2 = vsel %vm1465_vm4, %v3341_v3, %v1464_v21  ;;  %2547 = vrcp.f32 %v1886_v27 }
 0x292   : > { %v2530_v42 = vpop.eup %2529  ;;  %v1710_v58 = vmax.f32 %v1622_v45, 1e-12  ;;  %v1469_v23 = vsel %vm1467_vm5, %v1468_v30, %v1466_v2  ;;  %2549 = vrsqrt.f32 %v3383_v11  ;;  %v1938_v13 = vsel %vm1286_vm1, %v2528_v33, 1.0 }
 0x293   : > { %v2532_v54 = vpop.eup %2531  ;;  %v1471_v55 = vmul.f32 %v2530_v42, %v3353_v26  ;;  %v1807_v61 = vpop.xlane.xlu0 %1806  ;;  %v2030_v50 = vsel %vm1290_vm0, %v2516_v0, %v1998_v43  ;;  %v1551_v52 = vmax.f32 %v1469_v23, 1e-12  ;;  %vm1479_vm12 = vcmp.eq.f32.partialorder %v3390_v51, inf }
 0x294   : > { %v2534_v37 = vpop.eup %2533  ;;  %v1936_v4 = vsel %vm1286_vm1, %v2532_v54, 1.0  ;;  %2062 = vst [vmem:[%s3361_s8 + $0x8] sm:$0xff] %v2030_v50  ;;  %2551 = vrcp.f32 %v1710_v58  ;;  %vm1481_vm13 = vcmp.eq.f32.partialorder %v3390_v51, 0.0  ;;  %vm1486_vm14 = vcmp.eq.f32.partialorder %v3401_v41, inf }
 0x295   : > { %v2536_v39 = vpop.eup %2535  ;;  %v2000_v3 = vmul.f32 %v1936_v4, %v3082_v40  ;;  %v1473_v14 = vsel %vm1472_vm6, %v3353_v26, %v1471_v55  ;;  %v1810_v0 = vpop.xlane.xlu1 %1809  ;;  %2553 = vrcp.f32 %v1551_v52  ;;  %v1482_v4 = vand.u32 2147483648, %v3390_v51 }
 0x296   : > { %v2538_v24 = vpop.eup %2537  ;;  %v2003_v15 = vmul.f32 %v2536_v39, %v3104_v59  ;;  %v1476_v27 = vsel %vm1474_vm7, %v1475_v32, %v1473_v14  ;;  %2555 = vrsqrt.f32 %v3390_v51  ;;  %v2002_v59 = vmul.f32 %v1938_v13, %v3098_v57 }
 0x297   : > { %v2540_v30 = vpop.eup %2539  ;;  %v2032_v40 = vsel %vm1290_vm0, %v2534_v37, %v2000_v3  ;;  %v1552_v31 = vmax.f32 %v1476_v27, 1e-12  ;;  %v1624_v21 = vmul.f32 %v2538_v24, %v3376_v62  ;;  %v3433_v33 = vpop.xlane.xlu0 %1406  ;;  %2557 = vrsqrt.f32 %v3401_v41 }
 0x298   : > { %v2542_v34 = vpop.eup %2541  ;;  %2064 = vst [vmem:[%s3361_s8 + $0x18] sm:$0xff] %v2032_v40  ;;  %2067 = vst [vmem:[%s3361_s8 + $0x30] sm:$0xff] %v2003_v15  ;;  %v2001_v26 = vmul.f32 %v2540_v30, %v3095_v53  ;;  %v2247_v32 = vmul.f32 -1.442695, %v1807_v61  ;;  %v2248_v43 = vmul.f32 -1.442695, %v1810_v0 }
 0x299   : > { %2559 = vrcp.f32 %v1552_v31  ;;  %v1887_v56 = vadd.f32 1.0, %v2542_v34  ;;  %v1626_v42 = vsel %vm1625_vm8, %v3376_v62, %v1624_v21  ;;  %v3443_v45 = vpop.xlane.xlu1 %1409  ;;  %v2544_v2 = vpop.eup %2543  ;;  %v1635_v62 = vand.u32 2147483648, %v3383_v11 }
 0x29a   : > { %2065 = vst [vmem:[%s3361_s8 + $0x20] sm:$0xff] %v2001_v26  ;;  %v1629_v57 = vsel %vm1627_vm9, %v1628_v29, %v1626_v42  ;;  %2561 = vpow2.f32 %v2247_v32  ;;  %v2546_v53 = vpop.eup %2545  ;;  %v2034_v54 = vsel %vm1290_vm0, %v2544_v2, %v2002_v59  ;;  %vm1488_vm15 = vcmp.eq.f32.partialorder %v3401_v41, 0.0 }
 0x29b   : > { %2563 = vrcp.f32 %v1887_v56  ;;  %v1711_v58 = vmax.f32 %v1629_v57, 1e-12  ;;  %v3450_v23 = vpop.xlane.xlu0 %1339  ;;  %2066 = vst [vmem:[%s3361_s8 + $0x28] sm:$0xff] %v2034_v54  ;;  %v1888_v55 = vadd.f32 1.0, %v2546_v53  ;;  %v2548_v61 = vpop.eup %2547  ;;  %v1489_v13 = vand.u32 2147483648, %v3401_v41 }
 0x29c   : > { %2565 = vpow2.f32 %v2248_v43  ;;  %v2550_v50 = vpop.eup %2549  ;;  %v1642_v24 = vand.u32 2147483648, %v3433_v33  ;;  %vm1639_vm2 = vcmp.eq.f32.partialorder %v3433_v33, inf  ;;  %vm1641_vm3 = vcmp.eq.f32.partialorder %v3433_v33, 0.0 }
 0x29d   : > { %2567 = vrcp.f32 %v1711_v58  ;;  %v3457_v37 = vpop.xlane.xlu1 %1341  ;;  %v1631_v39 = vmul.f32 %v2550_v50, %v3383_v11  ;;  %vm1646_vm4 = vcmp.eq.f32.partialorder %v3443_v45, inf  ;;  %vm1648_vm5 = vcmp.eq.f32.partialorder %v3443_v45, 0.0 }
 0x29e   : > { %2569 = vrcp.f32 %v1888_v55  ;;  %v2552_v52 = vpop.eup %2551  ;;  %vm1493_vm6 = vcmp.eq.f32.partialorder %v3450_v23, inf  ;;  %vm1495_vm7 = vcmp.eq.f32.partialorder %v3450_v23, 0.0  ;;  %vm1500_vm8 = vcmp.eq.f32.partialorder %v3457_v37, inf }
 0x29f   : > { %2571 = vrsqrt.f32 %v3433_v33  ;;  %v1813_v3 = vpop.xlane.xlu0 %1812  ;;  %v2554_v14 = vpop.eup %2553  ;;  %v1940_v0 = vsel %vm1286_vm1, %v2552_v52, 1.0  ;;  %v1633_v40 = vsel %vm1632_vm10, %v3383_v11, %v1631_v39  ;;  %v1649_v52 = vand.u32 2147483648, %v3443_v45 }
 0x2a0   : > { %2573 = vrsqrt.f32 %v3443_v45  ;;  %v2249_v15 = vmul.f32 -1.442695, %v1813_v3  ;;  %v2556_v27 = vpop.eup %2555  ;;  %v2004_v29 = vmul.f32 %v1940_v0, %v3106_v60  ;;  %v2005_v30 = vmul.f32 %v2554_v14, %v3121_v12 }
 0x2a1   : > { %2575 = vrsqrt.f32 %v3450_v23  ;;  %v1816_v31 = vpop.xlane.xlu1 %1815  ;;  %v2558_v21 = vpop.eup %2557  ;;  %v1636_v34 = vsel %vm1634_vm11, %v1635_v62, %v1633_v40  ;;  %v1478_v59 = vmul.f32 %v2556_v27, %v3390_v51  ;;  %v1496_v0 = vand.u32 2147483648, %v3450_v23 }
 0x2a2   : > { %2577 = vrsqrt.f32 %v3457_v37  ;;  %v2250_v26 = vmul.f32 -1.442695, %v1816_v31  ;;  %v2036_v12 = vsel %vm1290_vm0, %v2548_v61, %v2004_v29  ;;  %2069 = vst [vmem:[%s3361_s8 + $0x40] sm:$0xff] %v2005_v30  ;;  %v1712_v32 = vmax.f32 %v1636_v34, 1e-12 }
 0x2a3   : > { %v2560_v60 = vpop.eup %2559  ;;  %v1485_v56 = vmul.f32 %v2558_v21, %v3401_v41  ;;  %2579 = vpow2.f32 %v2249_v15  ;;  %v3485_v42 = vpop.xlane.xlu0 %1412  ;;  %2068 = vst [vmem:[%s3361_s8 + $0x38] sm:$0xff] %v2036_v12  ;;  %v1480_v2 = vsel %vm1479_vm12, %v3390_v51, %v1478_v59  ;;  %vm1502_vm9 = vcmp.eq.f32.partialorder %v3457_v37, 0.0 }
 0x2a4   : > { %v2562_v11 = vpop.eup %2561  ;;  %v2007_v43 = vmul.f32 %v2560_v60, %v3128_v22  ;;  %2581 = vpow2.f32 %v2250_v26  ;;  %v1483_v53 = vsel %vm1481_vm13, %v1482_v4, %v1480_v2  ;;  %v1503_v30 = vand.u32 2147483648, %v3457_v37 }
 0x2a5   : > { %v2564_v57 = vpop.eup %2563  ;;  %2583 = vrcp.f32 %v1712_v32  ;;  %v1487_v54 = vsel %vm1486_vm14, %v3401_v41, %v1485_v56  ;;  %v1889_v58 = vadd.f32 1.0, %v2562_v11  ;;  %v3499_v22 = vpop.xlane.xlu1 %1415  ;;  %v1553_v61 = vmax.f32 %v1483_v53, 1e-12 }
 0x2a6   : > { %v2566_v55 = vpop.eup %2565  ;;  %2071 = vst [vmem:[%s3361_s8 + $0x50] sm:$0xff] %v2007_v43  ;;  %v1490_v62 = vsel %vm1488_vm15, %v1489_v13, %v1487_v54  ;;  %2585 = vrsqrt.f32 %v3485_v42  ;;  %vm1653_vm10 = vcmp.eq.f32.partialorder %v3485_v42, inf  ;;  %vm1655_vm11 = vcmp.eq.f32.partialorder %v3485_v42, 0.0 }
 0x2a7   : > { %v2568_v50 = vpop.eup %2567  ;;  %v1554_v51 = vmax.f32 %v1490_v62, 1e-12  ;;  %2587 = vrcp.f32 %v1889_v58  ;;  %v1890_v4 = vadd.f32 1.0, %v2566_v55  ;;  %v3507_v39 = vpop.xlane.xlu0 %1343  ;;  %vm1660_vm12 = vcmp.eq.f32.partialorder %v3499_v22, inf }
 0x2a8   : > { %v3509_v3 = vpop.eup %2569  ;;  %v1942_v14 = vsel %vm1286_vm1, %v2568_v50, 1.0  ;;  %2589 = vrcp.f32 %v1553_v61  ;;  %vm1662_vm13 = vcmp.eq.f32.partialorder %v3499_v22, 0.0  ;;  %vm1507_vm14 = vcmp.eq.f32.partialorder %v3507_v39, inf }
 0x2a9   : > { %v2572_v41 = vpop.eup %2571  ;;  %v2006_v13 = vmul.f32 %v1942_v14, %v3126_v16  ;;  %2591 = vrcp.f32 %v1554_v51  ;;  %v3518_v15 = vpop.xlane.xlu1 %1345  ;;  %vm1509_vm15 = vcmp.eq.f32.partialorder %v3507_v39, 0.0 }
 0x2aa   : > { %v2574_v27 = vpop.eup %2573  ;;  %2593 = vrcp.f32 %v1890_v4  ;;  %v1638_v29 = vmul.f32 %v2572_v41, %v3433_v33 }
 0x2ab   : > { %v2576_v40 = vpop.eup %2575  ;;  %v2038_v16 = vsel %vm1290_vm0, %v2564_v57, %v2006_v13  ;;  %v1645_v31 = vmul.f32 %v2574_v27, %v3443_v45  ;;  %2595 = vrsqrt.f32 %v3499_v22  ;;  %v1819_v21 = vpop.xlane.xlu0 %1818  ;;  %v1656_v27 = vand.u32 2147483648, %v3485_v42 }
 0x2ac   : > { %v2578_v34 = vpop.eup %2577  ;;  %2070 = vst [vmem:[%s3361_s8 + $0x48] sm:$0xff] %v2038_v16  ;;  %v1640_v59 = vsel %vm1639_vm2, %v3433_v33, %v1638_v29  ;;  %v1492_v26 = vmul.f32 %v2576_v40, %v3450_v23  ;;  %2597 = vrsqrt.f32 %v3507_v39  ;;  %vm1514_vm2 = vcmp.eq.f32.partialorder %v3518_v15, inf }
 0x2ad   : > { %v2580_v60 = vpop.eup %2579  ;;  %v1643_v12 = vsel %vm1641_vm3, %v1642_v24, %v1640_v59  ;;  %v1647_v32 = vsel %vm1646_vm4, %v3443_v45, %v1645_v31  ;;  %v1499_v56 = vmul.f32 %v2578_v34, %v3457_v37  ;;  %2599 = vrsqrt.f32 %v3518_v15  ;;  %v1822_v11 = vpop.xlane.xlu1 %1821 }
 0x2ae   : > { %v2582_v43 = vpop.eup %2581  ;;  %v1713_v2 = vmax.f32 %v1643_v12, 1e-12  ;;  %v1650_v57 = vsel %vm1648_vm5, %v1649_v52, %v1647_v32  ;;  %v1494_v53 = vsel %vm1493_vm6, %v3450_v23, %v1492_v26  ;;  %v1891_v33 = vadd.f32 1.0, %v2580_v60 }
 0x2af   : > { %v2584_v24 = vpop.eup %2583  ;;  %v1714_v54 = vmax.f32 %v1650_v57, 1e-12  ;;  %v1497_v58 = vsel %vm1495_vm7, %v1496_v0, %v1494_v53  ;;  %v1501_v55 = vsel %vm1500_vm8, %v3457_v37, %v1499_v56  ;;  %v1892_v61 = vadd.f32 1.0, %v2582_v43  ;;  %v3554_v62 = vpop.xlane.xlu0 %1418 }
 0x2b0   : > { %v2586_v50 = vpop.eup %2585  ;;  %v1944_v45 = vsel %vm1286_vm1, %v2584_v24, 1.0  ;;  %2601 = vrcp.f32 %v1713_v2  ;;  %v1555_v51 = vmax.f32 %v1497_v58, 1e-12  ;;  %v1504_v4 = vsel %vm1502_vm9, %v1503_v30, %v1501_v55 }
 0x2b1   : > { %v3560_v52 = vpop.eup %2587  ;;  %v2008_v23 = vmul.f32 %v1944_v45, %v3132_v28  ;;  %2603 = vrcp.f32 %v1714_v54  ;;  %v1556_v14 = vmax.f32 %v1504_v4, 1e-12  ;;  %v1652_v41 = vmul.f32 %v2586_v50, %v3485_v42  ;;  %v3564_v13 = vpop.xlane.xlu1 %1421 }
 0x2b2   : > { %v2590_v0 = vpop.eup %2589  ;;  %2605 = vrcp.f32 %v1555_v51  ;;  %v2251_v37 = vmul.f32 -1.442695, %v1819_v21  ;;  %v2252_v59 = vmul.f32 -1.442695, %v1822_v11  ;;  %v1663_v26 = vand.u32 2147483648, %v3499_v22 }
 0x2b3   : > { %v2592_v29 = vpop.eup %2591  ;;  %v2040_v28 = vsel %vm1290_vm0, %v3509_v3, %v2008_v23  ;;  %v2009_v30 = vmul.f32 %v2590_v0, %v3144_v18  ;;  %2607 = vrcp.f32 %v1556_v14  ;;  %v1654_v40 = vsel %vm1653_vm10, %v3485_v42, %v1652_v41  ;;  %v3575_v16 = vpop.xlane.xlu0 %1347 }
 0x2b4   : > { %v2594_v31 = vpop.eup %2593  ;;  %2072 = vst [vmem:[%s3361_s8 + $0x58] sm:$0xff] %v2040_v28  ;;  %v2011_v34 = vmul.f32 %v2592_v29, %v3152_v44  ;;  %2609 = vrcp.f32 %v1891_v33  ;;  %v1657_v21 = vsel %vm1655_vm11, %v1656_v27, %v1654_v40  ;;  %v1510_v56 = vand.u32 2147483648, %v3507_v39 }
 0x2b5   : > { %v2596_v3 = vpop.eup %2595  ;;  %2073 = vst [vmem:[%s3361_s8 + $0x60] sm:$0xff] %v2009_v30  ;;  %2611 = vrcp.f32 %v1892_v61  ;;  %v1715_v18 = vmax.f32 %v1657_v21, 1e-12  ;;  %v3584_v60 = vpop.xlane.xlu1 %1349  ;;  %vm1516_vm3 = vcmp.eq.f32.partialorder %v3518_v15, 0.0  ;;  %v1517_v33 = vand.u32 2147483648, %v3518_v15 }
 0x2b6   : > { %v2598_v12 = vpop.eup %2597  ;;  %2075 = vst [vmem:[%s3361_s8 + $0x70] sm:$0xff] %v2011_v34  ;;  %v1659_v32 = vmul.f32 %v2596_v3, %v3499_v22  ;;  %2613 = vpow2.f32 %v2251_v37  ;;  %vm1667_vm4 = vcmp.eq.f32.partialorder %v3554_v62, inf  ;;  %vm1669_vm5 = vcmp.eq.f32.partialorder %v3554_v62, 0.0 }
 0x2b7   : > { %v2600_v44 = vpop.eup %2599  ;;  %2615 = vrcp.f32 %v1715_v18  ;;  %v1506_v42 = vmul.f32 %v2598_v12, %v3507_v39  ;;  %v3593_v11 = vpop.xlane.xlu0 %1424  ;;  %vm1674_vm6 = vcmp.eq.f32.partialorder %v3564_v13, inf  ;;  %vm1676_vm7 = vcmp.eq.f32.partialorder %v3564_v13, 0.0 }
 0x2b8   : > { %v1661_v43 = vsel %vm1660_vm12, %v3499_v22, %v1659_v32  ;;  %v1513_v2 = vmul.f32 %v2600_v44, %v3518_v15  ;;  %2617 = vpow2.f32 %v2252_v59  ;;  %v1677_v34 = vand.u32 2147483648, %v3564_v13 }
 0x2b9   : > { %v1664_v57 = vsel %vm1662_vm13, %v1663_v26, %v1661_v43  ;;  %v1508_v53 = vsel %vm1507_vm14, %v3507_v39, %v1506_v42  ;;  %2619 = vrsqrt.f32 %v3554_v62  ;;  %v3609_v61 = vpop.xlane.xlu1 %1427  ;;  %vm1521_vm8 = vcmp.eq.f32.partialorder %v3575_v16, inf }
 0x2ba   : > { %v2602_v24 = vpop.eup %2601  ;;  %v1716_v54 = vmax.f32 %v1664_v57, 1e-12  ;;  %v1511_v58 = vsel %vm1509_vm15, %v1510_v56, %v1508_v53  ;;  %v1515_v55 = vsel %vm1514_vm2, %v3518_v15, %v1513_v2  ;;  %2621 = vrsqrt.f32 %v3564_v13 }
 0x2bb   : > { %v2604_v50 = vpop.eup %2603  ;;  %v1946_v22 = vsel %vm1286_vm1, %v2602_v24, 1.0  ;;  %v1557_v45 = vmax.f32 %v1511_v58, 1e-12  ;;  %v1518_v51 = vsel %vm1516_vm3, %v1517_v33, %v1515_v55  ;;  %2623 = vrsqrt.f32 %v3575_v16  ;;  %v3619_v27 = vpop.xlane.xlu0 %1351 }
 0x2bc   : > { %v2606_v4 = vpop.eup %2605  ;;  %v2010_v23 = vmul.f32 %v1946_v22, %v3147_v17  ;;  %v1948_v39 = vsel %vm1286_vm1, %v2604_v50, 1.0  ;;  %2625 = vrcp.f32 %v1716_v54  ;;  %v1558_v15 = vmax.f32 %v1518_v51, 1e-12 }
 0x2bd   : > { %v2608_v14 = vpop.eup %2607  ;;  %v2012_v41 = vmul.f32 %v1948_v39, %v3156_v46  ;;  %v2013_v0 = vmul.f32 %v2606_v4, %v3168_v1  ;;  %2627 = vrcp.f32 %v1557_v45  ;;  %v3636_v1 = vpop.xlane.xlu1 %1353  ;;  %vm1523_vm9 = vcmp.eq.f32.partialorder %v3575_v16, 0.0 }
 0x2be   : > { %v2610_v37 = vpop.eup %2609  ;;  %v2042_v17 = vsel %vm1290_vm0, %v3560_v52, %v2010_v23  ;;  %v2015_v29 = vmul.f32 %v2608_v14, %v3178_v7  ;;  %2629 = vrcp.f32 %v1558_v15  ;;  %v1670_v52 = vand.u32 2147483648, %v3554_v62 }
 0x2bf   : > { %v3625_v28 = vpop.eup %2611  ;;  %2074 = vst [vmem:[%s3361_s8 + $0x68] sm:$0xff] %v2042_v17  ;;  %v2044_v30 = vsel %vm1290_vm0, %v2594_v31, %v2012_v41  ;;  %2077 = vst [vmem:[%s3361_s8 + $0x80] sm:$0xff] %v2013_v0  ;;  %2631 = vrsqrt.f32 %v3584_v60  ;;  %v3650_v18 = vpop.xlane.xlu0 %1430  ;;  %v1524_v32 = vand.u32 2147483648, %v3575_v16  ;;  %vm1528_vm10 = vcmp.eq.f32.partialorder %v3584_v60, inf }
 0x2c0   : > { %v2614_v46 = vpop.eup %2613  ;;  %2076 = vst [vmem:[%s3361_s8 + $0x78] sm:$0xff] %v2044_v30  ;;  %2079 = vst [vmem:[%s3361_s8 + $0x90] sm:$0xff] %v2015_v29  ;;  %2633 = vrsqrt.f32 %v3593_v11  ;;  %vm1530_vm11 = vcmp.eq.f32.partialorder %v3584_v60, 0.0  ;;  %v1531_v56 = vand.u32 2147483648, %v3584_v60  ;;  %v1684_v53 = vand.u32 2147483648, %v3593_v11 }
 0x2c1   : > { %v2616_v7 = vpop.eup %2615  ;;  %2635 = vrsqrt.f32 %v3609_v61  ;;  %v1893_v3 = vadd.f32 1.0, %v2614_v46  ;;  %v3668_v33 = vpop.xlane.xlu1 %1433  ;;  %vm1681_vm12 = vcmp.eq.f32.partialorder %v3593_v11, inf  ;;  %vm1688_vm13 = vcmp.eq.f32.partialorder %v3609_v61, inf }
 0x2c2   : > { %v2618_v40 = vpop.eup %2617  ;;  %v1950_v31 = vsel %vm1286_vm1, %v2616_v7, 1.0  ;;  %2637 = vrsqrt.f32 %v3619_v27  ;;  %vm1683_vm14 = vcmp.eq.f32.partialorder %v3593_v11, 0.0  ;;  %vm1535_vm15 = vcmp.eq.f32.partialorder %v3619_v27, inf }
 0x2c3   : > { %v2620_v21 = vpop.eup %2619  ;;  %v2014_v59 = vmul.f32 %v1950_v31, %v3174_v6  ;;  %2639 = vrsqrt.f32 %v3636_v1  ;;  %v1894_v39 = vadd.f32 1.0, %v2618_v40  ;;  %v1825_v17 = vpop.xlane.xlu0 %1824  ;;  %vm1690_vm2 = vcmp.eq.f32.partialorder %v3609_v61, 0.0 }
 0x2c4   : > { %v2622_v26 = vpop.eup %2621  ;;  %v1666_v12 = vmul.f32 %v2620_v21, %v3554_v62  ;;  %2641 = vrsqrt.f32 %v3650_v18  ;;  %vm1537_vm3 = vcmp.eq.f32.partialorder %v3619_v27, 0.0 }
 0x2c5   : > { %v2624_v44 = vpop.eup %2623  ;;  %v2046_v6 = vsel %vm1290_vm0, %v2610_v37, %v2014_v59  ;;  %v1673_v42 = vmul.f32 %v2622_v26, %v3564_v13  ;;  %2643 = vrcp.f32 %v1893_v3  ;;  %v1691_v37 = vand.u32 2147483648, %v3609_v61  ;;  %v1828_v30 = vpop.xlane.xlu1 %1827 }
 0x2c6   : > { %v2626_v43 = vpop.eup %2625  ;;  %2078 = vst [vmem:[%s3361_s8 + $0x88] sm:$0xff] %v2046_v6  ;;  %v1668_v2 = vsel %vm1667_vm4, %v3554_v62, %v1666_v12  ;;  %v1520_v57 = vmul.f32 %v2624_v44, %v3575_v16  ;;  %vm1542_vm4 = vcmp.eq.f32.partialorder %v3636_v1, inf }
 0x2c7   : > { %v2628_v24 = vpop.eup %2627  ;;  %v1952_v54 = vsel %vm1286_vm1, %v2626_v43, 1.0  ;;  %v1671_v58 = vsel %vm1669_vm5, %v1670_v52, %v1668_v2  ;;  %v1675_v55 = vsel %vm1674_vm6, %v3564_v13, %v1673_v42  ;;  %v1538_v52 = vand.u32 2147483648, %v3619_v27  ;;  %v1831_v43 = vpop.xlane.xlu0 %1830 }
 0x2c8   : > { %v2630_v50 = vpop.eup %2629  ;;  %v2016_v22 = vmul.f32 %v1952_v54, %v3182_v9  ;;  %v2017_v45 = vmul.f32 %v2628_v24, %v3191_v25  ;;  %v1717_v51 = vmax.f32 %v1671_v58, 1e-12  ;;  %v1678_v4 = vsel %vm1676_vm7, %v1677_v34, %v1675_v55 }
 0x2c9   : > { %v2632_v62 = vpop.eup %2631  ;;  %v2019_v23 = vmul.f32 %v2630_v50, %v3198_v19  ;;  %v1718_v15 = vmax.f32 %v1678_v4, 1e-12  ;;  %v1522_v14 = vsel %vm1521_vm8, %v3575_v16, %v1520_v57  ;;  %vm1544_vm5 = vcmp.eq.f32.partialorder %v3636_v1, 0.0 }
 0x2ca   : > { %v2634_v9 = vpop.eup %2633  ;;  %v2048_v25 = vsel %vm1290_vm0, %v3625_v28, %v2016_v22  ;;  %2081 = vst [vmem:[%s3361_s8 + $0xa0] sm:$0xff] %v2017_v45  ;;  %2645 = vrcp.f32 %v1717_v51  ;;  %v1525_v13 = vsel %vm1523_vm9, %v1524_v32, %v1522_v14  ;;  %v1527_v19 = vmul.f32 %v2632_v62, %v3584_v60 }
 0x2cb   : > { %v2636_v41 = vpop.eup %2635  ;;  %2080 = vst [vmem:[%s3361_s8 + $0x98] sm:$0xff] %v2048_v25  ;;  %2083 = vst [vmem:[%s3361_s8 + $0xb0] sm:$0xff] %v2019_v23  ;;  %2647 = vrcp.f32 %v1718_v15  ;;  %v1559_v0 = vmax.f32 %v1525_v13, 1e-12  ;;  %v1680_v28 = vmul.f32 %v2634_v9, %v3593_v11  ;;  %v2253_v32 = vmul.f32 -1.442695, %v1825_v17 }
 0x2cc   : > { %v2638_v29 = vpop.eup %2637  ;;  %v1529_v16 = vsel %vm1528_vm10, %v3584_v60, %v1527_v19  ;;  %2649 = vrsqrt.f32 %v3668_v33  ;;  %v1687_v34 = vmul.f32 %v2636_v41, %v3609_v61  ;;  %v1545_v60 = vand.u32 2147483648, %v3636_v1 }
 0x2cd   : > { %2651 = vrcp.f32 %v1559_v0  ;;  %v1532_v46 = vsel %vm1530_vm11, %v1531_v56, %v1529_v16  ;;  %v1534_v7 = vmul.f32 %v2638_v29, %v3619_v27  ;;  %v2640_v40 = vpop.eup %2639  ;;  %v1682_v26 = vsel %vm1681_vm12, %v3593_v11, %v1680_v28 }
 0x2ce   : > { %2653 = vrcp.f32 %v1894_v39  ;;  %v1560_v31 = vmax.f32 %v1532_v46, 1e-12  ;;  %v1541_v59 = vmul.f32 %v2640_v40, %v3636_v1  ;;  %v2642_v3 = vpop.eup %2641  ;;  %vm1695_vm6 = vcmp.eq.f32.partialorder %v3650_v18, inf }
 0x2cf   : > { %v1536_v21 = vsel %vm1535_vm15, %v3619_v27, %v1534_v7  ;;  %v2644_v44 = vpop.eup %2643  ;;  %v1694_v56 = vmul.f32 %v2642_v3, %v3650_v18  ;;  %v1689_v2 = vsel %vm1688_vm13, %v3609_v61, %v1687_v34  ;;  %vm1697_vm7 = vcmp.eq.f32.partialorder %v3650_v18, 0.0  ;;  %v1834_v27 = vpop.xlane.xlu1 %1833 }
 0x2d0   : > { %2655 = vrcp.f32 %v1560_v31  ;;  %v1539_v12 = vsel %vm1537_vm3, %v1538_v52, %v1536_v21  ;;  %v1543_v42 = vsel %vm1542_vm4, %v3636_v1, %v1541_v59  ;;  %v2254_v24 = vmul.f32 -1.442695, %v1828_v30 }
 0x2d1   : > { %v1561_v6 = vmax.f32 %v1539_v12, 1e-12  ;;  %v1546_v57 = vsel %vm1544_vm5, %v1545_v60, %v1543_v42  ;;  %v1685_v54 = vsel %vm1683_vm14, %v1684_v53, %v1682_v26  ;;  %v1698_v58 = vand.u32 2147483648, %v3650_v18 }
 0x2d2   : > { %v1562_v1 = vmax.f32 %v1546_v57, 1e-12  ;;  %v1696_v50 = vsel %vm1695_vm6, %v3650_v18, %v1694_v56  ;;  %vm1702_vm8 = vcmp.eq.f32.partialorder %v3668_v33, inf  ;;  %v2255_v22 = vmul.f32 -1.442695, %v1831_v43 }
 0x2d3   : > { %2657 = vrcp.f32 %v1561_v6  ;;  %v1692_v4 = vsel %vm1690_vm2, %v1691_v37, %v1689_v2  ;;  %v2256_v11 = vmul.f32 -1.442695, %v1834_v27  ;;  %v1719_v39 = vmax.f32 %v1685_v54, 1e-12 }
 0x2d4   : > { %v2646_v55 = vpop.eup %2645  ;;  %2659 = vpow2.f32 %v2253_v32  ;;  %v1699_v61 = vsel %vm1697_vm7, %v1698_v58, %v1696_v50  ;;  %v1705_v25 = vand.u32 2147483648, %v3668_v33  ;;  %v1720_v41 = vmax.f32 %v1692_v4, 1e-12 }
 0x2d5   : > { %v2648_v45 = vpop.eup %2647  ;;  %v1954_v51 = vsel %vm1286_vm1, %v2646_v55, 1.0  ;;  %2661 = vrcp.f32 %v1562_v1  ;;  %vm1704_vm9 = vcmp.eq.f32.partialorder %v3668_v33, 0.0 }
 0x2d6   : > { %v2650_v53 = vpop.eup %2649  ;;  %v2018_v62 = vmul.f32 %v1954_v51, %v3196_v20  ;;  %v1956_v23 = vsel %vm1286_vm1, %v2648_v45, 1.0  ;;  %2663 = vpow2.f32 %v2254_v24 }
 0x2d7   : > { %v2652_v15 = vpop.eup %2651  ;;  %v2020_v14 = vmul.f32 %v1956_v23, %v3200_v38  ;;  %v1701_v9 = vmul.f32 %v2650_v53, %v3668_v33  ;;  %2665 = vpow2.f32 %v2255_v22 }
 0x2d8   : > { %v2654_v13 = vpop.eup %2653  ;;  %v2050_v20 = vsel %vm1290_vm0, %v2644_v44, %v2018_v62  ;;  %v2021_v19 = vmul.f32 %v2652_v15, %v3217_v63  ;;  %2667 = vpow2.f32 %v2256_v11  ;;  %v1721_v63 = vmax.f32 %v1699_v61, 1e-12 }
 0x2d9   : > { %2082 = vst [vmem:[%s3361_s8 + $0xa8] sm:$0xff] %v2050_v20  ;;  %v2052_v38 = vsel %vm1290_vm0, %v2654_v13, %v2020_v14  ;;  %v1703_v18 = vsel %vm1702_vm8, %v3668_v33, %v1701_v9  ;;  %2669 = vrcp.f32 %v1719_v39 }
 0x2da   : > { %v2656_v0 = vpop.eup %2655  ;;  %2084 = vst [vmem:[%s3361_s8 + $0xb8] sm:$0xff] %v2052_v38  ;;  %2085 = vst [vmem:[%s3361_s8 + $0xc0] sm:$0xff] %v2021_v19  ;;  %v1706_v37 = vsel %vm1704_vm9, %v1705_v25, %v1703_v18  ;;  %2671 = vrcp.f32 %v1720_v41 }
 0x2db   : > { %v2023_v17 = vmul.f32 %v2656_v0, %v3226_v8  ;;  %v1722_v29 = vmax.f32 %v1706_v37, 1e-12  ;;  %2673 = vrcp.f32 %v1721_v63 }
 0x2dd   : > { %v2658_v16 = vpop.eup %2657  ;;  %2087 = vst [vmem:[%s3361_s8 + $0xd0] sm:$0xff] %v2023_v17  ;;  %2675 = vrcp.f32 %v1722_v29 }
 0x2de   : > { %v2660_v28 = vpop.eup %2659  ;;  %v2025_v30 = vmul.f32 %v2658_v16, %v3240_v35 }
 0x2df   : > { %v2662_v33 = vpop.eup %2661  ;;  %v1895_v46 = vadd.f32 1.0, %v2660_v28 }
 0x2e0   : > { %v2664_v7 = vpop.eup %2663  ;;  %2089 = vst [vmem:[%s3361_s8 + $0xe0] sm:$0xff] %v2025_v30  ;;  %v2027_v52 = vmul.f32 %v2662_v33, %v3250_v48 }
 0x2e1   : > { %2677 = vrcp.f32 %v1895_v46  ;;  %v1896_v40 = vadd.f32 1.0, %v2664_v7  ;;  %v2666_v31 = vpop.eup %2665 }
 0x2e2   : > { %2091 = vst [vmem:[%s3361_s8 + $0xf0] sm:$0xff] %v2027_v52  ;;  %v2668_v8 = vpop.eup %2667  ;;  %v1897_v34 = vadd.f32 1.0, %v2666_v31 }
 0x2e3   : > { %2679 = vrcp.f32 %v1896_v40  ;;  %v2670_v21 = vpop.eup %2669  ;;  %v1898_v59 = vadd.f32 1.0, %v2668_v8 }
 0x2e4   : > { %2681 = vrcp.f32 %v1897_v34  ;;  %v2672_v35 = vpop.eup %2671  ;;  %v1958_v60 = vsel %vm1286_vm1, %v2670_v21, 1.0 }
 0x2e5   : > { %2683 = vrcp.f32 %v1898_v59  ;;  %v2674_v3 = vpop.eup %2673  ;;  %v1960_v48 = vsel %vm1286_vm1, %v2672_v35, 1.0  ;;  %v2022_v12 = vmul.f32 %v1958_v60, %v3222_v5 }
 0x2e6   : > { %v1962_v44 = vsel %vm1286_vm1, %v2674_v3, 1.0  ;;  %v2024_v6 = vmul.f32 %v1960_v48, %v3228_v10 }
 0x2e7   : > { %v2676_v26 = vpop.eup %2675  ;;  %v2026_v2 = vmul.f32 %v1962_v44, %v3248_v47 }
 0x2e8   : > { %v1964_v42 = vsel %vm1286_vm1, %v2676_v26, 1.0 }
 0x2e9   : > { %v2028_v24 = vmul.f32 %v1964_v42, %v3254_v49 }
 0x2eb   : > { %v2678_v32 = vpop.eup %2677 }
 0x2ec   : > { %v2054_v56 = vsel %vm1290_vm0, %v2678_v32, %v2022_v12 }
 0x2ed   : > { %v2680_v43 = vpop.eup %2679  ;;  %2086 = vst [vmem:[%s3361_s8 + $0xc8] sm:$0xff] %v2054_v56 }
 0x2ee   : > { %v2056_v5 = vsel %vm1290_vm0, %v2680_v43, %v2024_v6  ;;  %v2682_v57 = vpop.eup %2681 }
 0x2ef   : > { %2088 = vst [vmem:[%s3361_s8 + $0xd8] sm:$0xff] %v2056_v5  ;;  %v2684_v27 = vpop.eup %2683  ;;  %v2058_v10 = vsel %vm1290_vm0, %v2682_v57, %v2026_v2 }
 0x2f0   : > { %2090 = vst [vmem:[%s3361_s8 + $0xe8] sm:$0xff] %v2058_v10  ;;  %v2060_v54 = vsel %vm1290_vm0, %v2684_v27, %v2028_v24 }
 0x2f1   : > { %2092 = vst [vmem:[%s3361_s8 + $0xf8] sm:$0xff] %v2060_v54 }
 0x2f2 PF: > { %s15_s18 = sadd.s32 1, %s2691_s18  }
 0x2f3   : > { %p12_p4 = scmp.ge.s32.totalorder %s15_s18, 6  }
 0x2f5   :  { %14 = sbr.rel (!%p12_p4) target bundleno = 1 (0x1), region = 70 }

// kernel: sub.13
= control target key start
LH: loop header
LB: loop body
LE: loop exit
PB: predicated region body
PF: predicated region fallthrough
CT: control target
= control target key end

     0   :  { %s34_s0 = inlined_call_operand.vmem [shape: f32[2,3], index: 0, kind: input, shape index: {}]   ;;  %s35_s1 = inlined_call_operand.vmem [shape: f32[2,3], index: 1, kind: input, shape index: {}]   ;;  %s36_s2 = inlined_call_operand.vmem [shape: f32[2,3], index: 2, kind: output, shape index: {}]  }
   0x1   :  { %v3_v0 = vld [vmem:[%s34_s0] sm:$0x3] }
   0x2   :  { %v4_v1 = vld [vmem:[%s35_s1] sm:$0x3] }
   0x3   :  { %v7_v2 = vsub.f32 %v3_v0, %v4_v1 }
   0x5   :  { %9 = vst [vmem:[%s36_s2] sm:$0x3] %v7_v2 }

</bundles_post_ra>
